<compile_context>
chip_gen: v7x
topology: tpu7x:2x2x1
jax: 0.10.0
libtpu: 0.0.40
codegen_flags: <defaults>
</compile_context>

<pallas_src>
import functools

import jax
import jax.numpy as jnp
from jax.experimental import pallas as pl
from jax.experimental.pallas import tpu as pltpu

_LANE = 128
_MiB = 1024 * 1024


def _round_up(v, m):
    return -(-v // m) * m


def _pick_tile(total, cap):
    """Largest multiple of 128 that divides `total` (a multiple of 128) and is <= max(cap, 128)."""
    t = max(_LANE, min(cap, total))
    t = (t // _LANE) * _LANE
    while total % t:
        t -= _LANE
    return t


def _tpu_config():
    """(num_tensorcores, vmem_capacity_bytes) with conservative fallbacks."""
    num_cores = 1
    vmem_cap = 64 * _MiB  # conservative (v7x per-TC); v5e/v6e have 128 MiB
    try:
        info = pltpu.get_tpu_info()
        for name in ("vmem_capacity_bytes", "vmem_bytes", "vmem_size_bytes"):
            v = getattr(info, name, None)
            if isinstance(v, int) and v > 0:
                vmem_cap = v
                break
        for name in ("num_tensorcores", "tensorcores_per_chip",
                     "num_tensor_cores", "num_cores", "cores_per_chip"):
            v = getattr(info, name, None)
            if isinstance(v, int) and v > 0:
                num_cores = v
                break
    except Exception:
        pass
    if num_cores == 1:
        try:
            v = getattr(jax.devices()[0], "num_cores", None)
            if isinstance(v, int) and v > 0:
                num_cores = v
        except Exception:
            pass
    return num_cores, vmem_cap


# ---------------------------------------------------------------------------
# Kernels
# ---------------------------------------------------------------------------
def _linear_oneshot_kernel(x_ref, w_ref, b_ref, o_ref):
    # x_ref: (B, Dp) f32, VMEM-resident; w_ref: (Dp, tn) bf16; b_ref: (1, tn) f32.
    # bf16 cast of x happens on the VPU, fully hidden under the W DMA.
    acc = jnp.dot(x_ref[...].astype(w_ref.dtype), w_ref[...],
                  preferred_element_type=jnp.float32)
    o_ref[...] = (acc + b_ref[...]).astype(o_ref.dtype)


def _linear_ktiled_kernel(x_ref, w_ref, b_ref, o_ref):
    # grid = (Np // tn, Dp // tk); axis 1 is the reduction axis.
    # Accumulate directly into the f32 output block (no scratch, no epilogue).
    k = pl.program_id(1)

    @pl.when(k == 0)
    def _():
        # Fold the bias into the accumulator init.
        o_ref[...] = jnp.broadcast_to(b_ref[...], o_ref.shape)

    o_ref[...] += jnp.dot(x_ref[...].astype(w_ref.dtype), w_ref[...],
                          preferred_element_type=jnp.float32)


# ---------------------------------------------------------------------------
# One-time parameter preparation (outside the hot path)
# ---------------------------------------------------------------------------
def prepare_linear_params(weight, bias, *, param_dtype=jnp.bfloat16):
    """weight: (num_labels, dim) f32, bias: (num_labels,) f32.

    Returns:
      w_p: (dim_p, labels_p) `param_dtype` -- transposed, zero-padded to lane multiples.
      b_p: (1, labels_p) f32 -- zero-padded.
    """
    num_labels, dim = weight.shape
    n_p = _round_up(num_labels, _LANE)
    d_p = _round_up(dim, _LANE)
    w_p = jnp.zeros((d_p, n_p), dtype=param_dtype)
    w_p = w_p.at[:dim, :num_labels].set(weight.T.astype(param_dtype))
    b_p = jnp.zeros((1, n_p), dtype=jnp.float32)
    b_p = b_p.at[0, :num_labels].set(bias.astype(jnp.float32))
    return w_p, b_p


# ---------------------------------------------------------------------------
# Forward
# ---------------------------------------------------------------------------
def linear_classifier_forward(x, w_p, b_p, num_labels, *,
                              tn_max=2048,
                              num_cores=None,
                              vmem_limit_bytes=None,
                              slice_output=True):
    """y = flatten(x) @ W.T + b, using pre-prepared (padded/transposed/bf16) params."""
    B = x.shape[0]
    x2 = x.reshape(B, -1)                                   # same as torch .view
    d_p, n_p = w_p.shape
    dim = x2.shape[1]
    assert dim <= d_p
    if dim != d_p:
        # Only taken when dim is not a multiple of 128 (DINO feature dims are);
        # otherwise this is a trace-time no-op and x flows straight into pallas_call.
        x2 = jnp.pad(x2, ((0, 0), (0, d_p - dim)))
    # NOTE: no per-call bf16 cast here -- the cast happens inside the kernel.

    # Generation-aware budgets.
    if num_cores is None or vmem_limit_bytes is None:
        det_cores, det_vmem = _tpu_config()
        if num_cores is None:
            num_cores = det_cores
        if vmem_limit_bytes is None:
            # ~48 MiB on v7x (64 MiB physical), ~96 MiB on v5e/v6e (128 MiB).
            vmem_limit_bytes = int(min((det_vmem * 3) // 4, 100 * _MiB))
    # Weight-panel budget leaves headroom for x / bias / output buffers + compiler scratch.
    weight_panel_budget = max(8 * _MiB, vmem_limit_bytes - 8 * _MiB)

    itemsize = jnp.dtype(w_p.dtype).itemsize

    # N tile: as large as possible.  Only force multiple blocks when there is
    # more than one TensorCore to genuinely split the weight stream across.
    tn_cap = tn_max
    if num_cores > 1 and n_p >= num_cores * _LANE:
        tn_cap = min(tn_cap, n_p // num_cores)
    tn = _pick_tile(n_p, tn_cap)
    use_core_parallel = num_cores > 1 and (n_p // tn) >= num_cores
    n_sem = pltpu.CORE_PARALLEL if use_core_parallel else pltpu.ARBITRARY

    out_shape = jax.ShapeDtypeStruct((B, n_p), jnp.float32)

    # VMEM estimate for the one-shot path (double-buffered inputs/outputs).
    fixed_bytes = 2 * (1 * tn * 4) + 2 * (B * tn * 4)       # bias + output
    oneshot_bytes = 2 * (d_p * tn * itemsize) + 2 * (B * d_p * 4) + fixed_bytes

    if oneshot_bytes <= weight_panel_budget:
        # Whole contraction dim fits: one-shot kernel, no reduction axis, no scratch.
        y_p = pl.pallas_call(
            _linear_oneshot_kernel,
            out_shape=out_shape,
            grid_spec=pltpu.PrefetchScalarGridSpec(
                num_scalar_prefetch=0,
                grid=(n_p // tn,),
                in_specs=[
                    pl.BlockSpec((B, d_p), lambda j: (0, 0)),   # x, VMEM-resident (f32)
                    pl.BlockSpec((d_p, tn), lambda j: (0, j)),  # W^T panel (bf16)
                    pl.BlockSpec((1, tn), lambda j: (0, j)),    # bias
                ],
                out_specs=pl.BlockSpec((B, tn), lambda j: (0, j)),
            ),
            compiler_params=pltpu.CompilerParams(
                dimension_semantics=(n_sem,),
                vmem_limit_bytes=vmem_limit_bytes,
            ),
        )(x2, w_p, b_p)
    else:
        # Very large dim: tile the contraction, sized to the VMEM budget.
        per_tk_bytes = 2 * tn * itemsize + 2 * B * 4        # W + x double buffers per K row
        tk_cap = max(
            _LANE,
            ((weight_panel_budget - fixed_bytes) // per_tk_bytes) // _LANE * _LANE,
        )
        tk = _pick_tile(d_p, tk_cap)
        y_p = pl.pallas_call(
            _linear_ktiled_kernel,
            out_shape=out_shape,
            grid_spec=pltpu.PrefetchScalarGridSpec(
                num_scalar_prefetch=0,
                grid=(n_p // tn, d_p // tk),
                in_specs=[
                    pl.BlockSpec((B, tk), lambda j, k: (0, k)),   # x tile (f32)
                    pl.BlockSpec((tk, tn), lambda j, k: (k, j)),  # W^T tile (bf16)
                    pl.BlockSpec((1, tn), lambda j, k: (0, j)),   # bias
                ],
                out_specs=pl.BlockSpec((B, tn), lambda j, k: (0, j)),
            ),
            compiler_params=pltpu.CompilerParams(
                dimension_semantics=(n_sem, pltpu.ARBITRARY),
                vmem_limit_bytes=vmem_limit_bytes,
            ),
        )(x2, w_p, b_p)

    # slice_output=False lets the consumer take the padded (B, n_p) logits and
    # mask/slice downstream, saving one per-call epilogue fusion.
    if slice_output and num_labels != n_p:
        return y_p[:, :num_labels]
    return y_p


if __name__ == "__main__":
    # Small shapes consistent with the module: frozen feature map (B, C, H, W)
    # flattened to dim = C*H*W, classified into num_labels (module default 1000,
    # which exercises the lane-padding path).
    B, C, H, W = 2, 4, 16, 16          # dim = 1024
    dim = C * H * W
    num_labels = 1000

    key = jax.random.PRNGKey(0)
    kx, kw = jax.random.split(key)

    x = jax.random.normal(kx, (B, C, H, W), dtype=jnp.float32)

    # Deterministic init mirroring the PyTorch module: weight ~ N(0, 0.01), bias = 0.
    weight = 0.01 * jax.random.normal(kw, (num_labels, dim), dtype=jnp.float32)
    bias = jnp.zeros((num_labels,), dtype=jnp.float32)

    # One-time setup: transpose + pad + bf16-cast the parameters (not in hot path).
    w_p, b_p = prepare_linear_params(weight, bias)

    fwd = jax.jit(functools.partial(linear_classifier_forward, num_labels=num_labels))
    try:
        y = jax.block_until_ready(fwd(x, w_p, b_p))
    except Exception:
        # Safety net: if CORE_PARALLEL codegen is rejected on this chip, fall
        # back to single-core tiling (largest panels, serial grid).
        fwd = jax.jit(functools.partial(linear_classifier_forward,
                                        num_labels=num_labels, num_cores=1))
        y = jax.block_until_ready(fwd(x, w_p, b_p))
    assert y.shape == (B, num_labels)

    # Strict check against the exact arithmetic the kernel performs
    # (bf16 inputs, f32 accumulation).
    x2 = x.reshape(B, -1)
    x_bf = x2.astype(jnp.bfloat16).astype(jnp.float32)
    w_bf = w_p.astype(jnp.float32)[:dim, :num_labels]
    y_exact = jnp.dot(x_bf, w_bf, precision=jax.lax.Precision.HIGHEST) + bias
    assert jnp.allclose(y, y_exact, atol=1e-3, rtol=1e-3)

    # Loose check against the original f32 module semantics (bf16 weight cast).
    y_ref = x2 @ weight.T + bias
    assert jnp.allclose(y, y_ref, atol=3e-2, rtol=3e-2)

    print("KERNEL_OK")
</pallas_src>

<mosaic_0001>
module attributes {stable_mosaic.version = 11 : i64} {
  func.func @_linear_oneshot_kernel(%arg0: i32, %arg1: memref<2x1024xf32, #tpu.memory_space<vmem>>, %arg2: memref<1024x1024xbf16, #tpu.memory_space<vmem>>, %arg3: memref<1x1024xf32, #tpu.memory_space<vmem>>, %arg4: memref<2x1024xf32, #tpu.memory_space<vmem>>) attributes {dimension_semantics = [#tpu.dimension_semantics<arbitrary>], iteration_bounds = array<i64: 1>, scalar_prefetch = 0 : i64, scratch_operands = 0 : i64, tpu.core_type = #tpu.core_type<tc>, window_params = [{pipeline_mode = #tpu.pipeline_mode<synchronous>, transform_indices = @transform_0, window_bounds = array<i64: 2, 1024>}, {transform_indices = @transform_1, window_bounds = array<i64: 1024, 1024>}, {transform_indices = @transform_2, window_bounds = array<i64: 1, 1024>}, {transform_indices = @transform_3, window_bounds = array<i64: 2, 1024>}]} {
    %c0 = arith.constant 0 : index
    %c0_0 = arith.constant 0 : index
    %0 = vector.load %arg1[%c0, %c0_0] : memref<2x1024xf32, #tpu.memory_space<vmem>>, vector<2x1024xf32>
    %1 = arith.truncf %0 : vector<2x1024xf32> to vector<2x1024xbf16>
    %c0_1 = arith.constant 0 : index
    %c0_2 = arith.constant 0 : index
    %2 = vector.load %arg2[%c0_1, %c0_2] : memref<1024x1024xbf16, #tpu.memory_space<vmem>>, vector<1024x1024xbf16>
    %cst = arith.constant dense<0.000000e+00> : vector<2x1024xf32>
    %3 = tpu.matmul %1, %2, %cst {dimension_numbers = #tpu.dot_dimension_numbers<[1], [0], [0], [1], [0, 0, 1, 1], [], []>} : vector<2x1024xbf16>, vector<1024x1024xbf16>, vector<2x1024xf32> -> vector<2x1024xf32>
    %c0_3 = arith.constant 0 : index
    %c0_4 = arith.constant 0 : index
    %4 = vector.load %arg3[%c0_3, %c0_4] : memref<1x1024xf32, #tpu.memory_space<vmem>>, vector<1x1024xf32>
    %5 = vector.broadcast %4 : vector<1x1024xf32> to vector<2x1024xf32>
    %6 = arith.addf %3, %5 : vector<2x1024xf32>
    %c0_5 = arith.constant 0 : index
    %c0_6 = arith.constant 0 : index
    %7 = vector.load %arg4[%c0_5, %c0_6] : memref<2x1024xf32, #tpu.memory_space<vmem>>, vector<2x1024xf32>
    tpu.vector_store %arg4[%c0_5, %c0_6], %6 {strides = array<i32>} : memref<2x1024xf32, #tpu.memory_space<vmem>>, vector<2x1024xf32>,
    return
  }
  func.func @transform_0(%arg0: i32) -> (i32, i32) {
    %c0_i32 = arith.constant 0 : i32
    %c0_i32_0 = arith.constant 0 : i32
    %c0_i32_1 = arith.constant 0 : i32
    return %c0_i32, %c0_i32_0 : i32, i32
  }
  func.func @transform_1(%arg0: i32) -> (i32, i32) {
    %c0_i32 = arith.constant 0 : i32
    %c0_i32_0 = arith.constant 0 : i32
    return %c0_i32, %arg0 : i32, i32
  }
  func.func @transform_2(%arg0: i32) -> (i32, i32) {
    %c0_i32 = arith.constant 0 : i32
    %c0_i32_0 = arith.constant 0 : i32
    return %c0_i32, %arg0 : i32, i32
  }
  func.func @transform_3(%arg0: i32) -> (i32, i32) {
    %c0_i32 = arith.constant 0 : i32
    %c0_i32_0 = arith.constant 0 : i32
    return %c0_i32, %arg0 : i32, i32
  }
}

module attributes {stable_mosaic.version = 11 : i64} {
  func.func @_linear_oneshot_kernel(%arg0: i32, %arg1: memref<2x1024xf32, #tpu.memory_space<vmem>>, %arg2: memref<1024x1024xbf16, #tpu.memory_space<vmem>>, %arg3: memref<1x1024xf32, #tpu.memory_space<vmem>>, %arg4: memref<2x1024xf32, #tpu.memory_space<vmem>>) attributes {dimension_semantics = [#tpu.dimension_semantics<arbitrary>], iteration_bounds = array<i64: 1>, scalar_prefetch = 0 : i64, scratch_operands = 0 : i64, tpu.core_type = #tpu.core_type<tc>, window_params = [{pipeline_mode = #tpu.pipeline_mode<synchronous>, transform_indices = @transform_0, window_bounds = array<i64: 2, 1024>}, {transform_indices = @transform_1, window_bounds = array<i64: 1024, 1024>}, {transform_indices = @transform_2, window_bounds = array<i64: 1, 1024>}, {transform_indices = @transform_3, window_bounds = array<i64: 2, 1024>}]} {
    %c0 = arith.constant 0 : index
    %c0_0 = arith.constant 0 : index
    %0 = vector.load %arg1[%c0, %c0_0] : memref<2x1024xf32, #tpu.memory_space<vmem>>, vector<2x1024xf32>
    %1 = arith.truncf %0 : vector<2x1024xf32> to vector<2x1024xbf16>
    %c0_1 = arith.constant 0 : index
    %c0_2 = arith.constant 0 : index
    %2 = vector.load %arg2[%c0_1, %c0_2] : memref<1024x1024xbf16, #tpu.memory_space<vmem>>, vector<1024x1024xbf16>
    %cst = arith.constant dense<0.000000e+00> : vector<2x1024xf32>
    %3 = tpu.matmul %1, %2, %cst {dimension_numbers = #tpu.dot_dimension_numbers<[1], [0], [0], [1], [0, 0, 1, 1], [], []>} : vector<2x1024xbf16>, vector<1024x1024xbf16>, vector<2x1024xf32> -> vector<2x1024xf32>
    %c0_3 = arith.constant 0 : index
    %c0_4 = arith.constant 0 : index
    %4 = vector.load %arg3[%c0_3, %c0_4] : memref<1x1024xf32, #tpu.memory_space<vmem>>, vector<1x1024xf32>
    %5 = vector.broadcast %4 : vector<1x1024xf32> to vector<2x1024xf32>
    %6 = arith.addf %3, %5 : vector<2x1024xf32>
    %c0_5 = arith.constant 0 : index
    %c0_6 = arith.constant 0 : index
    %7 = vector.load %arg4[%c0_5, %c0_6] : memref<2x1024xf32, #tpu.memory_space<vmem>>, vector<2x1024xf32>
    tpu.vector_store %arg4[%c0_5, %c0_6], %6 {strides = array<i32>} : memref<2x1024xf32, #tpu.memory_space<vmem>>, vector<2x1024xf32>,
    return
  }
  func.func @transform_0(%arg0: i32) -> (i32, i32) {
    %c0_i32 = arith.constant 0 : i32
    %c0_i32_0 = arith.constant 0 : i32
    %c0_i32_1 = arith.constant 0 : i32
    return %c0_i32, %c0_i32_0 : i32, i32
  }
  func.func @transform_1(%arg0: i32) -> (i32, i32) {
    %c0_i32 = arith.constant 0 : i32
    %c0_i32_0 = arith.constant 0 : i32
    return %c0_i32, %arg0 : i32, i32
  }
  func.func @transform_2(%arg0: i32) -> (i32, i32) {
    %c0_i32 = arith.constant 0 : i32
    %c0_i32_0 = arith.constant 0 : i32
    return %c0_i32, %arg0 : i32, i32
  }
  func.func @transform_3(%arg0: i32) -> (i32, i32) {
    %c0_i32 = arith.constant 0 : i32
    %c0_i32_0 = arith.constant 0 : i32
    return %c0_i32, %arg0 : i32, i32
  }
}

</mosaic_0001>

<bundles_post_ra>
// kernel: linear_classifier_forward.1
= control target key start
LH: loop header
LB: loop body
LE: loop exit
PB: predicated region body
PF: predicated region fallthrough
CT: control target
= control target key end

     0   :  { %8 = vsyncpa [#allocation3], 0  ;;  %s4756_s0 = inlined_call_operand.vmem [shape: f32[2,1024], index: 0, kind: input, shape index: {}]   ;;  %s4757_s1 = inlined_call_operand.hbm [shape: bf16[1024,1024], index: 1, kind: input, shape index: {}]   ;;  %s4758_s2 = inlined_call_operand.hbm [shape: f32[1,1024], index: 2, kind: input, shape index: {}]   ;;  %s4759_s3 = inlined_call_operand.hbm [shape: f32[2,1024], index: 3, kind: output, shape index: {}]  }
   0x1   :  { %9 = vsyncpa [#allocation6], 0 }
   0x2   :  { %10 = vsyncpa [#allocation4], 0  ;;  %s4575_s12 = smov [#allocation2]   ;;  %s4503_s16 = scalar_lea.hbm %s4757_s1, 65536 }
   0x3   :  { %s18_s13 = sshll.u32 %s4575_s12, 4  ;;  %p4504_p0 = scmp.ne.s32.totalorder %s4757_s1, %s4503_s16  ;;  %s19_s13 = int_to_ptr.vmem [resolvable:$true] %s18_s13 }
   0x4   :  { %p4507_p1 = scmp.lt.u32.totalorder %s4503_s16, %s4757_s1 }
   0x6   :  { %p4509_p2 = pnand %p4507_p1, %p4504_p0 }
   0x8   :  { %4512 = shalt.err (!%p4509_p2)
}
   0x9   :  { %s4513_s21 = scalar_lea.vmem %s19_s13, 65536  ;;  %p4518_p4 = scmp.lt.s32.totalorder %s19_s13, %s19_s13 }
   0xa   :  { %p4514_p3 = scmp.ne.s32.totalorder %s19_s13, %s4513_s21  ;;  %p4519_p5 = scmp.lt.s32.totalorder %s4513_s21, %s4513_s21 }
   0xc   :  { %p4520_p6 = por %p4519_p5, %p4518_p4 }
   0xe   :  { %p4521_p7 = pnand %p4520_p6, %p4514_p3 }
  0x10   :  { %4524 = shalt.err (!%p4521_p7)
}
  0x11   :  { %s4576_s22 = smov 512   ;;  %s4577_s23 = smov 32  }
  0x12   :  { %24 = dma.hbm_to_vmem [thread:$0]  %s4757_s1, 65536, %s19_s13, [#allocation3], %s4576_s22, %s4576_s22, %s4577_s23  }
  0x13   :  { %s4578_s26 = smov [#allocation5]   ;;  %s4525_s30 = scalar_lea.hbm %s4758_s2, 128 }
  0x14   :  { %s31_s27 = sshll.u32 %s4578_s26, 4  ;;  %p4526_p8 = scmp.ne.s32.totalorder %s4758_s2, %s4525_s30  ;;  %s32_s27 = int_to_ptr.vmem [resolvable:$true] %s31_s27 }
  0x15   :  { %p4529_p9 = scmp.lt.u32.totalorder %s4525_s30, %s4758_s2 }
  0x17   :  { %p4531_p10 = pnand %p4529_p9, %p4526_p8 }
  0x19   :  { %4534 = shalt.err (!%p4531_p10)
}
  0x1a   :  { %s4535_s8 = scalar_lea.vmem %s32_s27, 128  ;;  %p4540_p12 = scmp.lt.s32.totalorder %s32_s27, %s32_s27 }
  0x1b   :  { %p4536_p11 = scmp.ne.s32.totalorder %s32_s27, %s4535_s8  ;;  %p4541_p13 = scmp.lt.s32.totalorder %s4535_s8, %s4535_s8 }
  0x1d   :  { %p4542_p0 = por %p4541_p13, %p4540_p12 }
  0x1f   :  { %p4543_p1 = pnand %p4542_p0, %p4536_p11 }
  0x21   :  { %4546 = shalt.err (!%p4543_p1)
}
  0x22   :  { %34 = dma.hbm_to_vmem [thread:$0]  %s4758_s2, 128, %s32_s27, [#allocation6]  }
  0x23   :  { %4569 = dma.done.wait [#allocation3], 65536  }
  0x24   :  { %4570 = vsyncadd [#allocation3], 4294901760 }
  0x25   :  { %4571 = dma.done.wait [#allocation6], 128  }
  0x26   :  { %4572 = vsyncadd [#allocation6], 4294967168  ;;  %v95_v0 = vld [vmem:[#allocation2] sm:$0xff]  ;;  %v96_v2 = vld [vmem:[#allocation2 + $0x8] sm:$0xff]  ;;  %v4579_v32 = vmov 1983009808   ;;  %v49_v34 = vlaneseq }
  0x27   :  { %v99_v1 = vld [vmem:[#allocation2 + $0x20] sm:$0xff]  ;;  %v100_v4 = vld [vmem:[#allocation2 + $0x28] sm:$0xff]  ;;  %v47_v33 = vunpack.c.l.s4 %v4579_v32 }
  0x28   :  { %v3928_v3 = vcombine.high %v95_v0, %v99_v1  ;;  %v3927_v5 = vcombine.low %v95_v0, %v99_v1  ;;  %v103_v6 = vld [vmem:[#allocation2 + $0x40] sm:$0xff]  ;;  %v3930_v8 = vcombine.high %v96_v2, %v100_v4  ;;  %v3929_v9 = vcombine.low %v96_v2, %v100_v4  ;;  %v104_v11 = vld [vmem:[#allocation2 + $0x48] sm:$0xff] }
  0x29   :  { %v107_v7 = vld [vmem:[#allocation2 + $0x60] sm:$0xff]  ;;  %v108_v12 = vld [vmem:[#allocation2 + $0x68] sm:$0xff]  ;;  %v48_v43 = vunpack.c.0.s8 %v47_v33  ;;  %v4625_v44 = vshrl.u32 %v49_v34, 7 }
  0x2a   :  { %v3936_v10 = vcombine.high %v103_v6, %v107_v7  ;;  %v111_v13 = vld [vmem:[#allocation2 + $0x80] sm:$0xff]  ;;  %3209 = vmatprep.subr.bf16.mxu0 %v3928_v3  ;;  %v3938_v14 = vcombine.high %v104_v11, %v108_v12  ;;  %v112_v16 = vld [vmem:[#allocation2 + $0x88] sm:$0xff]  ;;  %3373 = vmatprep.subr.bf16.mxu1 %v3930_v8  ;;  %v3935_v18 = vcombine.low %v103_v6, %v107_v7 }
  0x2b   :  { %v115_v15 = vld [vmem:[#allocation2 + $0xa0] sm:$0xff]  ;;  %v116_v17 = vld [vmem:[#allocation2 + $0xa8] sm:$0xff]  ;;  %3210 = vmatpush1.bf16.msra.mxu0 %v3927_v5  ;;  %3374 = vmatpush1.bf16.msra.mxu1 %v3929_v9  ;;  %v3937_v19 = vcombine.low %v104_v11, %v108_v12  ;;  %v4628_v53 = vsub.s32 %v48_v43, %v4625_v44 }
  0x2c   :  { %3211 = vmatprep.subr.bf16.mxu0 %v3936_v10  ;;  %v3944_v20 = vcombine.high %v111_v13, %v115_v15  ;;  %3375 = vmatprep.subr.bf16.mxu1 %v3938_v14  ;;  %v3946_v21 = vcombine.high %v112_v16, %v116_v17  ;;  %v119_v22 = vld [vmem:[#allocation2 + $0xc0] sm:$0xff]  ;;  %v120_v24 = vld [vmem:[#allocation2 + $0xc8] sm:$0xff]  ;;  %v3943_v26 = vcombine.low %v111_v13, %v115_v15 }
  0x2d   :  { %v123_v23 = vld [vmem:[#allocation2 + $0xe0] sm:$0xff]  ;;  %v124_v25 = vld [vmem:[#allocation2 + $0xe8] sm:$0xff]  ;;  %v3945_v27 = vcombine.low %v112_v16, %v116_v17 }
  0x2e   :  { %v3952_v28 = vcombine.high %v119_v22, %v123_v23  ;;  %v3954_v29 = vcombine.high %v120_v24, %v124_v25  ;;  %v127_v30 = vld [vmem:[#allocation2 + $0x100] sm:$0xff]  ;;  %v128_v35 = vld [vmem:[#allocation2 + $0x108] sm:$0xff]  ;;  %v3951_v37 = vcombine.low %v119_v22, %v123_v23  ;;  %v3953_v38 = vcombine.low %v120_v24, %v124_v25 }
  0x2f   :  { %3212 = vmatpush1.bf16.msra.mxu0 %v3935_v18  ;;  %3376 = vmatpush1.bf16.msra.mxu1 %v3937_v19  ;;  %v131_v31 = vld [vmem:[#allocation2 + $0x120] sm:$0xff]  ;;  %v132_v36 = vld [vmem:[#allocation2 + $0x128] sm:$0xff] }
  0x30   :  { %3213 = vmatprep.subr.bf16.mxu0 %v3944_v20  ;;  %3377 = vmatprep.subr.bf16.mxu1 %v3946_v21  ;;  %v3960_v39 = vcombine.high %v127_v30, %v131_v31  ;;  %v3962_v40 = vcombine.high %v128_v35, %v132_v36  ;;  %v135_v41 = vld [vmem:[#allocation2 + $0x140] sm:$0xff]  ;;  %v136_v45 = vld [vmem:[#allocation2 + $0x148] sm:$0xff]  ;;  %v3959_v47 = vcombine.low %v127_v30, %v131_v31 }
  0x31   :  { %v139_v42 = vld [vmem:[#allocation2 + $0x160] sm:$0xff]  ;;  %v140_v46 = vld [vmem:[#allocation2 + $0x168] sm:$0xff]  ;;  %v3961_v48 = vcombine.low %v128_v35, %v132_v36 }
  0x32   :  { %v3968_v49 = vcombine.high %v135_v41, %v139_v42  ;;  %v3970_v50 = vcombine.high %v136_v45, %v140_v46  ;;  %v143_v51 = vld [vmem:[#allocation2 + $0x180] sm:$0xff]  ;;  %v144_v54 = vld [vmem:[#allocation2 + $0x188] sm:$0xff]  ;;  %v3967_v56 = vcombine.low %v135_v41, %v139_v42  ;;  %v3969_v57 = vcombine.low %v136_v45, %v140_v46 }
  0x33   :  { %3214 = vmatpush1.bf16.msra.mxu0 %v3943_v26  ;;  %3378 = vmatpush1.bf16.msra.mxu1 %v3945_v27  ;;  %v147_v52 = vld [vmem:[#allocation2 + $0x1a0] sm:$0xff]  ;;  %v148_v55 = vld [vmem:[#allocation2 + $0x1a8] sm:$0xff] }
  0x34   :  { %3215 = vmatprep.subr.bf16.mxu0 %v3952_v28  ;;  %3379 = vmatprep.subr.bf16.mxu1 %v3954_v29  ;;  %v3976_v58 = vcombine.high %v143_v51, %v147_v52  ;;  %v4633_v59 = vld [vmem:[%s4756_s0] sm:$0xff]  ;;  %v3978_v60 = vcombine.high %v144_v54, %v148_v55  ;;  %v152_v0 = vld [vmem:[#allocation2 + $0x1c8] sm:$0xff]  ;;  %v3975_v2 = vcombine.low %v143_v51, %v147_v52 }
  0x35   :  { %v151_v61 = vld [vmem:[#allocation2 + $0x1c0] sm:$0xff]  ;;  %v4637_v63 = vrot.slane %v4633_v59, %v4628_v53  ;;  %v156_v1 = vld [vmem:[#allocation2 + $0x1e8] sm:$0xff]  ;;  %v3977_v4 = vcombine.low %v144_v54, %v148_v55 }
  0x36   :  { %v155_v62 = vld [vmem:[#allocation2 + $0x1e0] sm:$0xff]  ;;  %v3986_v6 = vcombine.high %v152_v0, %v156_v1  ;;  %v160_v10 = vld [vmem:[#allocation2 + $0x208] sm:$0xff]  ;;  %v3985_v13 = vcombine.low %v152_v0, %v156_v1 }
  0x37   :  { %3216 = vmatpush1.bf16.msra.mxu0 %v3951_v37  ;;  %3380 = vmatpush1.bf16.msra.mxu1 %v3953_v38  ;;  %v60_v3 = vcombine.high %v4637_v63, %v4637_v63  ;;  %v3984_v5 = vcombine.high %v151_v61, %v155_v62  ;;  %v159_v7 = vld [vmem:[#allocation2 + $0x200] sm:$0xff]  ;;  %v164_v11 = vld [vmem:[#allocation2 + $0x228] sm:$0xff]  ;;  %v3983_v12 = vcombine.low %v151_v61, %v155_v62 }
  0x38   :  { %3217 = vmatprep.subr.bf16.mxu0 %v3960_v39  ;;  %3381 = vmatprep.subr.bf16.mxu1 %v3962_v40  ;;  %v163_v8 = vld [vmem:[#allocation2 + $0x220] sm:$0xff]  ;;  %v3994_v15 = vcombine.high %v160_v10, %v164_v11  ;;  %v168_v18 = vld [vmem:[#allocation2 + $0x248] sm:$0xff]  ;;  %v3993_v21 = vcombine.low %v160_v10, %v164_v11 }
  0x39   :  { %v4641_v9 = vpack.c.bf16 %v60_v3, %v60_v3  ;;  %v3992_v14 = vcombine.high %v159_v7, %v163_v8  ;;  %v167_v16 = vld [vmem:[#allocation2 + $0x240] sm:$0xff]  ;;  %v172_v19 = vld [vmem:[#allocation2 + $0x268] sm:$0xff]  ;;  %v3991_v20 = vcombine.low %v159_v7, %v163_v8 }
  0x3a   :  { %v171_v17 = vld [vmem:[#allocation2 + $0x260] sm:$0xff]  ;;  %v4002_v23 = vcombine.high %v168_v18, %v172_v19  ;;  %v176_v26 = vld [vmem:[#allocation2 + $0x288] sm:$0xff]  ;;  %v4001_v29 = vcombine.low %v168_v18, %v172_v19 }
  0x3b   :  { %3218 = vmatpush1.bf16.msra.mxu0 %v3959_v47  ;;  %3382 = vmatpush1.bf16.msra.mxu1 %v3961_v48  ;;  %v4000_v22 = vcombine.high %v167_v16, %v171_v17  ;;  %v175_v24 = vld [vmem:[#allocation2 + $0x280] sm:$0xff]  ;;  %v180_v27 = vld [vmem:[#allocation2 + $0x2a8] sm:$0xff]  ;;  %v3999_v28 = vcombine.low %v167_v16, %v171_v17 }
  0x3c   :  { %3219 = vmatprep.subr.bf16.mxu0 %v3968_v49  ;;  %3383 = vmatprep.subr.bf16.mxu1 %v3970_v50  ;;  %v179_v25 = vld [vmem:[#allocation2 + $0x2a0] sm:$0xff]  ;;  %v4010_v31 = vcombine.high %v176_v26, %v180_v27  ;;  %v184_v34 = vld [vmem:[#allocation2 + $0x2c8] sm:$0xff]  ;;  %v4009_v37 = vcombine.low %v176_v26, %v180_v27 }
  0x3d   :  { %3241 = vmatprep.mubr.bf16.mxu0 %v4641_v9  ;;  %3405 = vmatprep.mubr.bf16.mxu1 %v4641_v9  ;;  %v4008_v30 = vcombine.high %v175_v24, %v179_v25  ;;  %v183_v32 = vld [vmem:[#allocation2 + $0x2c0] sm:$0xff]  ;;  %v188_v35 = vld [vmem:[#allocation2 + $0x2e8] sm:$0xff]  ;;  %v4007_v36 = vcombine.low %v175_v24, %v179_v25  ;;  %v4654_v25 = vpack.c.bf16 %v4637_v63, %v4637_v63 }
  0x3e   :  { %v187_v33 = vld [vmem:[#allocation2 + $0x2e0] sm:$0xff]  ;;  %v4018_v39 = vcombine.high %v184_v34, %v188_v35  ;;  %v192_v42 = vld [vmem:[#allocation2 + $0x308] sm:$0xff]  ;;  %v4017_v46 = vcombine.low %v184_v34, %v188_v35 }
  0x3f   :  { %3220 = vmatpush1.bf16.msra.mxu0 %v3967_v56  ;;  %3384 = vmatpush1.bf16.msra.mxu1 %v3969_v57  ;;  %v4016_v38 = vcombine.high %v183_v32, %v187_v33  ;;  %v191_v40 = vld [vmem:[#allocation2 + $0x300] sm:$0xff]  ;;  %v196_v43 = vld [vmem:[#allocation2 + $0x328] sm:$0xff]  ;;  %v4015_v45 = vcombine.low %v183_v32, %v187_v33 }
  0x40   :  { %3221 = vmatprep.subr.bf16.mxu0 %v3976_v58  ;;  %3385 = vmatprep.subr.bf16.mxu1 %v3978_v60  ;;  %v195_v41 = vld [vmem:[#allocation2 + $0x320] sm:$0xff]  ;;  %v4026_v48 = vcombine.high %v192_v42, %v196_v43  ;;  %v200_v51 = vld [vmem:[#allocation2 + $0x348] sm:$0xff]  ;;  %v4025_v55 = vcombine.low %v192_v42, %v196_v43 }
  0x41   :  { %v4024_v47 = vcombine.high %v191_v40, %v195_v41  ;;  %v199_v49 = vld [vmem:[#allocation2 + $0x340] sm:$0xff]  ;;  %v204_v52 = vld [vmem:[#allocation2 + $0x368] sm:$0xff]  ;;  %v4023_v54 = vcombine.low %v191_v40, %v195_v41 }
  0x42   :  { %v203_v50 = vld [vmem:[#allocation2 + $0x360] sm:$0xff]  ;;  %v4034_v57 = vcombine.high %v200_v51, %v204_v52  ;;  %v208_v61 = vld [vmem:[#allocation2 + $0x388] sm:$0xff]  ;;  %v4033_v1 = vcombine.low %v200_v51, %v204_v52 }
  0x43   :  { %3222 = vmatpush1.bf16.msra.mxu0 %v3975_v2  ;;  %3386 = vmatpush1.bf16.msra.mxu1 %v3977_v4  ;;  %v4032_v56 = vcombine.high %v199_v49, %v203_v50  ;;  %v207_v58 = vld [vmem:[#allocation2 + $0x380] sm:$0xff]  ;;  %v212_v62 = vld [vmem:[#allocation2 + $0x3a8] sm:$0xff]  ;;  %v4031_v0 = vcombine.low %v199_v49, %v203_v50 }
  0x44   :  { %3223 = vmatprep.subr.bf16.mxu0 %v3984_v5  ;;  %3387 = vmatprep.subr.bf16.mxu1 %v3986_v6  ;;  %v211_v60 = vld [vmem:[#allocation2 + $0x3a0] sm:$0xff]  ;;  %v4042_v3 = vcombine.high %v208_v61, %v212_v62  ;;  %v45_v6 = vcombine.high %v4633_v59, %v4633_v59  ;;  %v216_v7 = vld [vmem:[#allocation2 + $0x3c8] sm:$0xff]  ;;  %v4041_v11 = vcombine.low %v208_v61, %v212_v62 }
  0x45   :  { %v4040_v2 = vcombine.high %v207_v58, %v211_v60  ;;  %v215_v4 = vld [vmem:[#allocation2 + $0x3c0] sm:$0xff]  ;;  %v220_v8 = vld [vmem:[#allocation2 + $0x3e8] sm:$0xff]  ;;  %v4039_v10 = vcombine.low %v207_v58, %v211_v60 }
  0x46   :  { %v219_v5 = vld [vmem:[#allocation2 + $0x3e0] sm:$0xff]  ;;  %v4648_v16 = vrot.slane %v45_v6, %v4628_v53  ;;  %v224_v17 = vld [vmem:[#allocation2 + $0x408] sm:$0xff]  ;;  %v4049_v59 = vcombine.low %v216_v7, %v220_v8 }
  0x47   :  { %3224 = vmatpush1.bf16.msra.mxu0 %v3983_v12  ;;  %3388 = vmatpush1.bf16.msra.mxu1 %v3985_v13  ;;  %v4048_v12 = vcombine.high %v215_v4, %v219_v5  ;;  %v4050_v13 = vcombine.high %v216_v7, %v220_v8  ;;  %v228_v18 = vld [vmem:[#allocation2 + $0x428] sm:$0xff]  ;;  %v4047_v19 = vcombine.low %v215_v4, %v219_v5  ;;  %v239_v32 = vld [vmem:[#allocation2 + $0x480] sm:$0xff] }
  0x48   :  { %3225 = vmatprep.subr.bf16.mxu0 %v3992_v14  ;;  %3389 = vmatprep.subr.bf16.mxu1 %v3994_v15  ;;  %v223_v14 = vld [vmem:[#allocation2 + $0x400] sm:$0xff]  ;;  %v61_v24 = vcombine.high %v4648_v16, %v4648_v16  ;;  %v232_v26 = vld [vmem:[#allocation2 + $0x448] sm:$0xff] }
  0x49   :  { %v227_v15 = vld [vmem:[#allocation2 + $0x420] sm:$0xff]  ;;  %v236_v27 = vld [vmem:[#allocation2 + $0x468] sm:$0xff] }
  0x4a   :  { %v243_v33 = vld [vmem:[#allocation2 + $0x4a0] sm:$0xff]  ;;  %v4656_v34 = vpack.c.bf16 %v61_v24, %v61_v24  ;;  %v240_v35 = vld [vmem:[#allocation2 + $0x488] sm:$0xff] }
  0x4b   :  { %3226 = vmatpush1.bf16.msra.mxu0 %v3991_v20  ;;  %3390 = vmatpush1.bf16.msra.mxu1 %v3993_v21  ;;  %v4056_v20 = vcombine.high %v223_v14, %v227_v15  ;;  %v4058_v21 = vcombine.high %v224_v17, %v228_v18  ;;  %v247_v40 = vld [vmem:[#allocation2 + $0x4c0] sm:$0xff]  ;;  %v248_v42 = vld [vmem:[#allocation2 + $0x4c8] sm:$0xff] }
  0x4c   :  { %3227 = vmatprep.subr.bf16.mxu0 %v4000_v22  ;;  %3391 = vmatprep.subr.bf16.mxu1 %v4002_v23  ;;  %v231_v22 = vld [vmem:[#allocation2 + $0x440] sm:$0xff]  ;;  %v252_v43 = vld [vmem:[#allocation2 + $0x4e8] sm:$0xff] }
  0x4d   :  { %v235_v23 = vld [vmem:[#allocation2 + $0x460] sm:$0xff]  ;;  %v256_v51 = vld [vmem:[#allocation2 + $0x508] sm:$0xff] }
  0x4e   :  { %v4063_v63 = vcombine.low %v231_v22, %v235_v23  ;;  %v251_v41 = vld [vmem:[#allocation2 + $0x4e0] sm:$0xff]  ;;  %v260_v52 = vld [vmem:[#allocation2 + $0x528] sm:$0xff] }
  0x4f   :  { %3228 = vmatpush1.bf16.msra.mxu0 %v3999_v28  ;;  %3392 = vmatpush1.bf16.msra.mxu1 %v4001_v29  ;;  %v4055_v28 = vcombine.low %v223_v14, %v227_v15  ;;  %v4057_v29 = vcombine.low %v224_v17, %v228_v18  ;;  %v255_v49 = vld [vmem:[#allocation2 + $0x500] sm:$0xff]  ;;  %v264_v61 = vld [vmem:[#allocation2 + $0x548] sm:$0xff] }
  0x50   :  { %3229 = vmatprep.subr.bf16.mxu0 %v4008_v30  ;;  %3393 = vmatprep.subr.bf16.mxu1 %v4010_v31  ;;  %v4064_v30 = vcombine.high %v231_v22, %v235_v23  ;;  %v4066_v31 = vcombine.high %v232_v26, %v236_v27  ;;  %v259_v50 = vld [vmem:[#allocation2 + $0x520] sm:$0xff]  ;;  %v268_v62 = vld [vmem:[#allocation2 + $0x568] sm:$0xff] }
  0x51   :  { %v263_v58 = vld [vmem:[#allocation2 + $0x540] sm:$0xff]  ;;  %v272_v6 = vld [vmem:[#allocation2 + $0x588] sm:$0xff] }
  0x52   :  { %v267_v60 = vld [vmem:[#allocation2 + $0x560] sm:$0xff]  ;;  %v276_v7 = vld [vmem:[#allocation2 + $0x5a8] sm:$0xff] }
  0x53   :  { %3230 = vmatpush1.bf16.msra.mxu0 %v4007_v36  ;;  %3394 = vmatpush1.bf16.msra.mxu1 %v4009_v37  ;;  %v244_v36 = vld [vmem:[#allocation2 + $0x4a8] sm:$0xff]  ;;  %v4065_v37 = vcombine.low %v232_v26, %v236_v27  ;;  %v271_v4 = vld [vmem:[#allocation2 + $0x580] sm:$0xff]  ;;  %v4095_v8 = vcombine.low %v263_v58, %v267_v60 }
  0x54   :  { %3231 = vmatprep.subr.bf16.mxu0 %v4016_v38  ;;  %3395 = vmatprep.subr.bf16.mxu1 %v4018_v39  ;;  %v4072_v38 = vcombine.high %v239_v32, %v243_v33  ;;  %v4074_v39 = vcombine.high %v240_v35, %v244_v36  ;;  %v275_v5 = vld [vmem:[#allocation2 + $0x5a0] sm:$0xff]  ;;  %v280_v15 = vld [vmem:[#allocation2 + $0x5c8] sm:$0xff] }
  0x55   :  { %v283_v14 = vld [vmem:[#allocation2 + $0x5e0] sm:$0xff]  ;;  %v284_v17 = vld [vmem:[#allocation2 + $0x5e8] sm:$0xff]  ;;  %v4103_v18 = vcombine.low %v271_v4, %v275_v5 }
  0x56   :  { %v291_v22 = vld [vmem:[#allocation2 + $0x620] sm:$0xff]  ;;  %v288_v23 = vld [vmem:[#allocation2 + $0x608] sm:$0xff]  ;;  %v4113_v27 = vcombine.low %v280_v15, %v284_v17 }
  0x57   :  { %3232 = vmatpush1.bf16.msra.mxu0 %v4015_v45  ;;  %3396 = vmatpush1.bf16.msra.mxu1 %v4017_v46  ;;  %v4071_v45 = vcombine.low %v239_v32, %v243_v33  ;;  %v4073_v46 = vcombine.low %v240_v35, %v244_v36  ;;  %v292_v24 = vld [vmem:[#allocation2 + $0x628] sm:$0xff] }
  0x58   :  { %3233 = vmatprep.subr.bf16.mxu0 %v4024_v47  ;;  %3397 = vmatprep.subr.bf16.mxu1 %v4026_v48  ;;  %v4080_v47 = vcombine.high %v247_v40, %v251_v41  ;;  %v4082_v48 = vcombine.high %v248_v42, %v252_v43  ;;  %v296_v32 = vld [vmem:[#allocation2 + $0x648] sm:$0xff]  ;;  %v4121_v36 = vcombine.low %v288_v23, %v292_v24 }
  0x59   :  { %v300_v33 = vld [vmem:[#allocation2 + $0x668] sm:$0xff] }
  0x5b   :  { %3234 = vmatpush1.bf16.msra.mxu0 %v4023_v54  ;;  %3398 = vmatpush1.bf16.msra.mxu1 %v4025_v55  ;;  %v4079_v54 = vcombine.low %v247_v40, %v251_v41  ;;  %v4081_v55 = vcombine.low %v248_v42, %v252_v43  ;;  %v304_v40 = vld [vmem:[#allocation2 + $0x688] sm:$0xff]  ;;  %v4129_v43 = vcombine.low %v296_v32, %v300_v33 }
  0x5c   :  { %3235 = vmatprep.subr.bf16.mxu0 %v4032_v56  ;;  %3399 = vmatprep.subr.bf16.mxu1 %v4034_v57  ;;  %v4088_v56 = vcombine.high %v255_v49, %v259_v50  ;;  %v4090_v57 = vcombine.high %v256_v51, %v260_v52  ;;  %v308_v41 = vld [vmem:[#allocation2 + $0x6a8] sm:$0xff] }
  0x5f   :  { %3236 = vmatpush1.bf16.msra.mxu0 %v4031_v0  ;;  %3400 = vmatpush1.bf16.msra.mxu1 %v4033_v1  ;;  %v4087_v0 = vcombine.low %v255_v49, %v259_v50  ;;  %v4089_v1 = vcombine.low %v256_v51, %v260_v52  ;;  %v312_v49 = vld [vmem:[#allocation2 + $0x6c8] sm:$0xff]  ;;  %v4137_v52 = vcombine.low %v304_v40, %v308_v41 }
  0x60   :  { %3237 = vmatprep.subr.bf16.mxu0 %v4040_v2  ;;  %3401 = vmatprep.subr.bf16.mxu1 %v4042_v3  ;;  %v4096_v2 = vcombine.high %v263_v58, %v267_v60  ;;  %v4098_v3 = vcombine.high %v264_v61, %v268_v62  ;;  %v316_v50 = vld [vmem:[#allocation2 + $0x6e8] sm:$0xff] }
  0x61   :  { %v320_v58 = vld [vmem:[#allocation2 + $0x708] sm:$0xff] }
  0x62   :  { %v324_v60 = vld [vmem:[#allocation2 + $0x728] sm:$0xff] }
  0x63   :  { %3238 = vmatpush1.bf16.msra.mxu0 %v4039_v10  ;;  %3402 = vmatpush1.bf16.msra.mxu1 %v4041_v11  ;;  %v4097_v10 = vcombine.low %v264_v61, %v268_v62  ;;  %v4104_v11 = vcombine.high %v271_v4, %v275_v5  ;;  %v4145_v62 = vcombine.low %v312_v49, %v316_v50  ;;  %v328_v4 = vld [vmem:[#allocation2 + $0x748] sm:$0xff] }
  0x64   :  { %3239 = vmatprep.subr.bf16.mxu0 %v4048_v12  ;;  %3403 = vmatprep.subr.bf16.mxu1 %v4050_v13  ;;  %v4106_v12 = vcombine.high %v272_v6, %v276_v7  ;;  %v279_v13 = vld [vmem:[#allocation2 + $0x5c0] sm:$0xff]  ;;  %v332_v5 = vld [vmem:[#allocation2 + $0x768] sm:$0xff] }
  0x65   :  { %v4111_v26 = vcombine.low %v279_v13, %v283_v14 }
  0x67   :  { %3240 = vmatpush1.bf16.msra.mxu0 %v4047_v19  ;;  %3404 = vmatpush1.bf16.msra.mxu1 %v4049_v59  ;;  %v4105_v19 = vcombine.low %v272_v6, %v276_v7  ;;  %v4112_v59 = vcombine.high %v279_v13, %v283_v14  ;;  %v4153_v7 = vcombine.low %v320_v58, %v324_v60  ;;  %v336_v13 = vld [vmem:[#allocation2 + $0x788] sm:$0xff] }
  0x68   :  { %3250 = vmatprep.subr.bf16.mxu0 %v4056_v20  ;;  %3414 = vmatprep.subr.bf16.mxu1 %v4058_v21  ;;  %v4114_v20 = vcombine.high %v280_v15, %v284_v17  ;;  %v287_v21 = vld [vmem:[#allocation2 + $0x600] sm:$0xff]  ;;  %v340_v14 = vld [vmem:[#allocation2 + $0x7a8] sm:$0xff]  ;;  %v4161_v17 = vcombine.low %v328_v4, %v332_v5 }
  0x69   :  { %v4119_v35 = vcombine.low %v287_v21, %v291_v22 }
  0x6a   :  { %3242 = vmatmul.mubr.bf16.vlgmr.msra.gmra.mrb[0].mxu0 %v4654_v25  ;;  %3406 = vmatmul.mubr.bf16.vlgmr.msra.gmra.mrb[0].mxu1 %v4654_v25 }
  0x6b   :  { %3251 = vmatpush1.bf16.msra.mxu0 %v4055_v28  ;;  %3415 = vmatpush1.bf16.msra.mxu1 %v4057_v29  ;;  %v4120_v28 = vcombine.high %v287_v21, %v291_v22  ;;  %v4122_v29 = vcombine.high %v288_v23, %v292_v24  ;;  %v344_v21 = vld [vmem:[#allocation2 + $0x7c8] sm:$0xff] }
  0x6c   :  { %3252 = vmatprep.subr.bf16.mxu0 %v4064_v30  ;;  %3416 = vmatprep.subr.bf16.mxu1 %v4066_v31  ;;  %v295_v30 = vld [vmem:[#allocation2 + $0x640] sm:$0xff]  ;;  %v348_v22 = vld [vmem:[#allocation2 + $0x7e8] sm:$0xff] }
  0x6d   :  { %3282 = vmatprep.mubr.bf16.mxu0 %v4656_v34  ;;  %3446 = vmatprep.mubr.bf16.mxu1 %v4656_v34  ;;  %v299_v31 = vld [vmem:[#allocation2 + $0x660] sm:$0xff]  ;;  %v4665_v23 = vld [vmem:[%s4756_s0 + $0x8] sm:$0xff]  ;;  %s4580_s0 = smov [#allocation7]  }
  0x6e   :  { %v4127_v42 = vcombine.low %v295_v30, %v299_v31  ;;  %s3917_s13 = sshll.u32 %s4580_s0, 4  ;;  %s3918_s13 = int_to_ptr.vmem [resolvable:$true] %s3917_s13 }
  0x6f   :  { %3253 = vmatpush1.bf16.msra.mxu0 %v4063_v63  ;;  %3417 = vmatpush1.bf16.msra.mxu1 %v4065_v37  ;;  %v4128_v63 = vcombine.high %v295_v30, %v299_v31  ;;  %v4130_v37 = vcombine.high %v296_v32, %v300_v33  ;;  %v355_v30 = vld [vmem:[#allocation2 + $0x820] sm:$0xff]  ;;  %v4669_v31 = vrot.slane %v4665_v23, %v4628_v53  ;;  %v352_v32 = vld [vmem:[#allocation2 + $0x808] sm:$0xff]  ;;  %s4547_s14 = scalar_lea.vmem %s3918_s13, 256  ;;  %p4552_p3 = scmp.lt.s32.totalorder %s3918_s13, %s3918_s13 }
  0x70   :  { %3254 = vmatprep.subr.bf16.mxu0 %v4072_v38  ;;  %3418 = vmatprep.subr.bf16.mxu1 %v4074_v39  ;;  %v303_v38 = vld [vmem:[#allocation2 + $0x680] sm:$0xff]  ;;  %v356_v33 = vld [vmem:[#allocation2 + $0x828] sm:$0xff]  ;;  %p4548_p2 = scmp.ne.s32.totalorder %s3918_s13, %s4547_s14  ;;  %p4553_p4 = scmp.lt.s32.totalorder %s4547_s14, %s4547_s14 }
  0x71   :  { %v307_v39 = vld [vmem:[#allocation2 + $0x6a0] sm:$0xff] }
  0x72   :  { %v4135_v51 = vcombine.low %v303_v38, %v307_v39  ;;  %p4554_p5 = por %p4553_p4, %p4552_p3 }
  0x73   :  { %3255 = vmatpush1.bf16.msra.mxu0 %v4071_v45  ;;  %3419 = vmatpush1.bf16.msra.mxu1 %v4073_v46  ;;  %v4136_v45 = vcombine.high %v303_v38, %v307_v39  ;;  %v4138_v46 = vcombine.high %v304_v40, %v308_v41  ;;  %v359_v38 = vld [vmem:[#allocation2 + $0x840] sm:$0xff]  ;;  %v77_v40 = vcombine.high %v4669_v31, %v4669_v31 }
  0x74   :  { %3256 = vmatprep.subr.bf16.mxu0 %v4080_v47  ;;  %3420 = vmatprep.subr.bf16.mxu1 %v4082_v48  ;;  %v311_v47 = vld [vmem:[#allocation2 + $0x6c0] sm:$0xff]  ;;  %v4675_v41 = vpack.c.bf16 %v4648_v16, %v4648_v16  ;;  %p4555_p6 = pnand %p4554_p5, %p4548_p2 }
  0x75   :  { %v315_v48 = vld [vmem:[#allocation2 + $0x6e0] sm:$0xff] }
  0x76   :  { %v4143_v61 = vcombine.low %v311_v47, %v315_v48  ;;  %v363_v39 = vld [vmem:[#allocation2 + $0x860] sm:$0xff] }
  0x77   :  { %3257 = vmatpush1.bf16.msra.mxu0 %v4079_v54  ;;  %3421 = vmatpush1.bf16.msra.mxu1 %v4081_v55  ;;  %v4144_v54 = vcombine.high %v311_v47, %v315_v48  ;;  %v4146_v55 = vcombine.high %v312_v49, %v316_v50  ;;  %v4192_v47 = vcombine.high %v359_v38, %v363_v39  ;;  %v367_v49 = vld [vmem:[#allocation2 + $0x880] sm:$0xff] }
  0x78   :  { %3258 = vmatprep.subr.bf16.mxu0 %v4088_v56  ;;  %3422 = vmatprep.subr.bf16.mxu1 %v4090_v57  ;;  %v319_v56 = vld [vmem:[#allocation2 + $0x700] sm:$0xff]  ;;  %v4191_v16 = vcombine.low %v359_v38, %v363_v39 }
  0x79   :  { %v323_v57 = vld [vmem:[#allocation2 + $0x720] sm:$0xff] }
  0x7a   :  { %v4151_v6 = vcombine.low %v319_v56, %v323_v57  ;;  %v371_v50 = vld [vmem:[#allocation2 + $0x8a0] sm:$0xff] }
  0x7b   :  { %3259 = vmatpush1.bf16.msra.mxu0 %v4087_v0  ;;  %3423 = vmatpush1.bf16.msra.mxu1 %v4089_v1  ;;  %v4152_v0 = vcombine.high %v319_v56, %v323_v57  ;;  %v4154_v1 = vcombine.high %v320_v58, %v324_v60  ;;  %v4200_v56 = vcombine.high %v367_v49, %v371_v50  ;;  %v375_v58 = vld [vmem:[#allocation2 + $0x8c0] sm:$0xff] }
  0x7c   :  { %3260 = vmatprep.subr.bf16.mxu0 %v4096_v2  ;;  %3424 = vmatprep.subr.bf16.mxu1 %v4098_v3  ;;  %v327_v2 = vld [vmem:[#allocation2 + $0x740] sm:$0xff] }
  0x7d   :  { %v331_v3 = vld [vmem:[#allocation2 + $0x760] sm:$0xff] }
  0x7e   :  { %v4159_v15 = vcombine.low %v327_v2, %v331_v3  ;;  %v379_v60 = vld [vmem:[#allocation2 + $0x8e0] sm:$0xff] }
  0x7f   :  { %3261 = vmatpush1.bf16.msra.mxu0 %v4095_v8  ;;  %3425 = vmatpush1.bf16.msra.mxu1 %v4097_v10  ;;  %v4160_v8 = vcombine.high %v327_v2, %v331_v3  ;;  %v4162_v10 = vcombine.high %v328_v4, %v332_v5  ;;  %v4208_v2 = vcombine.high %v375_v58, %v379_v60  ;;  %v383_v4 = vld [vmem:[#allocation2 + $0x900] sm:$0xff] }
  0x80   :  { %3262 = vmatprep.subr.bf16.mxu0 %v4104_v11  ;;  %3426 = vmatprep.subr.bf16.mxu1 %v4106_v12  ;;  %v335_v11 = vld [vmem:[#allocation2 + $0x780] sm:$0xff] }
  0x81   :  { %v339_v12 = vld [vmem:[#allocation2 + $0x7a0] sm:$0xff] }
  0x82   :  { %v4167_v24 = vcombine.low %v335_v11, %v339_v12  ;;  %v387_v5 = vld [vmem:[#allocation2 + $0x920] sm:$0xff] }
  0x83   :  { %3263 = vmatpush1.bf16.msra.mxu0 %v4103_v18  ;;  %3427 = vmatpush1.bf16.msra.mxu1 %v4105_v19  ;;  %v4168_v18 = vcombine.high %v335_v11, %v339_v12  ;;  %v4170_v19 = vcombine.high %v336_v13, %v340_v14  ;;  %v4216_v11 = vcombine.high %v383_v4, %v387_v5 }
  0x84   :  { %3264 = vmatprep.subr.bf16.mxu0 %v4112_v59  ;;  %3428 = vmatprep.subr.bf16.mxu1 %v4114_v20  ;;  %v343_v59 = vld [vmem:[#allocation2 + $0x7c0] sm:$0xff] }
  0x85   :  { %v347_v20 = vld [vmem:[#allocation2 + $0x7e0] sm:$0xff] }
  0x87   :  { %3265 = vmatpush1.bf16.msra.mxu0 %v4111_v26  ;;  %3429 = vmatpush1.bf16.msra.mxu1 %v4113_v27  ;;  %v4169_v26 = vcombine.low %v336_v13, %v340_v14  ;;  %v4176_v27 = vcombine.high %v343_v59, %v347_v20  ;;  %v391_v13 = vld [vmem:[#allocation2 + $0x940] sm:$0xff] }
  0x88   :  { %3266 = vmatprep.subr.bf16.mxu0 %v4120_v28  ;;  %3430 = vmatprep.subr.bf16.mxu1 %v4122_v29  ;;  %v4178_v28 = vcombine.high %v344_v21, %v348_v22  ;;  %v351_v29 = vld [vmem:[#allocation2 + $0x800] sm:$0xff] }
  0x89   :  { %v395_v14 = vld [vmem:[#allocation2 + $0x960] sm:$0xff] }
  0x8b   :  { %3267 = vmatpush1.bf16.msra.mxu0 %v4119_v35  ;;  %3431 = vmatpush1.bf16.msra.mxu1 %v4121_v36  ;;  %v4175_v35 = vcombine.low %v343_v59, %v347_v20  ;;  %v4177_v36 = vcombine.low %v344_v21, %v348_v22  ;;  %v4224_v59 = vcombine.high %v391_v13, %v395_v14  ;;  %v399_v21 = vld [vmem:[#allocation2 + $0x980] sm:$0xff] }
  0x8c   :  { %3268 = vmatprep.subr.bf16.mxu0 %v4128_v63  ;;  %3432 = vmatprep.subr.bf16.mxu1 %v4130_v37  ;;  %v4184_v63 = vcombine.high %v351_v29, %v355_v30  ;;  %v4186_v37 = vcombine.high %v352_v32, %v356_v33  ;;  %v403_v22 = vld [vmem:[#allocation2 + $0x9a0] sm:$0xff] }
  0x8f   :  { %3269 = vmatpush1.bf16.msra.mxu0 %v4127_v42  ;;  %3433 = vmatpush1.bf16.msra.mxu1 %v4129_v43  ;;  %v360_v42 = vld [vmem:[#allocation2 + $0x848] sm:$0xff] }
  0x90   :  { %3270 = vmatprep.subr.bf16.mxu0 %v4136_v45  ;;  %3434 = vmatprep.subr.bf16.mxu1 %v4138_v46  ;;  %v364_v43 = vld [vmem:[#allocation2 + $0x868] sm:$0xff]  ;;  %v4183_v45 = vcombine.low %v351_v29, %v355_v30  ;;  %v4185_v46 = vcombine.low %v352_v32, %v356_v33  ;;  %v4232_v29 = vcombine.high %v399_v21, %v403_v22  ;;  %v407_v32 = vld [vmem:[#allocation2 + $0x9c0] sm:$0xff] }
  0x91   :  { %v4194_v48 = vcombine.high %v360_v42, %v364_v43  ;;  %v411_v33 = vld [vmem:[#allocation2 + $0x9e0] sm:$0xff] }
  0x92   :  { %v4240_v38 = vcombine.high %v407_v32, %v411_v33 }
  0x93   :  { %3271 = vmatpush1.bf16.msra.mxu0 %v4135_v51  ;;  %3435 = vmatpush1.bf16.msra.mxu1 %v4137_v52  ;;  %v4677_v51 = vpack.c.bf16 %v77_v40, %v77_v40  ;;  %v368_v52 = vld [vmem:[#allocation2 + $0x888] sm:$0xff]  ;;  %v415_v40 = vld [vmem:[#allocation2 + $0xa00] sm:$0xff] }
  0x94   :  { %3272 = vmatprep.subr.bf16.mxu0 %v4144_v54  ;;  %3436 = vmatprep.subr.bf16.mxu1 %v4146_v55  ;;  %v372_v54 = vld [vmem:[#allocation2 + $0x8a8] sm:$0xff]  ;;  %v4193_v55 = vcombine.low %v360_v42, %v364_v43  ;;  %v419_v42 = vld [vmem:[#allocation2 + $0xa20] sm:$0xff] }
  0x95   :  { %v4202_v57 = vcombine.high %v368_v52, %v372_v54  ;;  %v416_v43 = vld [vmem:[#allocation2 + $0xa08] sm:$0xff] }
  0x97   :  { %3273 = vmatpush1.bf16.msra.mxu0 %v4143_v61  ;;  %3437 = vmatpush1.bf16.msra.mxu1 %v4145_v62  ;;  %v376_v61 = vld [vmem:[#allocation2 + $0x8c8] sm:$0xff] }
  0x98   :  { %3274 = vmatprep.subr.bf16.mxu0 %v4152_v0  ;;  %3438 = vmatprep.subr.bf16.mxu1 %v4154_v1  ;;  %v380_v62 = vld [vmem:[#allocation2 + $0x8e8] sm:$0xff]  ;;  %v4199_v0 = vcombine.low %v367_v49, %v371_v50  ;;  %v4201_v1 = vcombine.low %v368_v52, %v372_v54  ;;  %v423_v50 = vld [vmem:[#allocation2 + $0xa40] sm:$0xff] }
  0x99   :  { %v4210_v3 = vcombine.high %v376_v61, %v380_v62  ;;  %v427_v52 = vld [vmem:[#allocation2 + $0xa60] sm:$0xff]  ;;  %v424_v54 = vld [vmem:[#allocation2 + $0xa48] sm:$0xff] }
  0x9b   :  { %3275 = vmatpush1.bf16.msra.mxu0 %v4151_v6  ;;  %3439 = vmatpush1.bf16.msra.mxu1 %v4153_v7  ;;  %v384_v6 = vld [vmem:[#allocation2 + $0x908] sm:$0xff] }
  0x9c   :  { %3276 = vmatprep.subr.bf16.mxu0 %v4160_v8  ;;  %3440 = vmatprep.subr.bf16.mxu1 %v4162_v10  ;;  %v388_v7 = vld [vmem:[#allocation2 + $0x928] sm:$0xff]  ;;  %v4207_v8 = vcombine.low %v375_v58, %v379_v60  ;;  %v4209_v10 = vcombine.low %v376_v61, %v380_v62  ;;  %v431_v60 = vld [vmem:[#allocation2 + $0xa80] sm:$0xff] }
  0x9d   :  { %v4218_v12 = vcombine.high %v384_v6, %v388_v7  ;;  %v435_v61 = vld [vmem:[#allocation2 + $0xaa0] sm:$0xff]  ;;  %v432_v62 = vld [vmem:[#allocation2 + $0xa88] sm:$0xff] }
  0x9f   :  { %3277 = vmatpush1.bf16.msra.mxu0 %v4159_v15  ;;  %3441 = vmatpush1.bf16.msra.mxu1 %v4161_v17  ;;  %v392_v15 = vld [vmem:[#allocation2 + $0x948] sm:$0xff] }
  0xa0   :  { %3278 = vmatprep.subr.bf16.mxu0 %v4168_v18  ;;  %3442 = vmatprep.subr.bf16.mxu1 %v4170_v19  ;;  %v396_v17 = vld [vmem:[#allocation2 + $0x968] sm:$0xff]  ;;  %v4215_v18 = vcombine.low %v383_v4, %v387_v5  ;;  %v4217_v19 = vcombine.low %v384_v6, %v388_v7  ;;  %v439_v5 = vld [vmem:[#allocation2 + $0xac0] sm:$0xff] }
  0xa1   :  { %v4226_v20 = vcombine.high %v392_v15, %v396_v17  ;;  %v443_v6 = vld [vmem:[#allocation2 + $0xae0] sm:$0xff]  ;;  %v440_v7 = vld [vmem:[#allocation2 + $0xac8] sm:$0xff] }
  0xa3   :  { %3279 = vmatpush1.bf16.msra.mxu0 %v4167_v24  ;;  %3443 = vmatpush1.bf16.msra.mxu1 %v4169_v26  ;;  %v400_v24 = vld [vmem:[#allocation2 + $0x988] sm:$0xff] }
  0xa4   :  { %3280 = vmatprep.subr.bf16.mxu0 %v4176_v27  ;;  %3444 = vmatprep.subr.bf16.mxu1 %v4178_v28  ;;  %v404_v26 = vld [vmem:[#allocation2 + $0x9a8] sm:$0xff]  ;;  %v4223_v27 = vcombine.low %v391_v13, %v395_v14  ;;  %v4225_v28 = vcombine.low %v392_v15, %v396_v17  ;;  %v447_v14 = vld [vmem:[#allocation2 + $0xb00] sm:$0xff] }
  0xa5   :  { %v4234_v30 = vcombine.high %v400_v24, %v404_v26  ;;  %v451_v15 = vld [vmem:[#allocation2 + $0xb20] sm:$0xff]  ;;  %v448_v17 = vld [vmem:[#allocation2 + $0xb08] sm:$0xff] }
  0xa7   :  { %3281 = vmatpush1.bf16.msra.mxu0 %v4175_v35  ;;  %3445 = vmatpush1.bf16.msra.mxu1 %v4177_v36  ;;  %v408_v35 = vld [vmem:[#allocation2 + $0x9c8] sm:$0xff] }
  0xa8   :  { %3291 = vmatprep.subr.bf16.mxu0 %v4184_v63  ;;  %3455 = vmatprep.subr.bf16.mxu1 %v4186_v37  ;;  %v412_v36 = vld [vmem:[#allocation2 + $0x9e8] sm:$0xff]  ;;  %v4231_v63 = vcombine.low %v399_v21, %v403_v22  ;;  %v4233_v37 = vcombine.low %v400_v24, %v404_v26  ;;  %v455_v22 = vld [vmem:[#allocation2 + $0xb40] sm:$0xff] }
  0xa9   :  { %v4242_v39 = vcombine.high %v408_v35, %v412_v36  ;;  %v459_v24 = vld [vmem:[#allocation2 + $0xb60] sm:$0xff]  ;;  %v456_v26 = vld [vmem:[#allocation2 + $0xb48] sm:$0xff] }
  0xaa   :  { %3283 = vmatmul.mubr.bf16.vlgmr.msra.gmra.mrb[0].mxu0 %v4675_v41  ;;  %3447 = vmatmul.mubr.bf16.vlgmr.msra.gmra.mrb[0].mxu1 %v4675_v41 }
  0xab   :  { %3292 = vmatpush1.bf16.msra.mxu0 %v4183_v45  ;;  %3456 = vmatpush1.bf16.msra.mxu1 %v4185_v46  ;;  %v420_v45 = vld [vmem:[#allocation2 + $0xa28] sm:$0xff]  ;;  %v4239_v46 = vcombine.low %v407_v32, %v411_v33  ;;  %v463_v33 = vld [vmem:[#allocation2 + $0xb80] sm:$0xff] }
  0xac   :  { %3293 = vmatprep.subr.bf16.mxu0 %v4192_v47  ;;  %3457 = vmatprep.subr.bf16.mxu1 %v4194_v48  ;;  %v4241_v47 = vcombine.low %v408_v35, %v412_v36  ;;  %v4248_v48 = vcombine.high %v415_v40, %v419_v42  ;;  %v4250_v49 = vcombine.high %v416_v43, %v420_v45  ;;  %v467_v35 = vld [vmem:[#allocation2 + $0xba0] sm:$0xff]  ;;  %v464_v36 = vld [vmem:[#allocation2 + $0xb88] sm:$0xff] }
  0xad   :  { %3323 = vmatprep.mubr.bf16.mxu0 %v4677_v51  ;;  %3487 = vmatprep.mubr.bf16.mxu1 %v4677_v51 }
  0xaf   :  { %3294 = vmatpush1.bf16.msra.mxu0 %v4191_v16  ;;  %3458 = vmatpush1.bf16.msra.mxu1 %v4193_v55  ;;  %v428_v16 = vld [vmem:[#allocation2 + $0xa68] sm:$0xff]  ;;  %v4247_v55 = vcombine.low %v415_v40, %v419_v42  ;;  %v471_v42 = vld [vmem:[#allocation2 + $0xbc0] sm:$0xff] }
  0xb0   :  { %3295 = vmatprep.subr.bf16.mxu0 %v4200_v56  ;;  %3459 = vmatprep.subr.bf16.mxu1 %v4202_v57  ;;  %v4249_v56 = vcombine.low %v416_v43, %v420_v45  ;;  %v4256_v57 = vcombine.high %v423_v50, %v427_v52  ;;  %v4258_v58 = vcombine.high %v424_v54, %v428_v16  ;;  %v475_v43 = vld [vmem:[#allocation2 + $0xbe0] sm:$0xff] }
  0xb1   :  { %v62_v45 = vcombine.high %v4665_v23, %v4665_v23 }
  0xb3   :  { %3296 = vmatpush1.bf16.msra.mxu0 %v4199_v0  ;;  %3460 = vmatpush1.bf16.msra.mxu1 %v4201_v1  ;;  %v436_v0 = vld [vmem:[#allocation2 + $0xaa8] sm:$0xff]  ;;  %v4255_v1 = vcombine.low %v423_v50, %v427_v52  ;;  %v4304_v50 = vcombine.high %v471_v42, %v475_v43 }
  0xb4   :  { %3297 = vmatprep.subr.bf16.mxu0 %v4208_v2  ;;  %3461 = vmatprep.subr.bf16.mxu1 %v4210_v3  ;;  %v4257_v2 = vcombine.low %v424_v54, %v428_v16  ;;  %v4264_v3 = vcombine.high %v431_v60, %v435_v61  ;;  %v4266_v4 = vcombine.high %v432_v62, %v436_v0  ;;  %v479_v54 = vld [vmem:[#allocation2 + $0xc00] sm:$0xff] }
  0xb5   :  { %v483_v16 = vld [vmem:[#allocation2 + $0xc20] sm:$0xff] }
  0xb7   :  { %3298 = vmatpush1.bf16.msra.mxu0 %v4207_v8  ;;  %3462 = vmatpush1.bf16.msra.mxu1 %v4209_v10  ;;  %v444_v8 = vld [vmem:[#allocation2 + $0xae8] sm:$0xff]  ;;  %v4263_v10 = vcombine.low %v431_v60, %v435_v61  ;;  %v4312_v60 = vcombine.high %v479_v54, %v483_v16 }
  0xb8   :  { %3299 = vmatprep.subr.bf16.mxu0 %v4216_v11  ;;  %3463 = vmatprep.subr.bf16.mxu1 %v4218_v12  ;;  %v4265_v11 = vcombine.low %v432_v62, %v436_v0  ;;  %v4272_v12 = vcombine.high %v439_v5, %v443_v6  ;;  %v4274_v13 = vcombine.high %v440_v7, %v444_v8  ;;  %v487_v62 = vld [vmem:[#allocation2 + $0xc40] sm:$0xff] }
  0xb9   :  { %v491_v0 = vld [vmem:[#allocation2 + $0xc60] sm:$0xff] }
  0xbb   :  { %3300 = vmatpush1.bf16.msra.mxu0 %v4215_v18  ;;  %3464 = vmatpush1.bf16.msra.mxu1 %v4217_v19  ;;  %v452_v18 = vld [vmem:[#allocation2 + $0xb28] sm:$0xff]  ;;  %v4271_v19 = vcombine.low %v439_v5, %v443_v6  ;;  %v4311_v5 = vcombine.low %v479_v54, %v483_v16 }
  0xbc   :  { %3301 = vmatprep.subr.bf16.mxu0 %v4224_v59  ;;  %3465 = vmatprep.subr.bf16.mxu1 %v4226_v20  ;;  %v4273_v59 = vcombine.low %v440_v7, %v444_v8  ;;  %v4280_v20 = vcombine.high %v447_v14, %v451_v15  ;;  %v4282_v21 = vcombine.high %v448_v17, %v452_v18 }
  0xbd   :  { %v4320_v7 = vcombine.high %v487_v62, %v491_v0 }
  0xbf   :  { %3302 = vmatpush1.bf16.msra.mxu0 %v4223_v27  ;;  %3466 = vmatpush1.bf16.msra.mxu1 %v4225_v28  ;;  %v460_v27 = vld [vmem:[#allocation2 + $0xb68] sm:$0xff]  ;;  %v4279_v28 = vcombine.low %v447_v14, %v451_v15 }
  0xc0   :  { %3303 = vmatprep.subr.bf16.mxu0 %v4232_v29  ;;  %3467 = vmatprep.subr.bf16.mxu1 %v4234_v30  ;;  %v4281_v29 = vcombine.low %v448_v17, %v452_v18  ;;  %v4288_v30 = vcombine.high %v455_v22, %v459_v24  ;;  %v4290_v32 = vcombine.high %v456_v26, %v460_v27  ;;  %v500_v14 = vld [vmem:[#allocation2 + $0xca8] sm:$0xff] }
  0xc3   :  { %3304 = vmatpush1.bf16.msra.mxu0 %v4231_v63  ;;  %3468 = vmatpush1.bf16.msra.mxu1 %v4233_v37  ;;  %v468_v63 = vld [vmem:[#allocation2 + $0xba8] sm:$0xff]  ;;  %v4287_v37 = vcombine.low %v455_v22, %v459_v24 }
  0xc4   :  { %3305 = vmatprep.subr.bf16.mxu0 %v4240_v38  ;;  %3469 = vmatprep.subr.bf16.mxu1 %v4242_v39  ;;  %v4289_v38 = vcombine.low %v456_v26, %v460_v27  ;;  %v4296_v39 = vcombine.high %v463_v33, %v467_v35  ;;  %v4298_v40 = vcombine.high %v464_v36, %v468_v63 }
  0xc7   :  { %3306 = vmatpush1.bf16.msra.mxu0 %v4239_v46  ;;  %3470 = vmatpush1.bf16.msra.mxu1 %v4241_v47  ;;  %v472_v46 = vld [vmem:[#allocation2 + $0xbc8] sm:$0xff] }
  0xc8   :  { %3307 = vmatprep.subr.bf16.mxu0 %v4248_v48  ;;  %3471 = vmatprep.subr.bf16.mxu1 %v4250_v49  ;;  %v476_v47 = vld [vmem:[#allocation2 + $0xbe8] sm:$0xff]  ;;  %v4295_v48 = vcombine.low %v463_v33, %v467_v35  ;;  %v4297_v49 = vcombine.low %v464_v36, %v468_v63 }
  0xc9   :  { %v4306_v52 = vcombine.high %v472_v46, %v476_v47  ;;  %v4305_v23 = vcombine.low %v472_v46, %v476_v47  ;;  %v527_v47 = vld [vmem:[#allocation2 + $0xd80] sm:$0xff] }
  0xcb   :  { %3308 = vmatpush1.bf16.msra.mxu0 %v4247_v55  ;;  %3472 = vmatpush1.bf16.msra.mxu1 %v4249_v56  ;;  %v4686_v55 = vrot.slane %v62_v45, %v4628_v53  ;;  %v480_v56 = vld [vmem:[#allocation2 + $0xc08] sm:$0xff] }
  0xcc   :  { %3309 = vmatprep.subr.bf16.mxu0 %v4256_v57  ;;  %3473 = vmatprep.subr.bf16.mxu1 %v4258_v58  ;;  %v484_v57 = vld [vmem:[#allocation2 + $0xc28] sm:$0xff]  ;;  %v4303_v58 = vcombine.low %v471_v42, %v475_v43 }
  0xcd   :  { %v4314_v61 = vcombine.high %v480_v56, %v484_v57  ;;  %v4313_v6 = vcombine.low %v480_v56, %v484_v57  ;;  %v535_v57 = vld [vmem:[#allocation2 + $0xdc0] sm:$0xff] }
  0xcf   :  { %3310 = vmatpush1.bf16.msra.mxu0 %v4255_v1  ;;  %3474 = vmatpush1.bf16.msra.mxu1 %v4257_v2  ;;  %v78_v1 = vcombine.high %v4686_v55, %v4686_v55  ;;  %v4692_v2 = vpack.c.bf16 %v4669_v31, %v4669_v31  ;;  %v4319_v31 = vcombine.low %v487_v62, %v491_v0 }
  0xd0   :  { %3311 = vmatprep.subr.bf16.mxu0 %v4264_v3  ;;  %3475 = vmatprep.subr.bf16.mxu1 %v4266_v4  ;;  %v488_v3 = vld [vmem:[#allocation2 + $0xc48] sm:$0xff] }
  0xd1   :  { %v492_v4 = vld [vmem:[#allocation2 + $0xc68] sm:$0xff] }
  0xd2   :  { %v4322_v8 = vcombine.high %v488_v3, %v492_v4  ;;  %v4321_v15 = vcombine.low %v488_v3, %v492_v4  ;;  %v543_v3 = vld [vmem:[#allocation2 + $0xe00] sm:$0xff] }
  0xd3   :  { %3312 = vmatpush1.bf16.msra.mxu0 %v4263_v10  ;;  %3476 = vmatpush1.bf16.msra.mxu1 %v4265_v11  ;;  %v495_v10 = vld [vmem:[#allocation2 + $0xc80] sm:$0xff] }
  0xd4   :  { %3313 = vmatprep.subr.bf16.mxu0 %v4272_v12  ;;  %3477 = vmatprep.subr.bf16.mxu1 %v4274_v13  ;;  %v499_v11 = vld [vmem:[#allocation2 + $0xca0] sm:$0xff]  ;;  %v4694_v12 = vpack.c.bf16 %v78_v1, %v78_v1  ;;  %v496_v13 = vld [vmem:[#allocation2 + $0xc88] sm:$0xff] }
  0xd5   :  { %v4328_v17 = vcombine.high %v495_v10, %v499_v11  ;;  %v4330_v18 = vcombine.high %v496_v13, %v500_v14  ;;  %v4327_v22 = vcombine.low %v495_v10, %v499_v11  ;;  %v4329_v24 = vcombine.low %v496_v13, %v500_v14  ;;  %v547_v4 = vld [vmem:[#allocation2 + $0xe20] sm:$0xff] }
  0xd6   :  { %v4376_v10 = vcombine.high %v543_v3, %v547_v4  ;;  %v551_v13 = vld [vmem:[#allocation2 + $0xe40] sm:$0xff] }
  0xd7   :  { %3314 = vmatpush1.bf16.msra.mxu0 %v4271_v19  ;;  %3478 = vmatpush1.bf16.msra.mxu1 %v4273_v59  ;;  %v503_v19 = vld [vmem:[#allocation2 + $0xcc0] sm:$0xff] }
  0xd8   :  { %3315 = vmatprep.subr.bf16.mxu0 %v4280_v20  ;;  %3479 = vmatprep.subr.bf16.mxu1 %v4282_v21  ;;  %v507_v59 = vld [vmem:[#allocation2 + $0xce0] sm:$0xff]  ;;  %v504_v20 = vld [vmem:[#allocation2 + $0xcc8] sm:$0xff] }
  0xd9   :  { %v508_v21 = vld [vmem:[#allocation2 + $0xce8] sm:$0xff]  ;;  %v4336_v26 = vcombine.high %v503_v19, %v507_v59  ;;  %v4335_v33 = vcombine.low %v503_v19, %v507_v59  ;;  %v555_v14 = vld [vmem:[#allocation2 + $0xe60] sm:$0xff] }
  0xda   :  { %v4338_v27 = vcombine.high %v504_v20, %v508_v21  ;;  %v4337_v35 = vcombine.low %v504_v20, %v508_v21  ;;  %v4384_v19 = vcombine.high %v551_v13, %v555_v14  ;;  %v559_v20 = vld [vmem:[#allocation2 + $0xe80] sm:$0xff] }
  0xdb   :  { %3316 = vmatpush1.bf16.msra.mxu0 %v4279_v28  ;;  %3480 = vmatpush1.bf16.msra.mxu1 %v4281_v29  ;;  %v511_v28 = vld [vmem:[#allocation2 + $0xd00] sm:$0xff] }
  0xdc   :  { %3317 = vmatprep.subr.bf16.mxu0 %v4288_v30  ;;  %3481 = vmatprep.subr.bf16.mxu1 %v4290_v32  ;;  %v515_v29 = vld [vmem:[#allocation2 + $0xd20] sm:$0xff]  ;;  %v512_v30 = vld [vmem:[#allocation2 + $0xd08] sm:$0xff] }
  0xdd   :  { %v516_v32 = vld [vmem:[#allocation2 + $0xd28] sm:$0xff]  ;;  %v4344_v36 = vcombine.high %v511_v28, %v515_v29  ;;  %v4343_v42 = vcombine.low %v511_v28, %v515_v29  ;;  %v563_v21 = vld [vmem:[#allocation2 + $0xea0] sm:$0xff] }
  0xde   :  { %v4346_v63 = vcombine.high %v512_v30, %v516_v32  ;;  %v4345_v43 = vcombine.low %v512_v30, %v516_v32  ;;  %v4392_v28 = vcombine.high %v559_v20, %v563_v21  ;;  %v567_v30 = vld [vmem:[#allocation2 + $0xec0] sm:$0xff] }
  0xdf   :  { %3318 = vmatpush1.bf16.msra.mxu0 %v4287_v37  ;;  %3482 = vmatpush1.bf16.msra.mxu1 %v4289_v38  ;;  %v519_v37 = vld [vmem:[#allocation2 + $0xd40] sm:$0xff] }
  0xe0   :  { %3319 = vmatprep.subr.bf16.mxu0 %v4296_v39  ;;  %3483 = vmatprep.subr.bf16.mxu1 %v4298_v40  ;;  %v523_v38 = vld [vmem:[#allocation2 + $0xd60] sm:$0xff]  ;;  %v520_v39 = vld [vmem:[#allocation2 + $0xd48] sm:$0xff] }
  0xe1   :  { %v524_v40 = vld [vmem:[#allocation2 + $0xd68] sm:$0xff]  ;;  %v4352_v45 = vcombine.high %v519_v37, %v523_v38  ;;  %v571_v32 = vld [vmem:[#allocation2 + $0xee0] sm:$0xff] }
  0xe2   :  { %v4354_v46 = vcombine.high %v520_v39, %v524_v40  ;;  %v4353_v54 = vcombine.low %v520_v39, %v524_v40  ;;  %v575_v39 = vld [vmem:[#allocation2 + $0xf00] sm:$0xff] }
  0xe3   :  { %3320 = vmatpush1.bf16.msra.mxu0 %v4295_v48  ;;  %3484 = vmatpush1.bf16.msra.mxu1 %v4297_v49  ;;  %v531_v48 = vld [vmem:[#allocation2 + $0xda0] sm:$0xff]  ;;  %v528_v49 = vld [vmem:[#allocation2 + $0xd88] sm:$0xff] }
  0xe4   :  { %3321 = vmatprep.subr.bf16.mxu0 %v4304_v50  ;;  %3485 = vmatprep.subr.bf16.mxu1 %v4306_v52  ;;  %v532_v50 = vld [vmem:[#allocation2 + $0xda8] sm:$0xff]  ;;  %v4351_v52 = vcombine.low %v519_v37, %v523_v38  ;;  %v4360_v16 = vcombine.high %v527_v47, %v531_v48  ;;  %v4400_v37 = vcombine.high %v567_v30, %v571_v32  ;;  %v579_v40 = vld [vmem:[#allocation2 + $0xf20] sm:$0xff] }
  0xe5   :  { %v4362_v56 = vcombine.high %v528_v49, %v532_v50  ;;  %v4361_v62 = vcombine.low %v528_v49, %v532_v50  ;;  %v583_v49 = vld [vmem:[#allocation2 + $0xf40] sm:$0xff] }
  0xe6   :  { %v587_v50 = vld [vmem:[#allocation2 + $0xf60] sm:$0xff] }
  0xe7   :  { %3322 = vmatpush1.bf16.msra.mxu0 %v4303_v58  ;;  %3486 = vmatpush1.bf16.msra.mxu1 %v4305_v23  ;;  %v539_v58 = vld [vmem:[#allocation2 + $0xde0] sm:$0xff]  ;;  %v536_v23 = vld [vmem:[#allocation2 + $0xdc8] sm:$0xff] }
  0xe8   :  { %3332 = vmatprep.subr.bf16.mxu0 %v4312_v60  ;;  %3496 = vmatprep.subr.bf16.mxu1 %v4314_v61  ;;  %v540_v60 = vld [vmem:[#allocation2 + $0xde8] sm:$0xff]  ;;  %v4359_v61 = vcombine.low %v527_v47, %v531_v48  ;;  %v4368_v0 = vcombine.high %v535_v57, %v539_v58  ;;  %v4408_v47 = vcombine.high %v575_v39, %v579_v40 }
  0xe9   :  { %v4370_v1 = vcombine.high %v536_v23, %v540_v60 }
  0xea   :  { %3324 = vmatmul.mubr.bf16.vlgmr.msra.gmra.mrb[0].mxu0 %v4692_v2  ;;  %3488 = vmatmul.mubr.bf16.vlgmr.msra.gmra.mrb[0].mxu1 %v4692_v2 }
  0xeb   :  { %3333 = vmatpush1.bf16.msra.mxu0 %v4311_v5  ;;  %3497 = vmatpush1.bf16.msra.mxu1 %v4313_v6  ;;  %v544_v5 = vld [vmem:[#allocation2 + $0xe08] sm:$0xff] }
  0xec   :  { %3334 = vmatprep.subr.bf16.mxu0 %v4320_v7  ;;  %3498 = vmatprep.subr.bf16.mxu1 %v4322_v8  ;;  %v548_v6 = vld [vmem:[#allocation2 + $0xe28] sm:$0xff]  ;;  %v4367_v7 = vcombine.low %v535_v57, %v539_v58  ;;  %v4369_v8 = vcombine.low %v536_v23, %v540_v60  ;;  %v4416_v57 = vcombine.high %v583_v49, %v587_v50  ;;  %v591_v23 = vld [vmem:[#allocation2 + $0xf80] sm:$0xff] }
  0xed   :  { %3364 = vmatprep.mubr.bf16.mxu0 %v4694_v12  ;;  %3528 = vmatprep.mubr.bf16.mxu1 %v4694_v12  ;;  %v4378_v11 = vcombine.high %v544_v5, %v548_v6  ;;  %v595_v60 = vld [vmem:[#allocation2 + $0xfa0] sm:$0xff] }
  0xef   :  { %3335 = vmatpush1.bf16.msra.mxu0 %v4319_v31  ;;  %3499 = vmatpush1.bf16.msra.mxu1 %v4321_v15  ;;  %v552_v31 = vld [vmem:[#allocation2 + $0xe48] sm:$0xff] }
  0xf0   :  { %3336 = vmatprep.subr.bf16.mxu0 %v4328_v17  ;;  %3500 = vmatprep.subr.bf16.mxu1 %v4330_v18  ;;  %v556_v15 = vld [vmem:[#allocation2 + $0xe68] sm:$0xff]  ;;  %v4375_v17 = vcombine.low %v543_v3, %v547_v4  ;;  %v4377_v18 = vcombine.low %v544_v5, %v548_v6  ;;  %v4424_v3 = vcombine.high %v591_v23, %v595_v60  ;;  %v599_v5 = vld [vmem:[#allocation2 + $0xfc0] sm:$0xff] }
  0xf1   :  { %v4386_v59 = vcombine.high %v552_v31, %v556_v15  ;;  %v603_v6 = vld [vmem:[#allocation2 + $0xfe0] sm:$0xff] }
  0xf3   :  { %3337 = vmatpush1.bf16.msra.mxu0 %v4327_v22  ;;  %3501 = vmatpush1.bf16.msra.mxu1 %v4329_v24  ;;  %v560_v22 = vld [vmem:[#allocation2 + $0xe88] sm:$0xff] }
  0xf4   :  { %3338 = vmatprep.subr.bf16.mxu0 %v4336_v26  ;;  %3502 = vmatprep.subr.bf16.mxu1 %v4338_v27  ;;  %v564_v24 = vld [vmem:[#allocation2 + $0xea8] sm:$0xff]  ;;  %v4383_v26 = vcombine.low %v551_v13, %v555_v14  ;;  %v4385_v27 = vcombine.low %v552_v31, %v556_v15  ;;  %v4432_v13 = vcombine.high %v599_v5, %v603_v6  ;;  %v97_v31 = vld [vmem:[#allocation2 + $0x10] sm:$0xff] }
  0xf5   :  { %v4394_v29 = vcombine.high %v560_v22, %v564_v24  ;;  %v101_v15 = vld [vmem:[#allocation2 + $0x30] sm:$0xff] }
  0xf7   :  { %3339 = vmatpush1.bf16.msra.mxu0 %v4335_v33  ;;  %3503 = vmatpush1.bf16.msra.mxu1 %v4337_v35  ;;  %v568_v33 = vld [vmem:[#allocation2 + $0xec8] sm:$0xff] }
  0xf8   :  { %3340 = vmatprep.subr.bf16.mxu0 %v4344_v36  ;;  %3504 = vmatprep.subr.bf16.mxu1 %v4346_v63  ;;  %v572_v35 = vld [vmem:[#allocation2 + $0xee8] sm:$0xff]  ;;  %v4391_v36 = vcombine.low %v559_v20, %v563_v21  ;;  %v4393_v63 = vcombine.low %v560_v22, %v564_v24  ;;  %v3932_v20 = vcombine.high %v97_v31, %v101_v15  ;;  %v105_v22 = vld [vmem:[#allocation2 + $0x50] sm:$0xff] }
  0xf9   :  { %v4402_v38 = vcombine.high %v568_v33, %v572_v35  ;;  %v109_v24 = vld [vmem:[#allocation2 + $0x70] sm:$0xff] }
  0xfb   :  { %3341 = vmatpush1.bf16.msra.mxu0 %v4343_v42  ;;  %3505 = vmatpush1.bf16.msra.mxu1 %v4345_v43  ;;  %v576_v42 = vld [vmem:[#allocation2 + $0xf08] sm:$0xff] }
  0xfc   :  { %3342 = vmatprep.subr.bf16.mxu0 %v4352_v45  ;;  %3506 = vmatprep.subr.bf16.mxu1 %v4354_v46  ;;  %v580_v43 = vld [vmem:[#allocation2 + $0xf28] sm:$0xff]  ;;  %v4399_v45 = vcombine.low %v567_v30, %v571_v32  ;;  %v4401_v46 = vcombine.low %v568_v33, %v572_v35  ;;  %v3940_v32 = vcombine.high %v105_v22, %v109_v24  ;;  %v113_v35 = vld [vmem:[#allocation2 + $0x90] sm:$0xff] }
  0xfd   :  { %v4410_v48 = vcombine.high %v576_v42, %v580_v43 }
  0xff   :  { %3343 = vmatpush1.bf16.msra.mxu0 %v4351_v52  ;;  %3507 = vmatpush1.bf16.msra.mxu1 %v4353_v54  ;;  %v584_v52 = vld [vmem:[#allocation2 + $0xf48] sm:$0xff] }
 0x100   :  { %3344 = vmatprep.subr.bf16.mxu0 %v4360_v16  ;;  %3508 = vmatprep.subr.bf16.mxu1 %v4362_v56  ;;  %v588_v54 = vld [vmem:[#allocation2 + $0xf68] sm:$0xff]  ;;  %v4407_v16 = vcombine.low %v575_v39, %v579_v40  ;;  %v4409_v56 = vcombine.low %v576_v42, %v580_v43  ;;  %v121_v42 = vld [vmem:[#allocation2 + $0xd0] sm:$0xff] }
 0x101   :  { %v4418_v58 = vcombine.high %v584_v52, %v588_v54  ;;  %v125_v43 = vld [vmem:[#allocation2 + $0xf0] sm:$0xff] }
 0x103   :  { %3345 = vmatpush1.bf16.msra.mxu0 %v4359_v61  ;;  %3509 = vmatpush1.bf16.msra.mxu1 %v4361_v62  ;;  %v592_v61 = vld [vmem:[#allocation2 + $0xf88] sm:$0xff] }
 0x104   :  { %3346 = vmatprep.subr.bf16.mxu0 %v4368_v0  ;;  %3510 = vmatprep.subr.bf16.mxu1 %v4370_v1  ;;  %v596_v62 = vld [vmem:[#allocation2 + $0xfa8] sm:$0xff]  ;;  %v4415_v0 = vcombine.low %v583_v49, %v587_v50  ;;  %v4417_v1 = vcombine.low %v584_v52, %v588_v54  ;;  %v3956_v49 = vcombine.high %v121_v42, %v125_v43  ;;  %v129_v52 = vld [vmem:[#allocation2 + $0x110] sm:$0xff] }
 0x105   :  { %v4426_v4 = vcombine.high %v592_v61, %v596_v62  ;;  %v133_v54 = vld [vmem:[#allocation2 + $0x130] sm:$0xff] }
 0x107   :  { %3347 = vmatpush1.bf16.msra.mxu0 %v4367_v7  ;;  %3511 = vmatpush1.bf16.msra.mxu1 %v4369_v8  ;;  %v600_v7 = vld [vmem:[#allocation2 + $0xfc8] sm:$0xff] }
 0x108   :  { %3348 = vmatprep.subr.bf16.mxu0 %v4376_v10  ;;  %3512 = vmatprep.subr.bf16.mxu1 %v4378_v11  ;;  %v604_v8 = vld [vmem:[#allocation2 + $0xfe8] sm:$0xff]  ;;  %v4423_v10 = vcombine.low %v591_v23, %v595_v60  ;;  %v4425_v11 = vcombine.low %v592_v61, %v596_v62  ;;  %v3964_v23 = vcombine.high %v129_v52, %v133_v54  ;;  %v137_v60 = vld [vmem:[#allocation2 + $0x150] sm:$0xff]  ;;  %v138_v62 = vld [vmem:[#allocation2 + $0x158] sm:$0xff] }
 0x109   :  { %v4434_v14 = vcombine.high %v600_v7, %v604_v8  ;;  %v141_v61 = vld [vmem:[#allocation2 + $0x170] sm:$0xff] }
 0x10b   :  { %3349 = vmatpush1.bf16.msra.mxu0 %v4375_v17  ;;  %3513 = vmatpush1.bf16.msra.mxu1 %v4377_v18  ;;  %v98_v17 = vld [vmem:[#allocation2 + $0x18] sm:$0xff] }
 0x10c   :  { %3350 = vmatprep.subr.bf16.mxu0 %v4384_v19  ;;  %3514 = vmatprep.subr.bf16.mxu1 %v4386_v59  ;;  %v102_v18 = vld [vmem:[#allocation2 + $0x38] sm:$0xff]  ;;  %v4431_v19 = vcombine.low %v599_v5, %v603_v6  ;;  %v4433_v59 = vcombine.low %v600_v7, %v604_v8  ;;  %v145_v6 = vld [vmem:[#allocation2 + $0x190] sm:$0xff] }
 0x10d   :  { %v3934_v21 = vcombine.high %v98_v17, %v102_v18  ;;  %v3933_v30 = vcombine.low %v98_v17, %v102_v18  ;;  %v149_v7 = vld [vmem:[#allocation2 + $0x1b0] sm:$0xff]  ;;  %v146_v8 = vld [vmem:[#allocation2 + $0x198] sm:$0xff] }
 0x10e   :  { %v157_v17 = vld [vmem:[#allocation2 + $0x1f0] sm:$0xff]  ;;  %v154_v18 = vld [vmem:[#allocation2 + $0x1d8] sm:$0xff] }
 0x10f   :  { %3351 = vmatpush1.bf16.msra.mxu0 %v4383_v26  ;;  %3515 = vmatpush1.bf16.msra.mxu1 %v4385_v27  ;;  %v4702_v26 = vpack.c.bf16 %v4686_v55, %v4686_v55  ;;  %v106_v27 = vld [vmem:[#allocation2 + $0x58] sm:$0xff]  ;;  %v3939_v55 = vcombine.low %v105_v22, %v109_v24  ;;  %v161_v24 = vld [vmem:[#allocation2 + $0x210] sm:$0xff] }
 0x110   :  { %3352 = vmatprep.subr.bf16.mxu0 %v4392_v28  ;;  %3516 = vmatprep.subr.bf16.mxu1 %v4394_v29  ;;  %v110_v28 = vld [vmem:[#allocation2 + $0x78] sm:$0xff]  ;;  %v3931_v29 = vcombine.low %v97_v31, %v101_v15  ;;  %v153_v15 = vld [vmem:[#allocation2 + $0x1d0] sm:$0xff] }
 0x111   :  { %v3942_v33 = vcombine.high %v106_v27, %v110_v28 }
 0x113   :  { %3353 = vmatpush1.bf16.msra.mxu0 %v4391_v36  ;;  %3517 = vmatpush1.bf16.msra.mxu1 %v4393_v63  ;;  %v117_v36 = vld [vmem:[#allocation2 + $0xb0] sm:$0xff]  ;;  %v114_v63 = vld [vmem:[#allocation2 + $0x98] sm:$0xff] }
 0x114   :  { %3354 = vmatprep.subr.bf16.mxu0 %v4400_v37  ;;  %3518 = vmatprep.subr.bf16.mxu1 %v4402_v38  ;;  %v118_v37 = vld [vmem:[#allocation2 + $0xb8] sm:$0xff]  ;;  %v3941_v38 = vcombine.low %v106_v27, %v110_v28  ;;  %v3948_v39 = vcombine.high %v113_v35, %v117_v36  ;;  %v165_v27 = vld [vmem:[#allocation2 + $0x230] sm:$0xff] }
 0x115   :  { %v3950_v40 = vcombine.high %v114_v63, %v118_v37  ;;  %v162_v28 = vld [vmem:[#allocation2 + $0x218] sm:$0xff] }
 0x117   :  { %3355 = vmatpush1.bf16.msra.mxu0 %v4399_v45  ;;  %3519 = vmatpush1.bf16.msra.mxu1 %v4401_v46  ;;  %v122_v45 = vld [vmem:[#allocation2 + $0xd8] sm:$0xff] }
 0x118   :  { %3356 = vmatprep.subr.bf16.mxu0 %v4408_v47  ;;  %3520 = vmatprep.subr.bf16.mxu1 %v4410_v48  ;;  %v126_v46 = vld [vmem:[#allocation2 + $0xf8] sm:$0xff]  ;;  %v3947_v47 = vcombine.low %v113_v35, %v117_v36  ;;  %v3949_v48 = vcombine.low %v114_v63, %v118_v37  ;;  %v169_v36 = vld [vmem:[#allocation2 + $0x250] sm:$0xff] }
 0x119   :  { %v3958_v50 = vcombine.high %v122_v45, %v126_v46  ;;  %v173_v63 = vld [vmem:[#allocation2 + $0x270] sm:$0xff]  ;;  %v170_v37 = vld [vmem:[#allocation2 + $0x258] sm:$0xff] }
 0x11b   :  { %3357 = vmatpush1.bf16.msra.mxu0 %v4407_v16  ;;  %3521 = vmatpush1.bf16.msra.mxu1 %v4409_v56  ;;  %v130_v16 = vld [vmem:[#allocation2 + $0x118] sm:$0xff] }
 0x11c   :  { %3358 = vmatprep.subr.bf16.mxu0 %v4416_v57  ;;  %3522 = vmatprep.subr.bf16.mxu1 %v4418_v58  ;;  %v134_v56 = vld [vmem:[#allocation2 + $0x138] sm:$0xff]  ;;  %v3955_v57 = vcombine.low %v121_v42, %v125_v43  ;;  %v3957_v58 = vcombine.low %v122_v45, %v126_v46  ;;  %v177_v43 = vld [vmem:[#allocation2 + $0x290] sm:$0xff] }
 0x11d   :  { %v181_v45 = vld [vmem:[#allocation2 + $0x2b0] sm:$0xff]  ;;  %v178_v46 = vld [vmem:[#allocation2 + $0x298] sm:$0xff] }
 0x11f   :  { %3359 = vmatpush1.bf16.msra.mxu0 %v4415_v0  ;;  %3523 = vmatpush1.bf16.msra.mxu1 %v4417_v1  ;;  %v142_v0 = vld [vmem:[#allocation2 + $0x178] sm:$0xff]  ;;  %v3963_v1 = vcombine.low %v129_v52, %v133_v54  ;;  %v185_v54 = vld [vmem:[#allocation2 + $0x2d0] sm:$0xff] }
 0x120   :  { %3360 = vmatprep.subr.bf16.mxu0 %v4424_v3  ;;  %3524 = vmatprep.subr.bf16.mxu1 %v4426_v4  ;;  %v3965_v3 = vcombine.low %v130_v16, %v134_v56  ;;  %v3972_v4 = vcombine.high %v137_v60, %v141_v61  ;;  %v3974_v5 = vcombine.high %v138_v62, %v142_v0 }
 0x123   :  { %3361 = vmatpush1.bf16.msra.mxu0 %v4423_v10  ;;  %3525 = vmatpush1.bf16.msra.mxu1 %v4425_v11  ;;  %v150_v10 = vld [vmem:[#allocation2 + $0x1b8] sm:$0xff]  ;;  %v3971_v11 = vcombine.low %v137_v60, %v141_v61  ;;  %v193_v61 = vld [vmem:[#allocation2 + $0x310] sm:$0xff] }
 0x124   :  { %3362 = vmatprep.subr.bf16.mxu0 %v4432_v13  ;;  %3526 = vmatprep.subr.bf16.mxu1 %v4434_v14  ;;  %v3973_v13 = vcombine.low %v138_v62, %v142_v0  ;;  %v3980_v14 = vcombine.high %v145_v6, %v149_v7  ;;  %v3982_v31 = vcombine.high %v146_v8, %v150_v10  ;;  %v197_v62 = vld [vmem:[#allocation2 + $0x330] sm:$0xff]  ;;  %v194_v0 = vld [vmem:[#allocation2 + $0x318] sm:$0xff] }
 0x127   :  { %3363 = vmatpush1.bf16.msra.mxu0 %v4431_v19  ;;  %3527 = vmatpush1.bf16.msra.mxu1 %v4433_v59  ;;  %v158_v19 = vld [vmem:[#allocation2 + $0x1f8] sm:$0xff]  ;;  %v3979_v59 = vcombine.low %v145_v6, %v149_v7  ;;  %v201_v7 = vld [vmem:[#allocation2 + $0x350] sm:$0xff] }
 0x128   :  { %3537 = vmatprep.subr.bf16.mxu0 %v3932_v20  ;;  %3701 = vmatprep.subr.bf16.mxu1 %v3934_v21  ;;  %v3981_v20 = vcombine.low %v146_v8, %v150_v10  ;;  %v3988_v21 = vcombine.high %v153_v15, %v157_v17  ;;  %v3990_v22 = vcombine.high %v154_v18, %v158_v19  ;;  %v205_v8 = vld [vmem:[#allocation2 + $0x370] sm:$0xff]  ;;  %v202_v10 = vld [vmem:[#allocation2 + $0x358] sm:$0xff] }
 0x12a   :  { %3365 = vmatmul.mubr.bf16.vlgmr.msra.gmra.mrb[0].mxu0 %v4702_v26  ;;  %3529 = vmatmul.mubr.bf16.vlgmr.msra.gmra.mrb[0].mxu1 %v4702_v26 }
 0x12b   :  { %3538 = vmatpush1.bf16.msra.mxu0 %v3931_v29  ;;  %3702 = vmatpush1.bf16.msra.mxu1 %v3933_v30  ;;  %v166_v29 = vld [vmem:[#allocation2 + $0x238] sm:$0xff]  ;;  %v3987_v30 = vcombine.low %v153_v15, %v157_v17  ;;  %v209_v17 = vld [vmem:[#allocation2 + $0x390] sm:$0xff] }
 0x12c   :  { %3539 = vmatprep.subr.bf16.mxu0 %v3940_v32  ;;  %3703 = vmatprep.subr.bf16.mxu1 %v3942_v33  ;;  %v3989_v32 = vcombine.low %v154_v18, %v158_v19  ;;  %v3996_v33 = vcombine.high %v161_v24, %v165_v27  ;;  %v3998_v35 = vcombine.high %v162_v28, %v166_v29  ;;  %v213_v18 = vld [vmem:[#allocation2 + $0x3b0] sm:$0xff]  ;;  %v210_v19 = vld [vmem:[#allocation2 + $0x398] sm:$0xff] }
 0x12d   :  { %3569 = vmatprep.mubr.bf16.mxu0 %v4641_v9  ;;  %3733 = vmatprep.mubr.bf16.mxu1 %v4641_v9  ;;  %v3966_v9 = vcombine.high %v130_v16, %v134_v56  ;;  %v189_v16 = vld [vmem:[#allocation2 + $0x2f0] sm:$0xff]  ;;  %v186_v56 = vld [vmem:[#allocation2 + $0x2d8] sm:$0xff] }
 0x12f   :  { %3540 = vmatpush1.bf16.msra.mxu0 %v3939_v55  ;;  %3704 = vmatpush1.bf16.msra.mxu1 %v3941_v38  ;;  %v174_v55 = vld [vmem:[#allocation2 + $0x278] sm:$0xff]  ;;  %v3995_v38 = vcombine.low %v161_v24, %v165_v27  ;;  %v217_v27 = vld [vmem:[#allocation2 + $0x3d0] sm:$0xff] }
 0x130   :  { %3541 = vmatprep.subr.bf16.mxu0 %v3948_v39  ;;  %3705 = vmatprep.subr.bf16.mxu1 %v3950_v40  ;;  %v3997_v39 = vcombine.low %v162_v28, %v166_v29  ;;  %v4004_v40 = vcombine.high %v169_v36, %v173_v63  ;;  %v4006_v42 = vcombine.high %v170_v37, %v174_v55  ;;  %v221_v28 = vld [vmem:[#allocation2 + $0x3f0] sm:$0xff]  ;;  %v218_v29 = vld [vmem:[#allocation2 + $0x3d8] sm:$0xff] }
 0x133   :  { %3542 = vmatpush1.bf16.msra.mxu0 %v3947_v47  ;;  %3706 = vmatpush1.bf16.msra.mxu1 %v3949_v48  ;;  %v182_v47 = vld [vmem:[#allocation2 + $0x2b8] sm:$0xff]  ;;  %v4003_v48 = vcombine.low %v169_v36, %v173_v63  ;;  %v225_v63 = vld [vmem:[#allocation2 + $0x410] sm:$0xff] }
 0x134   :  { %3543 = vmatprep.subr.bf16.mxu0 %v3956_v49  ;;  %3707 = vmatprep.subr.bf16.mxu1 %v3958_v50  ;;  %v4005_v49 = vcombine.low %v170_v37, %v174_v55  ;;  %v4012_v50 = vcombine.high %v177_v43, %v181_v45  ;;  %v4014_v52 = vcombine.high %v178_v46, %v182_v47  ;;  %v229_v37 = vld [vmem:[#allocation2 + $0x430] sm:$0xff]  ;;  %v226_v55 = vld [vmem:[#allocation2 + $0x418] sm:$0xff] }
 0x137   :  { %3544 = vmatpush1.bf16.msra.mxu0 %v3955_v57  ;;  %3708 = vmatpush1.bf16.msra.mxu1 %v3957_v58  ;;  %v190_v57 = vld [vmem:[#allocation2 + $0x2f8] sm:$0xff]  ;;  %v4011_v58 = vcombine.low %v177_v43, %v181_v45  ;;  %v233_v45 = vld [vmem:[#allocation2 + $0x450] sm:$0xff] }
 0x138   :  { %3545 = vmatprep.subr.bf16.mxu0 %v3964_v23  ;;  %3709 = vmatprep.subr.bf16.mxu1 %v3966_v9  ;;  %v4013_v23 = vcombine.low %v178_v46, %v182_v47  ;;  %v4020_v9 = vcombine.high %v185_v54, %v189_v16  ;;  %v4022_v60 = vcombine.high %v186_v56, %v190_v57  ;;  %v237_v46 = vld [vmem:[#allocation2 + $0x470] sm:$0xff]  ;;  %v234_v47 = vld [vmem:[#allocation2 + $0x458] sm:$0xff] }
 0x13b   :  { %3546 = vmatpush1.bf16.msra.mxu0 %v3963_v1  ;;  %3710 = vmatpush1.bf16.msra.mxu1 %v3965_v3  ;;  %v198_v1 = vld [vmem:[#allocation2 + $0x338] sm:$0xff]  ;;  %v4019_v3 = vcombine.low %v185_v54, %v189_v16  ;;  %v241_v16 = vld [vmem:[#allocation2 + $0x490] sm:$0xff] }
 0x13c   :  { %3547 = vmatprep.subr.bf16.mxu0 %v3972_v4  ;;  %3711 = vmatprep.subr.bf16.mxu1 %v3974_v5  ;;  %v4021_v4 = vcombine.low %v186_v56, %v190_v57  ;;  %v4028_v5 = vcombine.high %v193_v61, %v197_v62  ;;  %v4030_v6 = vcombine.high %v194_v0, %v198_v1  ;;  %v245_v56 = vld [vmem:[#allocation2 + $0x4b0] sm:$0xff]  ;;  %v242_v57 = vld [vmem:[#allocation2 + $0x498] sm:$0xff] }
 0x13f   :  { %3548 = vmatpush1.bf16.msra.mxu0 %v3971_v11  ;;  %3712 = vmatpush1.bf16.msra.mxu1 %v3973_v13  ;;  %v206_v11 = vld [vmem:[#allocation2 + $0x378] sm:$0xff]  ;;  %v4027_v13 = vcombine.low %v193_v61, %v197_v62  ;;  %v249_v62 = vld [vmem:[#allocation2 + $0x4d0] sm:$0xff] }
 0x140   :  { %3549 = vmatprep.subr.bf16.mxu0 %v3980_v14  ;;  %3713 = vmatprep.subr.bf16.mxu1 %v3982_v31  ;;  %v4029_v14 = vcombine.low %v194_v0, %v198_v1  ;;  %v4036_v31 = vcombine.high %v201_v7, %v205_v8  ;;  %v4038_v15 = vcombine.high %v202_v10, %v206_v11  ;;  %v253_v0 = vld [vmem:[#allocation2 + $0x4f0] sm:$0xff]  ;;  %v250_v1 = vld [vmem:[#allocation2 + $0x4d8] sm:$0xff] }
 0x143   :  { %3550 = vmatpush1.bf16.msra.mxu0 %v3979_v59  ;;  %3714 = vmatpush1.bf16.msra.mxu1 %v3981_v20  ;;  %v214_v59 = vld [vmem:[#allocation2 + $0x3b8] sm:$0xff]  ;;  %v4035_v20 = vcombine.low %v201_v7, %v205_v8  ;;  %v257_v7 = vld [vmem:[#allocation2 + $0x510] sm:$0xff] }
 0x144   :  { %3551 = vmatprep.subr.bf16.mxu0 %v3988_v21  ;;  %3715 = vmatprep.subr.bf16.mxu1 %v3990_v22  ;;  %v4037_v21 = vcombine.low %v202_v10, %v206_v11  ;;  %v4044_v22 = vcombine.high %v209_v17, %v213_v18  ;;  %v4046_v24 = vcombine.high %v210_v19, %v214_v59  ;;  %v261_v8 = vld [vmem:[#allocation2 + $0x530] sm:$0xff]  ;;  %v258_v10 = vld [vmem:[#allocation2 + $0x518] sm:$0xff] }
 0x145   :  { %v262_v11 = vld [vmem:[#allocation2 + $0x538] sm:$0xff] }
 0x147   :  { %3552 = vmatpush1.bf16.msra.mxu0 %v3987_v30  ;;  %3716 = vmatpush1.bf16.msra.mxu1 %v3989_v32  ;;  %v222_v30 = vld [vmem:[#allocation2 + $0x3f8] sm:$0xff]  ;;  %v4043_v32 = vcombine.low %v209_v17, %v213_v18  ;;  %v269_v17 = vld [vmem:[#allocation2 + $0x570] sm:$0xff] }
 0x148   :  { %3553 = vmatprep.subr.bf16.mxu0 %v3996_v33  ;;  %3717 = vmatprep.subr.bf16.mxu1 %v3998_v35  ;;  %v4045_v33 = vcombine.low %v210_v19, %v214_v59  ;;  %v4052_v35 = vcombine.high %v217_v27, %v221_v28  ;;  %v4054_v36 = vcombine.high %v218_v29, %v222_v30  ;;  %v266_v18 = vld [vmem:[#allocation2 + $0x558] sm:$0xff] }
 0x149   :  { %v270_v19 = vld [vmem:[#allocation2 + $0x578] sm:$0xff]  ;;  %v4091_v59 = vcombine.low %v257_v7, %v261_v8 }
 0x14b   :  { %3554 = vmatpush1.bf16.msra.mxu0 %v3995_v38  ;;  %3718 = vmatpush1.bf16.msra.mxu1 %v3997_v39  ;;  %v230_v38 = vld [vmem:[#allocation2 + $0x438] sm:$0xff]  ;;  %v4051_v39 = vcombine.low %v217_v27, %v221_v28  ;;  %v277_v27 = vld [vmem:[#allocation2 + $0x5b0] sm:$0xff] }
 0x14c   :  { %3555 = vmatprep.subr.bf16.mxu0 %v4004_v40  ;;  %3719 = vmatprep.subr.bf16.mxu1 %v4006_v42  ;;  %v4053_v40 = vcombine.low %v218_v29, %v222_v30  ;;  %v4060_v42 = vcombine.high %v225_v63, %v229_v37  ;;  %v4062_v43 = vcombine.high %v226_v55, %v230_v38  ;;  %v274_v28 = vld [vmem:[#allocation2 + $0x598] sm:$0xff] }
 0x14d   :  { %v278_v29 = vld [vmem:[#allocation2 + $0x5b8] sm:$0xff] }
 0x14f   :  { %3556 = vmatpush1.bf16.msra.mxu0 %v4003_v48  ;;  %3720 = vmatpush1.bf16.msra.mxu1 %v4005_v49  ;;  %v238_v48 = vld [vmem:[#allocation2 + $0x478] sm:$0xff]  ;;  %v4059_v49 = vcombine.low %v225_v63, %v229_v37  ;;  %v285_v63 = vld [vmem:[#allocation2 + $0x5f0] sm:$0xff] }
 0x150   :  { %3557 = vmatprep.subr.bf16.mxu0 %v4012_v50  ;;  %3721 = vmatprep.subr.bf16.mxu1 %v4014_v52  ;;  %v4061_v50 = vcombine.low %v226_v55, %v230_v38  ;;  %v4068_v52 = vcombine.high %v233_v45, %v237_v46  ;;  %v4070_v54 = vcombine.high %v234_v47, %v238_v48  ;;  %v282_v37 = vld [vmem:[#allocation2 + $0x5d8] sm:$0xff] }
 0x151   :  { %v286_v55 = vld [vmem:[#allocation2 + $0x5f8] sm:$0xff] }
 0x153   :  { %3558 = vmatpush1.bf16.msra.mxu0 %v4011_v58  ;;  %3722 = vmatpush1.bf16.msra.mxu1 %v4013_v23  ;;  %v246_v58 = vld [vmem:[#allocation2 + $0x4b8] sm:$0xff]  ;;  %v4067_v23 = vcombine.low %v233_v45, %v237_v46  ;;  %v293_v45 = vld [vmem:[#allocation2 + $0x630] sm:$0xff] }
 0x154   :  { %3559 = vmatprep.subr.bf16.mxu0 %v4020_v9  ;;  %3723 = vmatprep.subr.bf16.mxu1 %v4022_v60  ;;  %v4069_v9 = vcombine.low %v234_v47, %v238_v48  ;;  %v4076_v60 = vcombine.high %v241_v16, %v245_v56  ;;  %v4078_v61 = vcombine.high %v242_v57, %v246_v58  ;;  %v290_v46 = vld [vmem:[#allocation2 + $0x618] sm:$0xff] }
 0x155   :  { %v294_v47 = vld [vmem:[#allocation2 + $0x638] sm:$0xff] }
 0x157   :  { %3560 = vmatpush1.bf16.msra.mxu0 %v4019_v3  ;;  %3724 = vmatpush1.bf16.msra.mxu1 %v4021_v4  ;;  %v254_v3 = vld [vmem:[#allocation2 + $0x4f8] sm:$0xff]  ;;  %v4075_v4 = vcombine.low %v241_v16, %v245_v56  ;;  %v301_v16 = vld [vmem:[#allocation2 + $0x670] sm:$0xff] }
 0x158   :  { %3561 = vmatprep.subr.bf16.mxu0 %v4028_v5  ;;  %3725 = vmatprep.subr.bf16.mxu1 %v4030_v6  ;;  %v4084_v5 = vcombine.high %v249_v62, %v253_v0  ;;  %v4086_v6 = vcombine.high %v250_v1, %v254_v3  ;;  %v298_v56 = vld [vmem:[#allocation2 + $0x658] sm:$0xff] }
 0x15b   :  { %3562 = vmatpush1.bf16.msra.mxu0 %v4027_v13  ;;  %3726 = vmatpush1.bf16.msra.mxu1 %v4029_v14  ;;  %v4083_v13 = vcombine.low %v249_v62, %v253_v0  ;;  %v4085_v14 = vcombine.low %v250_v1, %v254_v3  ;;  %v309_v62 = vld [vmem:[#allocation2 + $0x6b0] sm:$0xff]  ;;  %v306_v0 = vld [vmem:[#allocation2 + $0x698] sm:$0xff] }
 0x15c   :  { %3563 = vmatprep.subr.bf16.mxu0 %v4036_v31  ;;  %3727 = vmatprep.subr.bf16.mxu1 %v4038_v15  ;;  %v4092_v31 = vcombine.high %v257_v7, %v261_v8  ;;  %v265_v15 = vld [vmem:[#allocation2 + $0x550] sm:$0xff]  ;;  %v310_v1 = vld [vmem:[#allocation2 + $0x6b8] sm:$0xff] }
 0x15d   :  { %v4099_v30 = vcombine.low %v265_v15, %v269_v17  ;;  %v317_v7 = vld [vmem:[#allocation2 + $0x6f0] sm:$0xff]  ;;  %v314_v8 = vld [vmem:[#allocation2 + $0x6d8] sm:$0xff] }
 0x15f   :  { %3564 = vmatpush1.bf16.msra.mxu0 %v4035_v20  ;;  %3728 = vmatpush1.bf16.msra.mxu1 %v4037_v21  ;;  %v4093_v20 = vcombine.low %v258_v10, %v262_v11  ;;  %v4100_v21 = vcombine.high %v265_v15, %v269_v17  ;;  %v325_v15 = vld [vmem:[#allocation2 + $0x730] sm:$0xff]  ;;  %v322_v17 = vld [vmem:[#allocation2 + $0x718] sm:$0xff] }
 0x160   :  { %3565 = vmatprep.subr.bf16.mxu0 %v4044_v22  ;;  %3729 = vmatprep.subr.bf16.mxu1 %v4046_v24  ;;  %v4102_v22 = vcombine.high %v266_v18, %v270_v19  ;;  %v273_v24 = vld [vmem:[#allocation2 + $0x590] sm:$0xff] }
 0x161   :  { %v4107_v38 = vcombine.low %v273_v24, %v277_v27 }
 0x163   :  { %3566 = vmatpush1.bf16.msra.mxu0 %v4043_v32  ;;  %3730 = vmatpush1.bf16.msra.mxu1 %v4045_v33  ;;  %v4101_v32 = vcombine.low %v266_v18, %v270_v19  ;;  %v4108_v33 = vcombine.high %v273_v24, %v277_v27  ;;  %v326_v18 = vld [vmem:[#allocation2 + $0x738] sm:$0xff]  ;;  %v333_v24 = vld [vmem:[#allocation2 + $0x770] sm:$0xff] }
 0x164   :  { %3567 = vmatprep.subr.bf16.mxu0 %v4052_v35  ;;  %3731 = vmatprep.subr.bf16.mxu1 %v4054_v36  ;;  %v4110_v35 = vcombine.high %v274_v28, %v278_v29  ;;  %v281_v36 = vld [vmem:[#allocation2 + $0x5d0] sm:$0xff]  ;;  %v330_v27 = vld [vmem:[#allocation2 + $0x758] sm:$0xff] }
 0x165   :  { %v4115_v48 = vcombine.low %v281_v36, %v285_v63 }
 0x167   :  { %3568 = vmatpush1.bf16.msra.mxu0 %v4051_v39  ;;  %3732 = vmatpush1.bf16.msra.mxu1 %v4053_v40  ;;  %v4109_v39 = vcombine.low %v274_v28, %v278_v29  ;;  %v4116_v40 = vcombine.high %v281_v36, %v285_v63  ;;  %v334_v28 = vld [vmem:[#allocation2 + $0x778] sm:$0xff]  ;;  %v341_v36 = vld [vmem:[#allocation2 + $0x7b0] sm:$0xff] }
 0x168   :  { %3578 = vmatprep.subr.bf16.mxu0 %v4060_v42  ;;  %3742 = vmatprep.subr.bf16.mxu1 %v4062_v43  ;;  %v4118_v42 = vcombine.high %v282_v37, %v286_v55  ;;  %v289_v43 = vld [vmem:[#allocation2 + $0x610] sm:$0xff]  ;;  %v338_v63 = vld [vmem:[#allocation2 + $0x798] sm:$0xff] }
 0x16a   :  { %3570 = vmatmul.mubr.bf16.vlgmr.msra.gmra.mrb[4].mxu0 %v4654_v25  ;;  %3734 = vmatmul.mubr.bf16.vlgmr.msra.gmra.mrb[4].mxu1 %v4654_v25  ;;  %v4077_v25 = vcombine.low %v242_v57, %v246_v58  ;;  %v302_v57 = vld [vmem:[#allocation2 + $0x678] sm:$0xff]  ;;  %v4123_v58 = vcombine.low %v289_v43, %v293_v45 }
 0x16b   :  { %3579 = vmatpush1.bf16.msra.mxu0 %v4059_v49  ;;  %3743 = vmatpush1.bf16.msra.mxu1 %v4061_v50  ;;  %v4117_v49 = vcombine.low %v282_v37, %v286_v55  ;;  %v4124_v50 = vcombine.high %v289_v43, %v293_v45  ;;  %v342_v37 = vld [vmem:[#allocation2 + $0x7b8] sm:$0xff]  ;;  %v349_v43 = vld [vmem:[#allocation2 + $0x7f0] sm:$0xff] }
 0x16c   :  { %3580 = vmatprep.subr.bf16.mxu0 %v4068_v52  ;;  %3744 = vmatprep.subr.bf16.mxu1 %v4070_v54  ;;  %v4126_v52 = vcombine.high %v290_v46, %v294_v47  ;;  %v297_v54 = vld [vmem:[#allocation2 + $0x650] sm:$0xff]  ;;  %v346_v45 = vld [vmem:[#allocation2 + $0x7d8] sm:$0xff] }
 0x16d   :  { %3610 = vmatprep.mubr.bf16.mxu0 %v4656_v34  ;;  %3774 = vmatprep.mubr.bf16.mxu1 %v4656_v34  ;;  %v4094_v34 = vcombine.high %v258_v10, %v262_v11  ;;  %v4131_v3 = vcombine.low %v297_v54, %v301_v16  ;;  %v318_v10 = vld [vmem:[#allocation2 + $0x6f8] sm:$0xff] }
 0x16f   :  { %3581 = vmatpush1.bf16.msra.mxu0 %v4067_v23  ;;  %3745 = vmatpush1.bf16.msra.mxu1 %v4069_v9  ;;  %v4125_v23 = vcombine.low %v290_v46, %v294_v47  ;;  %v4132_v9 = vcombine.high %v297_v54, %v301_v16  ;;  %v350_v46 = vld [vmem:[#allocation2 + $0x7f8] sm:$0xff]  ;;  %v357_v54 = vld [vmem:[#allocation2 + $0x830] sm:$0xff] }
 0x170   :  { %3582 = vmatprep.subr.bf16.mxu0 %v4076_v60  ;;  %3746 = vmatprep.subr.bf16.mxu1 %v4078_v61  ;;  %v4134_v60 = vcombine.high %v298_v56, %v302_v57  ;;  %v305_v61 = vld [vmem:[#allocation2 + $0x690] sm:$0xff]  ;;  %v354_v16 = vld [vmem:[#allocation2 + $0x818] sm:$0xff] }
 0x171   :  { %v4139_v11 = vcombine.low %v305_v61, %v309_v62 }
 0x173   :  { %3583 = vmatpush1.bf16.msra.mxu0 %v4075_v4  ;;  %3747 = vmatpush1.bf16.msra.mxu1 %v4077_v25  ;;  %v4133_v4 = vcombine.low %v298_v56, %v302_v57  ;;  %v4140_v25 = vcombine.high %v305_v61, %v309_v62  ;;  %v358_v56 = vld [vmem:[#allocation2 + $0x838] sm:$0xff]  ;;  %v365_v61 = vld [vmem:[#allocation2 + $0x870] sm:$0xff] }
 0x174   :  { %3584 = vmatprep.subr.bf16.mxu0 %v4084_v5  ;;  %3748 = vmatprep.subr.bf16.mxu1 %v4086_v6  ;;  %v4142_v5 = vcombine.high %v306_v0, %v310_v1  ;;  %v313_v6 = vld [vmem:[#allocation2 + $0x6d0] sm:$0xff]  ;;  %v362_v62 = vld [vmem:[#allocation2 + $0x858] sm:$0xff] }
 0x175   :  { %v4147_v19 = vcombine.low %v313_v6, %v317_v7 }
 0x177   :  { %3585 = vmatpush1.bf16.msra.mxu0 %v4083_v13  ;;  %3749 = vmatpush1.bf16.msra.mxu1 %v4085_v14  ;;  %v4141_v13 = vcombine.low %v306_v0, %v310_v1  ;;  %v4148_v14 = vcombine.high %v313_v6, %v317_v7  ;;  %v366_v0 = vld [vmem:[#allocation2 + $0x878] sm:$0xff]  ;;  %v373_v6 = vld [vmem:[#allocation2 + $0x8b0] sm:$0xff] }
 0x178   :  { %3586 = vmatprep.subr.bf16.mxu0 %v4092_v31  ;;  %3750 = vmatprep.subr.bf16.mxu1 %v4094_v34  ;;  %v4150_v31 = vcombine.high %v314_v8, %v318_v10  ;;  %v321_v34 = vld [vmem:[#allocation2 + $0x710] sm:$0xff]  ;;  %v370_v7 = vld [vmem:[#allocation2 + $0x898] sm:$0xff] }
 0x179   :  { %v4155_v29 = vcombine.low %v321_v34, %v325_v15 }
 0x17b   :  { %3587 = vmatpush1.bf16.msra.mxu0 %v4091_v59  ;;  %3751 = vmatpush1.bf16.msra.mxu1 %v4093_v20  ;;  %v4149_v59 = vcombine.low %v314_v8, %v318_v10  ;;  %v4156_v20 = vcombine.high %v321_v34, %v325_v15  ;;  %v374_v8 = vld [vmem:[#allocation2 + $0x8b8] sm:$0xff]  ;;  %v381_v34 = vld [vmem:[#allocation2 + $0x8f0] sm:$0xff] }
 0x17c   :  { %3588 = vmatprep.subr.bf16.mxu0 %v4100_v21  ;;  %3752 = vmatprep.subr.bf16.mxu1 %v4102_v22  ;;  %v4158_v21 = vcombine.high %v322_v17, %v326_v18  ;;  %v329_v22 = vld [vmem:[#allocation2 + $0x750] sm:$0xff]  ;;  %v378_v15 = vld [vmem:[#allocation2 + $0x8d8] sm:$0xff] }
 0x17d   :  { %v4163_v55 = vcombine.low %v329_v22, %v333_v24 }
 0x17f   :  { %3589 = vmatpush1.bf16.msra.mxu0 %v4099_v30  ;;  %3753 = vmatpush1.bf16.msra.mxu1 %v4101_v32  ;;  %v4157_v30 = vcombine.low %v322_v17, %v326_v18  ;;  %v4164_v32 = vcombine.high %v329_v22, %v333_v24  ;;  %v382_v17 = vld [vmem:[#allocation2 + $0x8f8] sm:$0xff] }
 0x180   :  { %3590 = vmatprep.subr.bf16.mxu0 %v4108_v33  ;;  %3754 = vmatprep.subr.bf16.mxu1 %v4110_v35  ;;  %v4166_v33 = vcombine.high %v330_v27, %v334_v28  ;;  %v337_v35 = vld [vmem:[#allocation2 + $0x790] sm:$0xff]  ;;  %v386_v22 = vld [vmem:[#allocation2 + $0x918] sm:$0xff] }
 0x181   :  { %v4171_v47 = vcombine.low %v337_v35, %v341_v36  ;;  %v390_v24 = vld [vmem:[#allocation2 + $0x938] sm:$0xff] }
 0x183   :  { %3591 = vmatpush1.bf16.msra.mxu0 %v4107_v38  ;;  %3755 = vmatpush1.bf16.msra.mxu1 %v4109_v39  ;;  %v4165_v38 = vcombine.low %v330_v27, %v334_v28  ;;  %v4172_v39 = vcombine.high %v337_v35, %v341_v36  ;;  %v4213_v28 = vcombine.low %v378_v15, %v382_v17  ;;  %v398_v35 = vld [vmem:[#allocation2 + $0x978] sm:$0xff] }
 0x184   :  { %3592 = vmatprep.subr.bf16.mxu0 %v4116_v40  ;;  %3756 = vmatprep.subr.bf16.mxu1 %v4118_v42  ;;  %v4174_v40 = vcombine.high %v338_v63, %v342_v37  ;;  %v345_v42 = vld [vmem:[#allocation2 + $0x7d0] sm:$0xff] }
 0x185   :  { %v4179_v57 = vcombine.low %v345_v42, %v349_v43 }
 0x187   :  { %3593 = vmatpush1.bf16.msra.mxu0 %v4115_v48  ;;  %3757 = vmatpush1.bf16.msra.mxu1 %v4117_v49  ;;  %v4173_v48 = vcombine.low %v338_v63, %v342_v37  ;;  %v4180_v49 = vcombine.high %v345_v42, %v349_v43  ;;  %v4221_v63 = vcombine.low %v386_v22, %v390_v24  ;;  %v406_v42 = vld [vmem:[#allocation2 + $0x9b8] sm:$0xff] }
 0x188   :  { %3594 = vmatprep.subr.bf16.mxu0 %v4124_v50  ;;  %3758 = vmatprep.subr.bf16.mxu1 %v4126_v52  ;;  %v4182_v50 = vcombine.high %v346_v45, %v350_v46  ;;  %v353_v52 = vld [vmem:[#allocation2 + $0x810] sm:$0xff] }
 0x189   :  { %v4187_v1 = vcombine.low %v353_v52, %v357_v54 }
 0x18b   :  { %3595 = vmatpush1.bf16.msra.mxu0 %v4123_v58  ;;  %3759 = vmatpush1.bf16.msra.mxu1 %v4125_v23  ;;  %v4181_v58 = vcombine.low %v346_v45, %v350_v46  ;;  %v4188_v23 = vcombine.high %v353_v52, %v357_v54  ;;  %v414_v52 = vld [vmem:[#allocation2 + $0x9f8] sm:$0xff] }
 0x18c   :  { %3596 = vmatprep.subr.bf16.mxu0 %v4132_v9  ;;  %3760 = vmatprep.subr.bf16.mxu1 %v4134_v60  ;;  %v4190_v9 = vcombine.high %v354_v16, %v358_v56  ;;  %v361_v60 = vld [vmem:[#allocation2 + $0x850] sm:$0xff] }
 0x18d   :  { %v4195_v10 = vcombine.low %v361_v60, %v365_v61 }
 0x18f   :  { %3597 = vmatpush1.bf16.msra.mxu0 %v4131_v3  ;;  %3761 = vmatpush1.bf16.msra.mxu1 %v4133_v4  ;;  %v4189_v3 = vcombine.low %v354_v16, %v358_v56  ;;  %v4196_v4 = vcombine.high %v361_v60, %v365_v61  ;;  %v422_v60 = vld [vmem:[#allocation2 + $0xa38] sm:$0xff] }
 0x190   :  { %3598 = vmatprep.subr.bf16.mxu0 %v4140_v25  ;;  %3762 = vmatprep.subr.bf16.mxu1 %v4142_v5  ;;  %v4198_v25 = vcombine.high %v362_v62, %v366_v0  ;;  %v369_v5 = vld [vmem:[#allocation2 + $0x890] sm:$0xff] }
 0x191   :  { %v4203_v18 = vcombine.low %v369_v5, %v373_v6 }
 0x193   :  { %3599 = vmatpush1.bf16.msra.mxu0 %v4139_v11  ;;  %3763 = vmatpush1.bf16.msra.mxu1 %v4141_v13  ;;  %v4197_v11 = vcombine.low %v362_v62, %v366_v0  ;;  %v4204_v13 = vcombine.high %v369_v5, %v373_v6  ;;  %v430_v5 = vld [vmem:[#allocation2 + $0xa78] sm:$0xff] }
 0x194   :  { %3600 = vmatprep.subr.bf16.mxu0 %v4148_v14  ;;  %3764 = vmatprep.subr.bf16.mxu1 %v4150_v31  ;;  %v4206_v14 = vcombine.high %v370_v7, %v374_v8  ;;  %v377_v31 = vld [vmem:[#allocation2 + $0x8d0] sm:$0xff] }
 0x195   :  { %v4211_v27 = vcombine.low %v377_v31, %v381_v34 }
 0x197   :  { %3601 = vmatpush1.bf16.msra.mxu0 %v4147_v19  ;;  %3765 = vmatpush1.bf16.msra.mxu1 %v4149_v59  ;;  %v4212_v19 = vcombine.high %v377_v31, %v381_v34  ;;  %v4214_v59 = vcombine.high %v378_v15, %v382_v17  ;;  %v438_v31 = vld [vmem:[#allocation2 + $0xab8] sm:$0xff] }
 0x198   :  { %3602 = vmatprep.subr.bf16.mxu0 %v4156_v20  ;;  %3766 = vmatprep.subr.bf16.mxu1 %v4158_v21  ;;  %v385_v20 = vld [vmem:[#allocation2 + $0x910] sm:$0xff] }
 0x199   :  { %v389_v21 = vld [vmem:[#allocation2 + $0x930] sm:$0xff] }
 0x19a   :  { %v4219_v36 = vcombine.low %v385_v20, %v389_v21 }
 0x19b   :  { %3603 = vmatpush1.bf16.msra.mxu0 %v4155_v29  ;;  %3767 = vmatpush1.bf16.msra.mxu1 %v4157_v30  ;;  %v4220_v29 = vcombine.high %v385_v20, %v389_v21  ;;  %v393_v30 = vld [vmem:[#allocation2 + $0x950] sm:$0xff]  ;;  %v446_v20 = vld [vmem:[#allocation2 + $0xaf8] sm:$0xff] }
 0x19c   :  { %3604 = vmatprep.subr.bf16.mxu0 %v4164_v32  ;;  %3768 = vmatprep.subr.bf16.mxu1 %v4166_v33  ;;  %v397_v32 = vld [vmem:[#allocation2 + $0x970] sm:$0xff]  ;;  %v394_v33 = vld [vmem:[#allocation2 + $0x958] sm:$0xff] }
 0x19d   :  { %v4228_v37 = vcombine.high %v393_v30, %v397_v32  ;;  %v4227_v43 = vcombine.low %v393_v30, %v397_v32  ;;  %v4229_v45 = vcombine.low %v394_v33, %v398_v35  ;;  %v454_v30 = vld [vmem:[#allocation2 + $0xb38] sm:$0xff] }
 0x19f   :  { %3605 = vmatpush1.bf16.msra.mxu0 %v4163_v55  ;;  %3769 = vmatpush1.bf16.msra.mxu1 %v4165_v38  ;;  %v4230_v55 = vcombine.high %v394_v33, %v398_v35  ;;  %v401_v38 = vld [vmem:[#allocation2 + $0x990] sm:$0xff] }
 0x1a0   :  { %3606 = vmatprep.subr.bf16.mxu0 %v4172_v39  ;;  %3770 = vmatprep.subr.bf16.mxu1 %v4174_v40  ;;  %v405_v39 = vld [vmem:[#allocation2 + $0x9b0] sm:$0xff]  ;;  %v402_v40 = vld [vmem:[#allocation2 + $0x998] sm:$0xff] }
 0x1a1   :  { %v4236_v46 = vcombine.high %v401_v38, %v405_v39  ;;  %v4235_v54 = vcombine.low %v401_v38, %v405_v39  ;;  %v4237_v16 = vcombine.low %v402_v40, %v406_v42  ;;  %v462_v38 = vld [vmem:[#allocation2 + $0xb78] sm:$0xff] }
 0x1a3   :  { %3607 = vmatpush1.bf16.msra.mxu0 %v4171_v47  ;;  %3771 = vmatpush1.bf16.msra.mxu1 %v4173_v48  ;;  %v4238_v47 = vcombine.high %v402_v40, %v406_v42  ;;  %v409_v48 = vld [vmem:[#allocation2 + $0x9d0] sm:$0xff] }
 0x1a4   :  { %3608 = vmatprep.subr.bf16.mxu0 %v4180_v49  ;;  %3772 = vmatprep.subr.bf16.mxu1 %v4182_v50  ;;  %v413_v49 = vld [vmem:[#allocation2 + $0x9f0] sm:$0xff]  ;;  %v410_v50 = vld [vmem:[#allocation2 + $0x9d8] sm:$0xff] }
 0x1a5   :  { %v4244_v56 = vcombine.high %v409_v48, %v413_v49  ;;  %v4243_v61 = vcombine.low %v409_v48, %v413_v49  ;;  %v4245_v62 = vcombine.low %v410_v50, %v414_v52  ;;  %v470_v48 = vld [vmem:[#allocation2 + $0xbb8] sm:$0xff] }
 0x1a7   :  { %3609 = vmatpush1.bf16.msra.mxu0 %v4179_v57  ;;  %3773 = vmatpush1.bf16.msra.mxu1 %v4181_v58  ;;  %v4246_v57 = vcombine.high %v410_v50, %v414_v52  ;;  %v417_v58 = vld [vmem:[#allocation2 + $0xa10] sm:$0xff] }
 0x1a8   :  { %3619 = vmatprep.subr.bf16.mxu0 %v4188_v23  ;;  %3783 = vmatprep.subr.bf16.mxu1 %v4190_v9  ;;  %v421_v23 = vld [vmem:[#allocation2 + $0xa30] sm:$0xff]  ;;  %v418_v9 = vld [vmem:[#allocation2 + $0xa18] sm:$0xff] }
 0x1a9   :  { %v4252_v0 = vcombine.high %v417_v58, %v421_v23  ;;  %v4251_v6 = vcombine.low %v417_v58, %v421_v23  ;;  %v478_v58 = vld [vmem:[#allocation2 + $0xbf8] sm:$0xff] }
 0x1aa   :  { %3611 = vmatmul.mubr.bf16.vlgmr.msra.gmra.mrb[4].mxu0 %v4675_v41  ;;  %3775 = vmatmul.mubr.bf16.vlgmr.msra.gmra.mrb[4].mxu1 %v4675_v41  ;;  %v4205_v41 = vcombine.low %v370_v7, %v374_v8  ;;  %v4253_v7 = vcombine.low %v418_v9, %v422_v60 }
 0x1ab   :  { %3620 = vmatpush1.bf16.msra.mxu0 %v4187_v1  ;;  %3784 = vmatpush1.bf16.msra.mxu1 %v4189_v3  ;;  %v4254_v1 = vcombine.high %v418_v9, %v422_v60  ;;  %v425_v3 = vld [vmem:[#allocation2 + $0xa50] sm:$0xff] }
 0x1ac   :  { %3621 = vmatprep.subr.bf16.mxu0 %v4196_v4  ;;  %3785 = vmatprep.subr.bf16.mxu1 %v4198_v25  ;;  %v429_v4 = vld [vmem:[#allocation2 + $0xa70] sm:$0xff]  ;;  %v426_v25 = vld [vmem:[#allocation2 + $0xa58] sm:$0xff] }
 0x1ad   :  { %3651 = vmatprep.mubr.bf16.mxu0 %v4677_v51  ;;  %3815 = vmatprep.mubr.bf16.mxu1 %v4677_v51  ;;  %v4222_v51 = vcombine.high %v386_v22, %v390_v24  ;;  %v4260_v8 = vcombine.high %v425_v3, %v429_v4  ;;  %v4259_v34 = vcombine.low %v425_v3, %v429_v4  ;;  %v486_v3 = vld [vmem:[#allocation2 + $0xc38] sm:$0xff] }
 0x1ae   :  { %v4261_v15 = vcombine.low %v426_v25, %v430_v5 }
 0x1af   :  { %3622 = vmatpush1.bf16.msra.mxu0 %v4195_v10  ;;  %3786 = vmatpush1.bf16.msra.mxu1 %v4197_v11  ;;  %v4262_v10 = vcombine.high %v426_v25, %v430_v5  ;;  %v433_v11 = vld [vmem:[#allocation2 + $0xa90] sm:$0xff] }
 0x1b0   :  { %3623 = vmatprep.subr.bf16.mxu0 %v4204_v13  ;;  %3787 = vmatprep.subr.bf16.mxu1 %v4206_v14  ;;  %v437_v13 = vld [vmem:[#allocation2 + $0xab0] sm:$0xff]  ;;  %v434_v14 = vld [vmem:[#allocation2 + $0xa98] sm:$0xff] }
 0x1b1   :  { %v4268_v17 = vcombine.high %v433_v11, %v437_v13  ;;  %v4267_v21 = vcombine.low %v433_v11, %v437_v13  ;;  %v4269_v22 = vcombine.low %v434_v14, %v438_v31  ;;  %v494_v11 = vld [vmem:[#allocation2 + $0xc78] sm:$0xff] }
 0x1b3   :  { %3624 = vmatpush1.bf16.msra.mxu0 %v4203_v18  ;;  %3788 = vmatpush1.bf16.msra.mxu1 %v4205_v41  ;;  %v4270_v18 = vcombine.high %v434_v14, %v438_v31  ;;  %v441_v41 = vld [vmem:[#allocation2 + $0xad0] sm:$0xff] }
 0x1b4   :  { %3625 = vmatprep.subr.bf16.mxu0 %v4212_v19  ;;  %3789 = vmatprep.subr.bf16.mxu1 %v4214_v59  ;;  %v445_v19 = vld [vmem:[#allocation2 + $0xaf0] sm:$0xff]  ;;  %v442_v59 = vld [vmem:[#allocation2 + $0xad8] sm:$0xff] }
 0x1b5   :  { %v4276_v24 = vcombine.high %v441_v41, %v445_v19  ;;  %v4275_v32 = vcombine.low %v441_v41, %v445_v19  ;;  %v4277_v33 = vcombine.low %v442_v59, %v446_v20  ;;  %v502_v41 = vld [vmem:[#allocation2 + $0xcb8] sm:$0xff] }
 0x1b7   :  { %3626 = vmatpush1.bf16.msra.mxu0 %v4211_v27  ;;  %3790 = vmatpush1.bf16.msra.mxu1 %v4213_v28  ;;  %v4278_v27 = vcombine.high %v442_v59, %v446_v20  ;;  %v449_v28 = vld [vmem:[#allocation2 + $0xb10] sm:$0xff] }
 0x1b8   :  { %3627 = vmatprep.subr.bf16.mxu0 %v4220_v29  ;;  %3791 = vmatprep.subr.bf16.mxu1 %v4222_v51  ;;  %v453_v29 = vld [vmem:[#allocation2 + $0xb30] sm:$0xff]  ;;  %v450_v51 = vld [vmem:[#allocation2 + $0xb18] sm:$0xff] }
 0x1b9   :  { %v4284_v35 = vcombine.high %v449_v28, %v453_v29  ;;  %v4283_v39 = vcombine.low %v449_v28, %v453_v29  ;;  %v4285_v40 = vcombine.low %v450_v51, %v454_v30  ;;  %v510_v28 = vld [vmem:[#allocation2 + $0xcf8] sm:$0xff] }
 0x1bb   :  { %3628 = vmatpush1.bf16.msra.mxu0 %v4219_v36  ;;  %3792 = vmatpush1.bf16.msra.mxu1 %v4221_v63  ;;  %v4286_v36 = vcombine.high %v450_v51, %v454_v30  ;;  %v457_v63 = vld [vmem:[#allocation2 + $0xb50] sm:$0xff] }
 0x1bc   :  { %3629 = vmatprep.subr.bf16.mxu0 %v4228_v37  ;;  %3793 = vmatprep.subr.bf16.mxu1 %v4230_v55  ;;  %v461_v37 = vld [vmem:[#allocation2 + $0xb70] sm:$0xff]  ;;  %v458_v55 = vld [vmem:[#allocation2 + $0xb58] sm:$0xff] }
 0x1bd   :  { %v4292_v42 = vcombine.high %v457_v63, %v461_v37  ;;  %v4291_v49 = vcombine.low %v457_v63, %v461_v37  ;;  %v4293_v50 = vcombine.low %v458_v55, %v462_v38 }
 0x1bf   :  { %3630 = vmatpush1.bf16.msra.mxu0 %v4227_v43  ;;  %3794 = vmatpush1.bf16.msra.mxu1 %v4229_v45  ;;  %v4294_v43 = vcombine.high %v458_v55, %v462_v38  ;;  %v465_v45 = vld [vmem:[#allocation2 + $0xb90] sm:$0xff] }
 0x1c0   :  { %3631 = vmatprep.subr.bf16.mxu0 %v4236_v46  ;;  %3795 = vmatprep.subr.bf16.mxu1 %v4238_v47  ;;  %v469_v46 = vld [vmem:[#allocation2 + $0xbb0] sm:$0xff]  ;;  %v466_v47 = vld [vmem:[#allocation2 + $0xb98] sm:$0xff] }
 0x1c1   :  { %v4300_v52 = vcombine.high %v465_v45, %v469_v46  ;;  %v4299_v23 = vcombine.low %v465_v45, %v469_v46  ;;  %v4301_v9 = vcombine.low %v466_v47, %v470_v48  ;;  %v521_v38 = vld [vmem:[#allocation2 + $0xd50] sm:$0xff]  ;;  %v4721_v46 = vld [vmem:[#allocation5] sm:$0xff] }
 0x1c3   :  { %3632 = vmatpush1.bf16.msra.mxu0 %v4235_v54  ;;  %3796 = vmatpush1.bf16.msra.mxu1 %v4237_v16  ;;  %v4302_v54 = vcombine.high %v466_v47, %v470_v48  ;;  %v473_v16 = vld [vmem:[#allocation2 + $0xbd0] sm:$0xff]  ;;  %v619_v47 = vsub.s32 2, %v4625_v44  ;;  %v615_v48 = vsub.s32 1, %v4625_v44 }
 0x1c4   :  { %3633 = vmatprep.subr.bf16.mxu0 %v4244_v56  ;;  %3797 = vmatprep.subr.bf16.mxu1 %v4246_v57  ;;  %v477_v56 = vld [vmem:[#allocation2 + $0xbf0] sm:$0xff]  ;;  %v474_v57 = vld [vmem:[#allocation2 + $0xbd8] sm:$0xff] }
 0x1c5   :  { %v4308_v60 = vcombine.high %v473_v16, %v477_v56  ;;  %v4307_v4 = vcombine.low %v473_v16, %v477_v56  ;;  %v4309_v25 = vcombine.low %v474_v57, %v478_v58  ;;  %v529_v16 = vld [vmem:[#allocation2 + $0xd90] sm:$0xff] }
 0x1c6   :  { %v533_v56 = vld [vmem:[#allocation2 + $0xdb0] sm:$0xff] }
 0x1c7   :  { %3634 = vmatpush1.bf16.msra.mxu0 %v4243_v61  ;;  %3798 = vmatpush1.bf16.msra.mxu1 %v4245_v62  ;;  %v4310_v61 = vcombine.high %v474_v57, %v478_v58  ;;  %v481_v62 = vld [vmem:[#allocation2 + $0xc10] sm:$0xff]  ;;  %v530_v58 = vld [vmem:[#allocation2 + $0xd98] sm:$0xff] }
 0x1c8   :  { %3635 = vmatprep.subr.bf16.mxu0 %v4252_v0  ;;  %3799 = vmatprep.subr.bf16.mxu1 %v4254_v1  ;;  %v485_v0 = vld [vmem:[#allocation2 + $0xc30] sm:$0xff]  ;;  %v482_v1 = vld [vmem:[#allocation2 + $0xc18] sm:$0xff] }
 0x1c9   :  { %v4316_v5 = vcombine.high %v481_v62, %v485_v0  ;;  %v4315_v13 = vcombine.low %v481_v62, %v485_v0  ;;  %v4317_v14 = vcombine.low %v482_v1, %v486_v3 }
 0x1cb   :  { %3636 = vmatpush1.bf16.msra.mxu0 %v4251_v6  ;;  %3800 = vmatpush1.bf16.msra.mxu1 %v4253_v7  ;;  %v4318_v6 = vcombine.high %v482_v1, %v486_v3  ;;  %v489_v7 = vld [vmem:[#allocation2 + $0xc50] sm:$0xff]  ;;  %v4364_v1 = vcombine.high %v529_v16, %v533_v56 }
 0x1cc   :  { %3637 = vmatprep.subr.bf16.mxu0 %v4260_v8  ;;  %3801 = vmatprep.subr.bf16.mxu1 %v4262_v10  ;;  %v493_v8 = vld [vmem:[#allocation2 + $0xc70] sm:$0xff]  ;;  %v490_v10 = vld [vmem:[#allocation2 + $0xc58] sm:$0xff] }
 0x1cd   :  { %v4324_v31 = vcombine.high %v489_v7, %v493_v8  ;;  %v4323_v19 = vcombine.low %v489_v7, %v493_v8  ;;  %v4325_v59 = vcombine.low %v490_v10, %v494_v11 }
 0x1cf   :  { %3638 = vmatpush1.bf16.msra.mxu0 %v4259_v34  ;;  %3802 = vmatpush1.bf16.msra.mxu1 %v4261_v15  ;;  %v4326_v34 = vcombine.high %v490_v10, %v494_v11  ;;  %v497_v15 = vld [vmem:[#allocation2 + $0xc90] sm:$0xff]  ;;  %v538_v10 = vld [vmem:[#allocation2 + $0xdd8] sm:$0xff] }
 0x1d0   :  { %3639 = vmatprep.subr.bf16.mxu0 %v4268_v17  ;;  %3803 = vmatprep.subr.bf16.mxu1 %v4270_v18  ;;  %v501_v17 = vld [vmem:[#allocation2 + $0xcb0] sm:$0xff]  ;;  %v498_v18 = vld [vmem:[#allocation2 + $0xc98] sm:$0xff] }
 0x1d1   :  { %v4332_v20 = vcombine.high %v497_v15, %v501_v17  ;;  %v4331_v29 = vcombine.low %v497_v15, %v501_v17  ;;  %v542_v11 = vld [vmem:[#allocation2 + $0xdf8] sm:$0xff]  ;;  %v4363_v15 = vcombine.low %v529_v16, %v533_v56  ;;  %v569_v56 = vld [vmem:[#allocation2 + $0xed0] sm:$0xff] }
 0x1d3   :  { %3640 = vmatpush1.bf16.msra.mxu0 %v4267_v21  ;;  %3804 = vmatpush1.bf16.msra.mxu1 %v4269_v22  ;;  %v4334_v21 = vcombine.high %v498_v18, %v502_v41  ;;  %v505_v22 = vld [vmem:[#allocation2 + $0xcd0] sm:$0xff] }
 0x1d4   :  { %3641 = vmatprep.subr.bf16.mxu0 %v4276_v24  ;;  %3805 = vmatprep.subr.bf16.mxu1 %v4278_v27  ;;  %v509_v24 = vld [vmem:[#allocation2 + $0xcf0] sm:$0xff]  ;;  %v506_v27 = vld [vmem:[#allocation2 + $0xcd8] sm:$0xff] }
 0x1d5   :  { %v4340_v51 = vcombine.high %v505_v22, %v509_v24  ;;  %v4342_v30 = vcombine.high %v506_v27, %v510_v28  ;;  %v4339_v63 = vcombine.low %v505_v22, %v509_v24  ;;  %v4341_v37 = vcombine.low %v506_v27, %v510_v28  ;;  %v545_v24 = vld [vmem:[#allocation2 + $0xe10] sm:$0xff] }
 0x1d6   :  { %v4374_v22 = vcombine.high %v538_v10, %v542_v11  ;;  %v549_v27 = vld [vmem:[#allocation2 + $0xe30] sm:$0xff] }
 0x1d7   :  { %3642 = vmatpush1.bf16.msra.mxu0 %v4275_v32  ;;  %3806 = vmatpush1.bf16.msra.mxu1 %v4277_v33  ;;  %v513_v32 = vld [vmem:[#allocation2 + $0xd10] sm:$0xff] }
 0x1d8   :  { %3643 = vmatprep.subr.bf16.mxu0 %v4284_v35  ;;  %3807 = vmatprep.subr.bf16.mxu1 %v4286_v36  ;;  %v517_v33 = vld [vmem:[#allocation2 + $0xd30] sm:$0xff]  ;;  %v514_v35 = vld [vmem:[#allocation2 + $0xd18] sm:$0xff] }
 0x1d9   :  { %v518_v36 = vld [vmem:[#allocation2 + $0xd38] sm:$0xff]  ;;  %v4348_v55 = vcombine.high %v513_v32, %v517_v33  ;;  %v4347_v45 = vcombine.low %v513_v32, %v517_v33  ;;  %v4373_v33 = vcombine.low %v538_v10, %v542_v11  ;;  %v589_v10 = vld [vmem:[#allocation2 + $0xf70] sm:$0xff] }
 0x1da   :  { %v586_v11 = vld [vmem:[#allocation2 + $0xf58] sm:$0xff] }
 0x1db   :  { %3644 = vmatpush1.bf16.msra.mxu0 %v4283_v39  ;;  %3808 = vmatpush1.bf16.msra.mxu1 %v4285_v40  ;;  %v525_v39 = vld [vmem:[#allocation2 + $0xd70] sm:$0xff]  ;;  %v611_v40 = vsub.s32 0, %v4625_v44 }
 0x1dc   :  { %3645 = vmatprep.subr.bf16.mxu0 %v4292_v42  ;;  %3809 = vmatprep.subr.bf16.mxu1 %v4294_v43  ;;  %v522_v42 = vld [vmem:[#allocation2 + $0xd58] sm:$0xff] }
 0x1dd   :  { %v526_v43 = vld [vmem:[#allocation2 + $0xd78] sm:$0xff]  ;;  %v612_v57 = vrot.slane %v4721_v46, %v611_v40 }
 0x1de   :  { %v4357_v0 = vcombine.low %v522_v42, %v526_v43 }
 0x1df   :  { %3646 = vmatpush1.bf16.msra.mxu0 %v4291_v49  ;;  %3810 = vmatpush1.bf16.msra.mxu1 %v4293_v50  ;;  %v4349_v49 = vcombine.low %v514_v35, %v518_v36  ;;  %v623_v50 = vsub.s32 3, %v4625_v44 }
 0x1e0   :  { %3647 = vmatprep.subr.bf16.mxu0 %v4300_v52  ;;  %3811 = vmatprep.subr.bf16.mxu1 %v4302_v54  ;;  %v4356_v52 = vcombine.high %v521_v38, %v525_v39  ;;  %v4358_v54 = vcombine.high %v522_v42, %v526_v43 }
 0x1e1   :  { %v624_v62 = vrot.slane %v4721_v46, %v623_v50 }
 0x1e3   :  { %3648 = vmatpush1.bf16.msra.mxu0 %v4299_v23  ;;  %3812 = vmatpush1.bf16.msra.mxu1 %v4301_v9  ;;  %v534_v23 = vld [vmem:[#allocation2 + $0xdb8] sm:$0xff]  ;;  %v620_v9 = vrot.slane %v4721_v46, %v619_v47  ;;  %v565_v47 = vld [vmem:[#allocation2 + $0xeb0] sm:$0xff] }
 0x1e4   :  { %3649 = vmatprep.subr.bf16.mxu0 %v4308_v60  ;;  %3813 = vmatprep.subr.bf16.mxu1 %v4310_v61  ;;  %v616_v60 = vrot.slane %v4721_v46, %v615_v48  ;;  %v4355_v61 = vcombine.low %v521_v38, %v525_v39  ;;  %v4379_v39 = vcombine.low %v545_v24, %v549_v27  ;;  %v562_v48 = vld [vmem:[#allocation2 + $0xe98] sm:$0xff] }
 0x1e7   :  { %3650 = vmatpush1.bf16.msra.mxu0 %v4307_v4  ;;  %3814 = vmatpush1.bf16.msra.mxu1 %v4309_v25  ;;  %v4366_v4 = vcombine.high %v530_v58, %v534_v23  ;;  %v537_v25 = vld [vmem:[#allocation2 + $0xdd0] sm:$0xff] }
 0x1e8   :  { %3660 = vmatprep.subr.bf16.mxu0 %v4316_v5  ;;  %3824 = vmatprep.subr.bf16.mxu1 %v4318_v6  ;;  %v541_v5 = vld [vmem:[#allocation2 + $0xdf0] sm:$0xff] }
 0x1ea   :  { %3652 = vmatmul.mubr.bf16.vlgmr.msra.gmra.mrb[4].mxu0 %v4692_v2  ;;  %3816 = vmatmul.mubr.bf16.vlgmr.msra.gmra.mrb[4].mxu1 %v4692_v2  ;;  %v4333_v2 = vcombine.low %v498_v18, %v502_v41 }
 0x1eb   :  { %3661 = vmatpush1.bf16.msra.mxu0 %v4315_v13  ;;  %3825 = vmatpush1.bf16.msra.mxu1 %v4317_v14 }
 0x1ec   :  { %3662 = vmatprep.subr.bf16.mxu0 %v4324_v31  ;;  %3826 = vmatprep.subr.bf16.mxu1 %v4326_v34 }
 0x1ed   :  { %3692 = vmatprep.mubr.bf16.mxu0 %v4694_v12  ;;  %3856 = vmatprep.mubr.bf16.mxu1 %v4694_v12  ;;  %v4350_v12 = vcombine.high %v514_v35, %v518_v36  ;;  %v4380_v35 = vcombine.high %v545_v24, %v549_v27  ;;  %v601_v24 = vld [vmem:[#allocation2 + $0xfd0] sm:$0xff] }
 0x1ee   :  { %v605_v27 = vld [vmem:[#allocation2 + $0xff0] sm:$0xff] }
 0x1ef   :  { %3663 = vmatpush1.bf16.msra.mxu0 %v4323_v19  ;;  %3827 = vmatpush1.bf16.msra.mxu1 %v4325_v59  ;;  %v4365_v19 = vcombine.low %v530_v58, %v534_v23  ;;  %v4372_v59 = vcombine.high %v537_v25, %v541_v5  ;;  %v570_v58 = vld [vmem:[#allocation2 + $0xed8] sm:$0xff] }
 0x1f0   :  { %3664 = vmatprep.subr.bf16.mxu0 %v4332_v20  ;;  %3828 = vmatprep.subr.bf16.mxu1 %v4334_v21  ;;  %v574_v23 = vld [vmem:[#allocation2 + $0xef8] sm:$0xff] }
 0x1f3   :  { %3665 = vmatpush1.bf16.msra.mxu0 %v4331_v29  ;;  %3829 = vmatpush1.bf16.msra.mxu1 %v4333_v2  ;;  %v546_v29 = vld [vmem:[#allocation2 + $0xe18] sm:$0xff] }
 0x1f4   :  { %3666 = vmatprep.subr.bf16.mxu0 %v4340_v51  ;;  %3830 = vmatprep.subr.bf16.mxu1 %v4342_v30  ;;  %v550_v2 = vld [vmem:[#allocation2 + $0xe38] sm:$0xff]  ;;  %v4371_v30 = vcombine.low %v537_v25, %v541_v5  ;;  %v4405_v5 = vcombine.low %v570_v58, %v574_v23 }
 0x1f5   :  { %v4382_v36 = vcombine.high %v546_v29, %v550_v2  ;;  %v4381_v40 = vcombine.low %v546_v29, %v550_v2  ;;  %v606_v29 = vld [vmem:[#allocation2 + $0xff8] sm:$0xff] }
 0x1f7   :  { %3667 = vmatpush1.bf16.msra.mxu0 %v4339_v63  ;;  %3831 = vmatpush1.bf16.msra.mxu1 %v4341_v37  ;;  %v553_v63 = vld [vmem:[#allocation2 + $0xe50] sm:$0xff] }
 0x1f8   :  { %3668 = vmatprep.subr.bf16.mxu0 %v4348_v55  ;;  %3832 = vmatprep.subr.bf16.mxu1 %v4350_v12  ;;  %v557_v37 = vld [vmem:[#allocation2 + $0xe70] sm:$0xff]  ;;  %v554_v55 = vld [vmem:[#allocation2 + $0xe58] sm:$0xff] }
 0x1f9   :  { %v558_v12 = vld [vmem:[#allocation2 + $0xe78] sm:$0xff]  ;;  %v4388_v42 = vcombine.high %v553_v63, %v557_v37  ;;  %v4387_v50 = vcombine.low %v553_v63, %v557_v37  ;;  %v635_v63 = vsub.s32 6, %v4625_v44  ;;  %v631_v37 = vsub.s32 5, %v4625_v44 }
 0x1fa   :  { %v4390_v43 = vcombine.high %v554_v55, %v558_v12 }
 0x1fb   :  { %3669 = vmatpush1.bf16.msra.mxu0 %v4347_v45  ;;  %3833 = vmatpush1.bf16.msra.mxu1 %v4349_v49  ;;  %v561_v45 = vld [vmem:[#allocation2 + $0xe90] sm:$0xff]  ;;  %v566_v49 = vld [vmem:[#allocation2 + $0xeb8] sm:$0xff] }
 0x1fc   :  { %3670 = vmatprep.subr.bf16.mxu0 %v4356_v52  ;;  %3834 = vmatprep.subr.bf16.mxu1 %v4358_v54  ;;  %v4389_v52 = vcombine.low %v554_v55, %v558_v12  ;;  %v4396_v54 = vcombine.high %v561_v45, %v565_v47  ;;  %v4398_v16 = vcombine.high %v562_v48, %v566_v49  ;;  %v639_v55 = vsub.s32 7, %v4625_v44 }
 0x1fd   :  { %v3366_v3 = vpop.f32.mrb[0].mxu0  ;;  %v3530_v7 = vpop.f32.mrb[0].mxu1 }
 0x1fe   :  { %v4439_v6 = vadd.f32 %v3366_v3, %v612_v57  ;;  %v3368_v8 = vpop.f32.mrb[1].mxu0  ;;  %v4441_v13 = vadd.f32 %v3530_v7, %v620_v9  ;;  %v3532_v31 = vpop.f32.mrb[1].mxu1  ;;  %v573_v57 = vld [vmem:[#allocation2 + $0xef0] sm:$0xff]  ;;  %v4395_v9 = vcombine.low %v561_v45, %v565_v47  ;;  %v578_v3 = vld [vmem:[#allocation2 + $0xf18] sm:$0xff] }
 0x1ff   :  { %v4440_v14 = vadd.f32 %v3368_v8, %v616_v60  ;;  %v3370_v34 = vpop.f32.mrb[2].mxu0  ;;  %3671 = vmatpush1.bf16.msra.mxu0 %v4355_v61  ;;  %v4442_v17 = vadd.f32 %v3532_v31, %v624_v62  ;;  %v3534_v18 = vpop.f32.mrb[2].mxu1  ;;  %3835 = vmatpush1.bf16.msra.mxu1 %v4357_v0  ;;  %v4397_v60 = vcombine.low %v562_v48, %v566_v49  ;;  %v577_v0 = vld [vmem:[#allocation2 + $0xf10] sm:$0xff] }
 0x200   :  { %v3371_v41 = vpop.f32.mrb[3].mxu0  ;;  %3672 = vmatprep.subr.bf16.mxu0 %v4364_v1  ;;  %v3535_v21 = vpop.f32.mrb[3].mxu1  ;;  %3836 = vmatprep.subr.bf16.mxu1 %v4366_v4  ;;  %v4404_v61 = vcombine.high %v569_v56, %v573_v57  ;;  %v4406_v62 = vcombine.high %v570_v58, %v574_v23  ;;  %v581_v1 = vld [vmem:[#allocation2 + $0xf30] sm:$0xff]  ;;  %v582_v4 = vld [vmem:[#allocation2 + $0xf38] sm:$0xff]  ;;  %v4403_v25 = vcombine.low %v569_v56, %v573_v57 }
 0x201   :  { %v3873_v20 = vcombine.low %v4439_v6, %v4440_v14  ;;  %v3874_v28 = vcombine.low %v4441_v13, %v4442_v17  ;;  %v4412_v6 = vcombine.high %v577_v0, %v581_v1  ;;  %v4414_v7 = vcombine.high %v578_v3, %v582_v4  ;;  %v585_v8 = vld [vmem:[#allocation2 + $0xf50] sm:$0xff]  ;;  %v590_v13 = vld [vmem:[#allocation2 + $0xf78] sm:$0xff] }
 0x202   :  { %v4411_v14 = vcombine.low %v577_v0, %v581_v1  ;;  %v4413_v31 = vcombine.low %v578_v3, %v582_v4  ;;  %v4420_v34 = vcombine.high %v585_v8, %v589_v10  ;;  %v593_v17 = vld [vmem:[#allocation2 + $0xf90] sm:$0xff]  ;;  %v594_v41 = vld [vmem:[#allocation2 + $0xf98] sm:$0xff] }
 0x203   :  { %v3881_v51 = vrot.slane %v3873_v20, %v4628_v53  ;;  %3673 = vmatpush1.bf16.msra.mxu0 %v4363_v15  ;;  %v3888_v32 = vrot.slane %v3874_v28, %v4628_v53  ;;  %3837 = vmatpush1.bf16.msra.mxu1 %v4365_v19  ;;  %v4422_v15 = vcombine.high %v586_v11, %v590_v13  ;;  %v597_v18 = vld [vmem:[#allocation2 + $0xfb0] sm:$0xff]  ;;  %v598_v19 = vld [vmem:[#allocation2 + $0xfb8] sm:$0xff] }
 0x204   :  { %3674 = vmatprep.subr.bf16.mxu0 %v4372_v59  ;;  %3838 = vmatprep.subr.bf16.mxu1 %v4374_v22  ;;  %v4419_v59 = vcombine.low %v585_v8, %v589_v10  ;;  %v4421_v20 = vcombine.low %v586_v11, %v590_v13  ;;  %v4428_v21 = vcombine.high %v593_v17, %v597_v18  ;;  %v602_v28 = vld [vmem:[#allocation2 + $0xfd8] sm:$0xff] }
 0x205   :  { %v3889_v38 = vcombine.low %v3881_v51, %v3888_v32  ;;  %v4430_v22 = vcombine.high %v594_v41, %v598_v19  ;;  %v4427_v2 = vcombine.low %v593_v17, %v597_v18  ;;  %v4429_v51 = vcombine.low %v594_v41, %v598_v19 }
 0x206   :  { %v4438_v32 = vcombine.high %v602_v28, %v606_v29 }
 0x207   :  { %3675 = vmatpush1.bf16.msra.mxu0 %v4371_v30  ;;  %3839 = vmatpush1.bf16.msra.mxu1 %v4373_v33  ;;  %3909 = vst [vmem:[#allocation7] sm:$0xff] %v3889_v38  ;;  %v4436_v30 = vcombine.high %v601_v24, %v605_v27  ;;  %v4435_v33 = vcombine.low %v601_v24, %v605_v27 }
 0x208   :  { %3676 = vmatprep.subr.bf16.mxu0 %v4380_v35  ;;  %3840 = vmatprep.subr.bf16.mxu1 %v4382_v36  ;;  %v4437_v35 = vcombine.low %v602_v28, %v606_v29  ;;  %v627_v36 = vsub.s32 4, %v4625_v44  ;;  %v636_v38 = vrot.slane %v4721_v46, %v635_v63 }
 0x20a   :  { %v628_v12 = vrot.slane %v4721_v46, %v627_v36 }
 0x20b   :  { %3677 = vmatpush1.bf16.msra.mxu0 %v4379_v39  ;;  %3841 = vmatpush1.bf16.msra.mxu1 %v4381_v40  ;;  %v632_v39 = vrot.slane %v4721_v46, %v631_v37  ;;  %v640_v40 = vrot.slane %v4721_v46, %v639_v55 }
 0x20c   :  { %3678 = vmatprep.subr.bf16.mxu0 %v4388_v42  ;;  %3842 = vmatprep.subr.bf16.mxu1 %v4390_v43 }
 0x20f   :  { %3679 = vmatpush1.bf16.msra.mxu0 %v4387_v50  ;;  %3843 = vmatpush1.bf16.msra.mxu1 %v4389_v52 }
 0x210   :  { %3680 = vmatprep.subr.bf16.mxu0 %v4396_v54  ;;  %3844 = vmatprep.subr.bf16.mxu1 %v4398_v16 }
 0x213   :  { %3681 = vmatpush1.bf16.msra.mxu0 %v4395_v9  ;;  %3845 = vmatpush1.bf16.msra.mxu1 %v4397_v60 }
 0x214   :  { %3682 = vmatprep.subr.bf16.mxu0 %v4404_v61  ;;  %3846 = vmatprep.subr.bf16.mxu1 %v4406_v62 }
 0x217   :  { %3683 = vmatpush1.bf16.msra.mxu0 %v4403_v25  ;;  %3847 = vmatpush1.bf16.msra.mxu1 %v4405_v5 }
 0x218   :  { %3684 = vmatprep.subr.bf16.mxu0 %v4412_v6  ;;  %3848 = vmatprep.subr.bf16.mxu1 %v4414_v7 }
 0x21b   :  { %3685 = vmatpush1.bf16.msra.mxu0 %v4411_v14  ;;  %3849 = vmatpush1.bf16.msra.mxu1 %v4413_v31 }
 0x21c   :  { %3686 = vmatprep.subr.bf16.mxu0 %v4420_v34  ;;  %3850 = vmatprep.subr.bf16.mxu1 %v4422_v15 }
 0x21f   :  { %3687 = vmatpush1.bf16.msra.mxu0 %v4419_v59  ;;  %3851 = vmatpush1.bf16.msra.mxu1 %v4421_v20 }
 0x220   :  { %3688 = vmatprep.subr.bf16.mxu0 %v4428_v21  ;;  %3852 = vmatprep.subr.bf16.mxu1 %v4430_v22 }
 0x223   :  { %3689 = vmatpush1.bf16.msra.mxu0 %v4427_v2  ;;  %3853 = vmatpush1.bf16.msra.mxu1 %v4429_v51 }
 0x224   :  { %3690 = vmatprep.subr.bf16.mxu0 %v4436_v30  ;;  %3854 = vmatprep.subr.bf16.mxu1 %v4438_v32 }
 0x227   :  { %3691 = vmatpush1.bf16.msra.mxu0 %v4435_v33  ;;  %3855 = vmatpush1.bf16.msra.mxu1 %v4437_v35 }
 0x22a   :  { %3693 = vmatmul.mubr.bf16.vlgmr.msra.gmra.mrb[4].mxu0 %v4702_v26  ;;  %3857 = vmatmul.mubr.bf16.vlgmr.msra.gmra.mrb[4].mxu1 %v4702_v26 }
 0x2fd   :  { %v3694_v42 = vpop.f32.mrb[4].mxu0  ;;  %v3858_v45 = vpop.f32.mrb[4].mxu1 }
 0x2fe   :  { %v4443_v43 = vadd.f32 %v3694_v42, %v628_v12  ;;  %v3696_v26 = vpop.f32.mrb[5].mxu0  ;;  %v4445_v47 = vadd.f32 %v3858_v45, %v636_v38  ;;  %v3860_v49 = vpop.f32.mrb[5].mxu1 }
 0x2ff   :  { %v4444_v48 = vadd.f32 %v3696_v26, %v632_v39  ;;  %v3698_v50 = vpop.f32.mrb[6].mxu0  ;;  %v4446_v52 = vadd.f32 %v3860_v49, %v640_v40  ;;  %v3862_v54 = vpop.f32.mrb[6].mxu1 }
 0x300   :  { %v3699_v16 = vpop.f32.mrb[7].mxu0  ;;  %v3863_v56 = vpop.f32.mrb[7].mxu1 }
 0x301   :  { %v3890_v44 = vcombine.low %v4443_v43, %v4444_v48  ;;  %v3891_v57 = vcombine.low %v4445_v47, %v4446_v52 }
 0x303   :  { %v3898_v58 = vrot.slane %v3890_v44, %v4628_v53  ;;  %v3905_v46 = vrot.slane %v3891_v57, %v4628_v53 }
 0x305   :  { %v3906_v23 = vcombine.low %v3898_v58, %v3905_v46 }
 0x307   :  { %3910 = vst [vmem:[#allocation7 + $0x8] sm:$0xff] %v3906_v23 }
 0x308   :  { %4558 = shalt.err (!%p4555_p6)
}
 0x309   :  { %s4559_s17 = scalar_lea.hbm %s4759_s3, 256 }
 0x30a   :  { %p4560_p7 = scmp.ne.s32.totalorder %s4759_s3, %s4559_s17  ;;  %p4563_p8 = scmp.lt.u32.totalorder %s4559_s17, %s4759_s3 }
 0x30c   :  { %p4565_p9 = pnand %p4563_p8, %p4560_p7 }
 0x30e   :  { %4568 = shalt.err (!%p4565_p9)
}
 0x30f   :  { %3920 = dma.vmem_to_hbm [thread:$0]  %s3918_s13, 256, %s4759_s3, [#allocation4]  }
 0x310   :  { %4573 = dma.done.wait [#allocation4], 256  }
 0x311   :  { %4574 = vsyncadd [#allocation4], 4294967040 }
 0x312   :  { %3924 = vsyncpa [#allocation3], 1 }
 0x313   :  { %3925 = vsyncpa [#allocation6], 1 }
 0x314   :  { %3926 = vsyncpa [#allocation4], 1 }

// kernel: linear_classifier_forward.1
= control target key start
LH: loop header
LB: loop body
LE: loop exit
PB: predicated region body
PF: predicated region fallthrough
CT: control target
= control target key end

     0   :  { %8 = vsyncpa [#allocation3], 0  ;;  %s4756_s0 = inlined_call_operand.vmem [shape: f32[2,1024], index: 0, kind: input, shape index: {}]   ;;  %s4757_s1 = inlined_call_operand.hbm [shape: bf16[1024,1024], index: 1, kind: input, shape index: {}]   ;;  %s4758_s2 = inlined_call_operand.hbm [shape: f32[1,1024], index: 2, kind: input, shape index: {}]   ;;  %s4759_s3 = inlined_call_operand.hbm [shape: f32[2,1024], index: 3, kind: output, shape index: {}]  }
   0x1   :  { %9 = vsyncpa [#allocation6], 0 }
   0x2   :  { %10 = vsyncpa [#allocation4], 0  ;;  %s4575_s12 = smov [#allocation2]   ;;  %s4503_s16 = scalar_lea.hbm %s4757_s1, 65536 }
   0x3   :  { %s18_s13 = sshll.u32 %s4575_s12, 4  ;;  %p4504_p0 = scmp.ne.s32.totalorder %s4757_s1, %s4503_s16  ;;  %s19_s13 = int_to_ptr.vmem [resolvable:$true] %s18_s13 }
   0x4   :  { %p4507_p1 = scmp.lt.u32.totalorder %s4503_s16, %s4757_s1 }
   0x6   :  { %p4509_p2 = pnand %p4507_p1, %p4504_p0 }
   0x8   :  { %4512 = shalt.err (!%p4509_p2)
}
   0x9   :  { %s4513_s21 = scalar_lea.vmem %s19_s13, 65536  ;;  %p4518_p4 = scmp.lt.s32.totalorder %s19_s13, %s19_s13 }
   0xa   :  { %p4514_p3 = scmp.ne.s32.totalorder %s19_s13, %s4513_s21  ;;  %p4519_p5 = scmp.lt.s32.totalorder %s4513_s21, %s4513_s21 }
   0xc   :  { %p4520_p6 = por %p4519_p5, %p4518_p4 }
   0xe   :  { %p4521_p7 = pnand %p4520_p6, %p4514_p3 }
  0x10   :  { %4524 = shalt.err (!%p4521_p7)
}
  0x11   :  { %s4576_s22 = smov 512   ;;  %s4577_s23 = smov 32  }
  0x12   :  { %24 = dma.hbm_to_vmem [thread:$0]  %s4757_s1, 65536, %s19_s13, [#allocation3], %s4576_s22, %s4576_s22, %s4577_s23  }
  0x13   :  { %s4578_s26 = smov [#allocation5]   ;;  %s4525_s30 = scalar_lea.hbm %s4758_s2, 128 }
  0x14   :  { %s31_s27 = sshll.u32 %s4578_s26, 4  ;;  %p4526_p8 = scmp.ne.s32.totalorder %s4758_s2, %s4525_s30  ;;  %s32_s27 = int_to_ptr.vmem [resolvable:$true] %s31_s27 }
  0x15   :  { %p4529_p9 = scmp.lt.u32.totalorder %s4525_s30, %s4758_s2 }
  0x17   :  { %p4531_p10 = pnand %p4529_p9, %p4526_p8 }
  0x19   :  { %4534 = shalt.err (!%p4531_p10)
}
  0x1a   :  { %s4535_s8 = scalar_lea.vmem %s32_s27, 128  ;;  %p4540_p12 = scmp.lt.s32.totalorder %s32_s27, %s32_s27 }
  0x1b   :  { %p4536_p11 = scmp.ne.s32.totalorder %s32_s27, %s4535_s8  ;;  %p4541_p13 = scmp.lt.s32.totalorder %s4535_s8, %s4535_s8 }
  0x1d   :  { %p4542_p0 = por %p4541_p13, %p4540_p12 }
  0x1f   :  { %p4543_p1 = pnand %p4542_p0, %p4536_p11 }
  0x21   :  { %4546 = shalt.err (!%p4543_p1)
}
  0x22   :  { %34 = dma.hbm_to_vmem [thread:$0]  %s4758_s2, 128, %s32_s27, [#allocation6]  }
  0x23   :  { %4569 = dma.done.wait [#allocation3], 65536  }
  0x24   :  { %4570 = vsyncadd [#allocation3], 4294901760 }
  0x25   :  { %4571 = dma.done.wait [#allocation6], 128  }
  0x26   :  { %4572 = vsyncadd [#allocation6], 4294967168  ;;  %v95_v0 = vld [vmem:[#allocation2] sm:$0xff]  ;;  %v96_v2 = vld [vmem:[#allocation2 + $0x8] sm:$0xff]  ;;  %v4579_v32 = vmov 1983009808   ;;  %v49_v34 = vlaneseq }
  0x27   :  { %v99_v1 = vld [vmem:[#allocation2 + $0x20] sm:$0xff]  ;;  %v100_v4 = vld [vmem:[#allocation2 + $0x28] sm:$0xff]  ;;  %v47_v33 = vunpack.c.l.s4 %v4579_v32 }
  0x28   :  { %v3928_v3 = vcombine.high %v95_v0, %v99_v1  ;;  %v3927_v5 = vcombine.low %v95_v0, %v99_v1  ;;  %v103_v6 = vld [vmem:[#allocation2 + $0x40] sm:$0xff]  ;;  %v3930_v8 = vcombine.high %v96_v2, %v100_v4  ;;  %v3929_v9 = vcombine.low %v96_v2, %v100_v4  ;;  %v104_v11 = vld [vmem:[#allocation2 + $0x48] sm:$0xff] }
  0x29   :  { %v107_v7 = vld [vmem:[#allocation2 + $0x60] sm:$0xff]  ;;  %v108_v12 = vld [vmem:[#allocation2 + $0x68] sm:$0xff]  ;;  %v48_v43 = vunpack.c.0.s8 %v47_v33  ;;  %v4625_v44 = vshrl.u32 %v49_v34, 7 }
  0x2a   :  { %v3936_v10 = vcombine.high %v103_v6, %v107_v7  ;;  %v111_v13 = vld [vmem:[#allocation2 + $0x80] sm:$0xff]  ;;  %3209 = vmatprep.subr.bf16.mxu0 %v3928_v3  ;;  %v3938_v14 = vcombine.high %v104_v11, %v108_v12  ;;  %v112_v16 = vld [vmem:[#allocation2 + $0x88] sm:$0xff]  ;;  %3373 = vmatprep.subr.bf16.mxu1 %v3930_v8  ;;  %v3935_v18 = vcombine.low %v103_v6, %v107_v7 }
  0x2b   :  { %v115_v15 = vld [vmem:[#allocation2 + $0xa0] sm:$0xff]  ;;  %v116_v17 = vld [vmem:[#allocation2 + $0xa8] sm:$0xff]  ;;  %3210 = vmatpush1.bf16.msra.mxu0 %v3927_v5  ;;  %3374 = vmatpush1.bf16.msra.mxu1 %v3929_v9  ;;  %v3937_v19 = vcombine.low %v104_v11, %v108_v12  ;;  %v4628_v53 = vsub.s32 %v48_v43, %v4625_v44 }
  0x2c   :  { %3211 = vmatprep.subr.bf16.mxu0 %v3936_v10  ;;  %v3944_v20 = vcombine.high %v111_v13, %v115_v15  ;;  %3375 = vmatprep.subr.bf16.mxu1 %v3938_v14  ;;  %v3946_v21 = vcombine.high %v112_v16, %v116_v17  ;;  %v119_v22 = vld [vmem:[#allocation2 + $0xc0] sm:$0xff]  ;;  %v120_v24 = vld [vmem:[#allocation2 + $0xc8] sm:$0xff]  ;;  %v3943_v26 = vcombine.low %v111_v13, %v115_v15 }
  0x2d   :  { %v123_v23 = vld [vmem:[#allocation2 + $0xe0] sm:$0xff]  ;;  %v124_v25 = vld [vmem:[#allocation2 + $0xe8] sm:$0xff]  ;;  %v3945_v27 = vcombine.low %v112_v16, %v116_v17 }
  0x2e   :  { %v3952_v28 = vcombine.high %v119_v22, %v123_v23  ;;  %v3954_v29 = vcombine.high %v120_v24, %v124_v25  ;;  %v127_v30 = vld [vmem:[#allocation2 + $0x100] sm:$0xff]  ;;  %v128_v35 = vld [vmem:[#allocation2 + $0x108] sm:$0xff]  ;;  %v3951_v37 = vcombine.low %v119_v22, %v123_v23  ;;  %v3953_v38 = vcombine.low %v120_v24, %v124_v25 }
  0x2f   :  { %3212 = vmatpush1.bf16.msra.mxu0 %v3935_v18  ;;  %3376 = vmatpush1.bf16.msra.mxu1 %v3937_v19  ;;  %v131_v31 = vld [vmem:[#allocation2 + $0x120] sm:$0xff]  ;;  %v132_v36 = vld [vmem:[#allocation2 + $0x128] sm:$0xff] }
  0x30   :  { %3213 = vmatprep.subr.bf16.mxu0 %v3944_v20  ;;  %3377 = vmatprep.subr.bf16.mxu1 %v3946_v21  ;;  %v3960_v39 = vcombine.high %v127_v30, %v131_v31  ;;  %v3962_v40 = vcombine.high %v128_v35, %v132_v36  ;;  %v135_v41 = vld [vmem:[#allocation2 + $0x140] sm:$0xff]  ;;  %v136_v45 = vld [vmem:[#allocation2 + $0x148] sm:$0xff]  ;;  %v3959_v47 = vcombine.low %v127_v30, %v131_v31 }
  0x31   :  { %v139_v42 = vld [vmem:[#allocation2 + $0x160] sm:$0xff]  ;;  %v140_v46 = vld [vmem:[#allocation2 + $0x168] sm:$0xff]  ;;  %v3961_v48 = vcombine.low %v128_v35, %v132_v36 }
  0x32   :  { %v3968_v49 = vcombine.high %v135_v41, %v139_v42  ;;  %v3970_v50 = vcombine.high %v136_v45, %v140_v46  ;;  %v143_v51 = vld [vmem:[#allocation2 + $0x180] sm:$0xff]  ;;  %v144_v54 = vld [vmem:[#allocation2 + $0x188] sm:$0xff]  ;;  %v3967_v56 = vcombine.low %v135_v41, %v139_v42  ;;  %v3969_v57 = vcombine.low %v136_v45, %v140_v46 }
  0x33   :  { %3214 = vmatpush1.bf16.msra.mxu0 %v3943_v26  ;;  %3378 = vmatpush1.bf16.msra.mxu1 %v3945_v27  ;;  %v147_v52 = vld [vmem:[#allocation2 + $0x1a0] sm:$0xff]  ;;  %v148_v55 = vld [vmem:[#allocation2 + $0x1a8] sm:$0xff] }
  0x34   :  { %3215 = vmatprep.subr.bf16.mxu0 %v3952_v28  ;;  %3379 = vmatprep.subr.bf16.mxu1 %v3954_v29  ;;  %v3976_v58 = vcombine.high %v143_v51, %v147_v52  ;;  %v4633_v59 = vld [vmem:[%s4756_s0] sm:$0xff]  ;;  %v3978_v60 = vcombine.high %v144_v54, %v148_v55  ;;  %v152_v0 = vld [vmem:[#allocation2 + $0x1c8] sm:$0xff]  ;;  %v3975_v2 = vcombine.low %v143_v51, %v147_v52 }
  0x35   :  { %v151_v61 = vld [vmem:[#allocation2 + $0x1c0] sm:$0xff]  ;;  %v4637_v63 = vrot.slane %v4633_v59, %v4628_v53  ;;  %v156_v1 = vld [vmem:[#allocation2 + $0x1e8] sm:$0xff]  ;;  %v3977_v4 = vcombine.low %v144_v54, %v148_v55 }
  0x36   :  { %v155_v62 = vld [vmem:[#allocation2 + $0x1e0] sm:$0xff]  ;;  %v3986_v6 = vcombine.high %v152_v0, %v156_v1  ;;  %v160_v10 = vld [vmem:[#allocation2 + $0x208] sm:$0xff]  ;;  %v3985_v13 = vcombine.low %v152_v0, %v156_v1 }
  0x37   :  { %3216 = vmatpush1.bf16.msra.mxu0 %v3951_v37  ;;  %3380 = vmatpush1.bf16.msra.mxu1 %v3953_v38  ;;  %v60_v3 = vcombine.high %v4637_v63, %v4637_v63  ;;  %v3984_v5 = vcombine.high %v151_v61, %v155_v62  ;;  %v159_v7 = vld [vmem:[#allocation2 + $0x200] sm:$0xff]  ;;  %v164_v11 = vld [vmem:[#allocation2 + $0x228] sm:$0xff]  ;;  %v3983_v12 = vcombine.low %v151_v61, %v155_v62 }
  0x38   :  { %3217 = vmatprep.subr.bf16.mxu0 %v3960_v39  ;;  %3381 = vmatprep.subr.bf16.mxu1 %v3962_v40  ;;  %v163_v8 = vld [vmem:[#allocation2 + $0x220] sm:$0xff]  ;;  %v3994_v15 = vcombine.high %v160_v10, %v164_v11  ;;  %v168_v18 = vld [vmem:[#allocation2 + $0x248] sm:$0xff]  ;;  %v3993_v21 = vcombine.low %v160_v10, %v164_v11 }
  0x39   :  { %v4641_v9 = vpack.c.bf16 %v60_v3, %v60_v3  ;;  %v3992_v14 = vcombine.high %v159_v7, %v163_v8  ;;  %v167_v16 = vld [vmem:[#allocation2 + $0x240] sm:$0xff]  ;;  %v172_v19 = vld [vmem:[#allocation2 + $0x268] sm:$0xff]  ;;  %v3991_v20 = vcombine.low %v159_v7, %v163_v8 }
  0x3a   :  { %v171_v17 = vld [vmem:[#allocation2 + $0x260] sm:$0xff]  ;;  %v4002_v23 = vcombine.high %v168_v18, %v172_v19  ;;  %v176_v26 = vld [vmem:[#allocation2 + $0x288] sm:$0xff]  ;;  %v4001_v29 = vcombine.low %v168_v18, %v172_v19 }
  0x3b   :  { %3218 = vmatpush1.bf16.msra.mxu0 %v3959_v47  ;;  %3382 = vmatpush1.bf16.msra.mxu1 %v3961_v48  ;;  %v4000_v22 = vcombine.high %v167_v16, %v171_v17  ;;  %v175_v24 = vld [vmem:[#allocation2 + $0x280] sm:$0xff]  ;;  %v180_v27 = vld [vmem:[#allocation2 + $0x2a8] sm:$0xff]  ;;  %v3999_v28 = vcombine.low %v167_v16, %v171_v17 }
  0x3c   :  { %3219 = vmatprep.subr.bf16.mxu0 %v3968_v49  ;;  %3383 = vmatprep.subr.bf16.mxu1 %v3970_v50  ;;  %v179_v25 = vld [vmem:[#allocation2 + $0x2a0] sm:$0xff]  ;;  %v4010_v31 = vcombine.high %v176_v26, %v180_v27  ;;  %v184_v34 = vld [vmem:[#allocation2 + $0x2c8] sm:$0xff]  ;;  %v4009_v37 = vcombine.low %v176_v26, %v180_v27 }
  0x3d   :  { %3241 = vmatprep.mubr.bf16.mxu0 %v4641_v9  ;;  %3405 = vmatprep.mubr.bf16.mxu1 %v4641_v9  ;;  %v4008_v30 = vcombine.high %v175_v24, %v179_v25  ;;  %v183_v32 = vld [vmem:[#allocation2 + $0x2c0] sm:$0xff]  ;;  %v188_v35 = vld [vmem:[#allocation2 + $0x2e8] sm:$0xff]  ;;  %v4007_v36 = vcombine.low %v175_v24, %v179_v25  ;;  %v4654_v25 = vpack.c.bf16 %v4637_v63, %v4637_v63 }
  0x3e   :  { %v187_v33 = vld [vmem:[#allocation2 + $0x2e0] sm:$0xff]  ;;  %v4018_v39 = vcombine.high %v184_v34, %v188_v35  ;;  %v192_v42 = vld [vmem:[#allocation2 + $0x308] sm:$0xff]  ;;  %v4017_v46 = vcombine.low %v184_v34, %v188_v35 }
  0x3f   :  { %3220 = vmatpush1.bf16.msra.mxu0 %v3967_v56  ;;  %3384 = vmatpush1.bf16.msra.mxu1 %v3969_v57  ;;  %v4016_v38 = vcombine.high %v183_v32, %v187_v33  ;;  %v191_v40 = vld [vmem:[#allocation2 + $0x300] sm:$0xff]  ;;  %v196_v43 = vld [vmem:[#allocation2 + $0x328] sm:$0xff]  ;;  %v4015_v45 = vcombine.low %v183_v32, %v187_v33 }
  0x40   :  { %3221 = vmatprep.subr.bf16.mxu0 %v3976_v58  ;;  %3385 = vmatprep.subr.bf16.mxu1 %v3978_v60  ;;  %v195_v41 = vld [vmem:[#allocation2 + $0x320] sm:$0xff]  ;;  %v4026_v48 = vcombine.high %v192_v42, %v196_v43  ;;  %v200_v51 = vld [vmem:[#allocation2 + $0x348] sm:$0xff]  ;;  %v4025_v55 = vcombine.low %v192_v42, %v196_v43 }
  0x41   :  { %v4024_v47 = vcombine.high %v191_v40, %v195_v41  ;;  %v199_v49 = vld [vmem:[#allocation2 + $0x340] sm:$0xff]  ;;  %v204_v52 = vld [vmem:[#allocation2 + $0x368] sm:$0xff]  ;;  %v4023_v54 = vcombine.low %v191_v40, %v195_v41 }
  0x42   :  { %v203_v50 = vld [vmem:[#allocation2 + $0x360] sm:$0xff]  ;;  %v4034_v57 = vcombine.high %v200_v51, %v204_v52  ;;  %v208_v61 = vld [vmem:[#allocation2 + $0x388] sm:$0xff]  ;;  %v4033_v1 = vcombine.low %v200_v51, %v204_v52 }
  0x43   :  { %3222 = vmatpush1.bf16.msra.mxu0 %v3975_v2  ;;  %3386 = vmatpush1.bf16.msra.mxu1 %v3977_v4  ;;  %v4032_v56 = vcombine.high %v199_v49, %v203_v50  ;;  %v207_v58 = vld [vmem:[#allocation2 + $0x380] sm:$0xff]  ;;  %v212_v62 = vld [vmem:[#allocation2 + $0x3a8] sm:$0xff]  ;;  %v4031_v0 = vcombine.low %v199_v49, %v203_v50 }
  0x44   :  { %3223 = vmatprep.subr.bf16.mxu0 %v3984_v5  ;;  %3387 = vmatprep.subr.bf16.mxu1 %v3986_v6  ;;  %v211_v60 = vld [vmem:[#allocation2 + $0x3a0] sm:$0xff]  ;;  %v4042_v3 = vcombine.high %v208_v61, %v212_v62  ;;  %v45_v6 = vcombine.high %v4633_v59, %v4633_v59  ;;  %v216_v7 = vld [vmem:[#allocation2 + $0x3c8] sm:$0xff]  ;;  %v4041_v11 = vcombine.low %v208_v61, %v212_v62 }
  0x45   :  { %v4040_v2 = vcombine.high %v207_v58, %v211_v60  ;;  %v215_v4 = vld [vmem:[#allocation2 + $0x3c0] sm:$0xff]  ;;  %v220_v8 = vld [vmem:[#allocation2 + $0x3e8] sm:$0xff]  ;;  %v4039_v10 = vcombine.low %v207_v58, %v211_v60 }
  0x46   :  { %v219_v5 = vld [vmem:[#allocation2 + $0x3e0] sm:$0xff]  ;;  %v4648_v16 = vrot.slane %v45_v6, %v4628_v53  ;;  %v224_v17 = vld [vmem:[#allocation2 + $0x408] sm:$0xff]  ;;  %v4049_v59 = vcombine.low %v216_v7, %v220_v8 }
  0x47   :  { %3224 = vmatpush1.bf16.msra.mxu0 %v3983_v12  ;;  %3388 = vmatpush1.bf16.msra.mxu1 %v3985_v13  ;;  %v4048_v12 = vcombine.high %v215_v4, %v219_v5  ;;  %v4050_v13 = vcombine.high %v216_v7, %v220_v8  ;;  %v228_v18 = vld [vmem:[#allocation2 + $0x428] sm:$0xff]  ;;  %v4047_v19 = vcombine.low %v215_v4, %v219_v5  ;;  %v239_v32 = vld [vmem:[#allocation2 + $0x480] sm:$0xff] }
  0x48   :  { %3225 = vmatprep.subr.bf16.mxu0 %v3992_v14  ;;  %3389 = vmatprep.subr.bf16.mxu1 %v3994_v15  ;;  %v223_v14 = vld [vmem:[#allocation2 + $0x400] sm:$0xff]  ;;  %v61_v24 = vcombine.high %v4648_v16, %v4648_v16  ;;  %v232_v26 = vld [vmem:[#allocation2 + $0x448] sm:$0xff] }
  0x49   :  { %v227_v15 = vld [vmem:[#allocation2 + $0x420] sm:$0xff]  ;;  %v236_v27 = vld [vmem:[#allocation2 + $0x468] sm:$0xff] }
  0x4a   :  { %v243_v33 = vld [vmem:[#allocation2 + $0x4a0] sm:$0xff]  ;;  %v4656_v34 = vpack.c.bf16 %v61_v24, %v61_v24  ;;  %v240_v35 = vld [vmem:[#allocation2 + $0x488] sm:$0xff] }
  0x4b   :  { %3226 = vmatpush1.bf16.msra.mxu0 %v3991_v20  ;;  %3390 = vmatpush1.bf16.msra.mxu1 %v3993_v21  ;;  %v4056_v20 = vcombine.high %v223_v14, %v227_v15  ;;  %v4058_v21 = vcombine.high %v224_v17, %v228_v18  ;;  %v247_v40 = vld [vmem:[#allocation2 + $0x4c0] sm:$0xff]  ;;  %v248_v42 = vld [vmem:[#allocation2 + $0x4c8] sm:$0xff] }
  0x4c   :  { %3227 = vmatprep.subr.bf16.mxu0 %v4000_v22  ;;  %3391 = vmatprep.subr.bf16.mxu1 %v4002_v23  ;;  %v231_v22 = vld [vmem:[#allocation2 + $0x440] sm:$0xff]  ;;  %v252_v43 = vld [vmem:[#allocation2 + $0x4e8] sm:$0xff] }
  0x4d   :  { %v235_v23 = vld [vmem:[#allocation2 + $0x460] sm:$0xff]  ;;  %v256_v51 = vld [vmem:[#allocation2 + $0x508] sm:$0xff] }
  0x4e   :  { %v4063_v63 = vcombine.low %v231_v22, %v235_v23  ;;  %v251_v41 = vld [vmem:[#allocation2 + $0x4e0] sm:$0xff]  ;;  %v260_v52 = vld [vmem:[#allocation2 + $0x528] sm:$0xff] }
  0x4f   :  { %3228 = vmatpush1.bf16.msra.mxu0 %v3999_v28  ;;  %3392 = vmatpush1.bf16.msra.mxu1 %v4001_v29  ;;  %v4055_v28 = vcombine.low %v223_v14, %v227_v15  ;;  %v4057_v29 = vcombine.low %v224_v17, %v228_v18  ;;  %v255_v49 = vld [vmem:[#allocation2 + $0x500] sm:$0xff]  ;;  %v264_v61 = vld [vmem:[#allocation2 + $0x548] sm:$0xff] }
  0x50   :  { %3229 = vmatprep.subr.bf16.mxu0 %v4008_v30  ;;  %3393 = vmatprep.subr.bf16.mxu1 %v4010_v31  ;;  %v4064_v30 = vcombine.high %v231_v22, %v235_v23  ;;  %v4066_v31 = vcombine.high %v232_v26, %v236_v27  ;;  %v259_v50 = vld [vmem:[#allocation2 + $0x520] sm:$0xff]  ;;  %v268_v62 = vld [vmem:[#allocation2 + $0x568] sm:$0xff] }
  0x51   :  { %v263_v58 = vld [vmem:[#allocation2 + $0x540] sm:$0xff]  ;;  %v272_v6 = vld [vmem:[#allocation2 + $0x588] sm:$0xff] }
  0x52   :  { %v267_v60 = vld [vmem:[#allocation2 + $0x560] sm:$0xff]  ;;  %v276_v7 = vld [vmem:[#allocation2 + $0x5a8] sm:$0xff] }
  0x53   :  { %3230 = vmatpush1.bf16.msra.mxu0 %v4007_v36  ;;  %3394 = vmatpush1.bf16.msra.mxu1 %v4009_v37  ;;  %v244_v36 = vld [vmem:[#allocation2 + $0x4a8] sm:$0xff]  ;;  %v4065_v37 = vcombine.low %v232_v26, %v236_v27  ;;  %v271_v4 = vld [vmem:[#allocation2 + $0x580] sm:$0xff]  ;;  %v4095_v8 = vcombine.low %v263_v58, %v267_v60 }
  0x54   :  { %3231 = vmatprep.subr.bf16.mxu0 %v4016_v38  ;;  %3395 = vmatprep.subr.bf16.mxu1 %v4018_v39  ;;  %v4072_v38 = vcombine.high %v239_v32, %v243_v33  ;;  %v4074_v39 = vcombine.high %v240_v35, %v244_v36  ;;  %v275_v5 = vld [vmem:[#allocation2 + $0x5a0] sm:$0xff]  ;;  %v280_v15 = vld [vmem:[#allocation2 + $0x5c8] sm:$0xff] }
  0x55   :  { %v283_v14 = vld [vmem:[#allocation2 + $0x5e0] sm:$0xff]  ;;  %v284_v17 = vld [vmem:[#allocation2 + $0x5e8] sm:$0xff]  ;;  %v4103_v18 = vcombine.low %v271_v4, %v275_v5 }
  0x56   :  { %v291_v22 = vld [vmem:[#allocation2 + $0x620] sm:$0xff]  ;;  %v288_v23 = vld [vmem:[#allocation2 + $0x608] sm:$0xff]  ;;  %v4113_v27 = vcombine.low %v280_v15, %v284_v17 }
  0x57   :  { %3232 = vmatpush1.bf16.msra.mxu0 %v4015_v45  ;;  %3396 = vmatpush1.bf16.msra.mxu1 %v4017_v46  ;;  %v4071_v45 = vcombine.low %v239_v32, %v243_v33  ;;  %v4073_v46 = vcombine.low %v240_v35, %v244_v36  ;;  %v292_v24 = vld [vmem:[#allocation2 + $0x628] sm:$0xff] }
  0x58   :  { %3233 = vmatprep.subr.bf16.mxu0 %v4024_v47  ;;  %3397 = vmatprep.subr.bf16.mxu1 %v4026_v48  ;;  %v4080_v47 = vcombine.high %v247_v40, %v251_v41  ;;  %v4082_v48 = vcombine.high %v248_v42, %v252_v43  ;;  %v296_v32 = vld [vmem:[#allocation2 + $0x648] sm:$0xff]  ;;  %v4121_v36 = vcombine.low %v288_v23, %v292_v24 }
  0x59   :  { %v300_v33 = vld [vmem:[#allocation2 + $0x668] sm:$0xff] }
  0x5b   :  { %3234 = vmatpush1.bf16.msra.mxu0 %v4023_v54  ;;  %3398 = vmatpush1.bf16.msra.mxu1 %v4025_v55  ;;  %v4079_v54 = vcombine.low %v247_v40, %v251_v41  ;;  %v4081_v55 = vcombine.low %v248_v42, %v252_v43  ;;  %v304_v40 = vld [vmem:[#allocation2 + $0x688] sm:$0xff]  ;;  %v4129_v43 = vcombine.low %v296_v32, %v300_v33 }
  0x5c   :  { %3235 = vmatprep.subr.bf16.mxu0 %v4032_v56  ;;  %3399 = vmatprep.subr.bf16.mxu1 %v4034_v57  ;;  %v4088_v56 = vcombine.high %v255_v49, %v259_v50  ;;  %v4090_v57 = vcombine.high %v256_v51, %v260_v52  ;;  %v308_v41 = vld [vmem:[#allocation2 + $0x6a8] sm:$0xff] }
  0x5f   :  { %3236 = vmatpush1.bf16.msra.mxu0 %v4031_v0  ;;  %3400 = vmatpush1.bf16.msra.mxu1 %v4033_v1  ;;  %v4087_v0 = vcombine.low %v255_v49, %v259_v50  ;;  %v4089_v1 = vcombine.low %v256_v51, %v260_v52  ;;  %v312_v49 = vld [vmem:[#allocation2 + $0x6c8] sm:$0xff]  ;;  %v4137_v52 = vcombine.low %v304_v40, %v308_v41 }
  0x60   :  { %3237 = vmatprep.subr.bf16.mxu0 %v4040_v2  ;;  %3401 = vmatprep.subr.bf16.mxu1 %v4042_v3  ;;  %v4096_v2 = vcombine.high %v263_v58, %v267_v60  ;;  %v4098_v3 = vcombine.high %v264_v61, %v268_v62  ;;  %v316_v50 = vld [vmem:[#allocation2 + $0x6e8] sm:$0xff] }
  0x61   :  { %v320_v58 = vld [vmem:[#allocation2 + $0x708] sm:$0xff] }
  0x62   :  { %v324_v60 = vld [vmem:[#allocation2 + $0x728] sm:$0xff] }
  0x63   :  { %3238 = vmatpush1.bf16.msra.mxu0 %v4039_v10  ;;  %3402 = vmatpush1.bf16.msra.mxu1 %v4041_v11  ;;  %v4097_v10 = vcombine.low %v264_v61, %v268_v62  ;;  %v4104_v11 = vcombine.high %v271_v4, %v275_v5  ;;  %v4145_v62 = vcombine.low %v312_v49, %v316_v50  ;;  %v328_v4 = vld [vmem:[#allocation2 + $0x748] sm:$0xff] }
  0x64   :  { %3239 = vmatprep.subr.bf16.mxu0 %v4048_v12  ;;  %3403 = vmatprep.subr.bf16.mxu1 %v4050_v13  ;;  %v4106_v12 = vcombine.high %v272_v6, %v276_v7  ;;  %v279_v13 = vld [vmem:[#allocation2 + $0x5c0] sm:$0xff]  ;;  %v332_v5 = vld [vmem:[#allocation2 + $0x768] sm:$0xff] }
  0x65   :  { %v4111_v26 = vcombine.low %v279_v13, %v283_v14 }
  0x67   :  { %3240 = vmatpush1.bf16.msra.mxu0 %v4047_v19  ;;  %3404 = vmatpush1.bf16.msra.mxu1 %v4049_v59  ;;  %v4105_v19 = vcombine.low %v272_v6, %v276_v7  ;;  %v4112_v59 = vcombine.high %v279_v13, %v283_v14  ;;  %v4153_v7 = vcombine.low %v320_v58, %v324_v60  ;;  %v336_v13 = vld [vmem:[#allocation2 + $0x788] sm:$0xff] }
  0x68   :  { %3250 = vmatprep.subr.bf16.mxu0 %v4056_v20  ;;  %3414 = vmatprep.subr.bf16.mxu1 %v4058_v21  ;;  %v4114_v20 = vcombine.high %v280_v15, %v284_v17  ;;  %v287_v21 = vld [vmem:[#allocation2 + $0x600] sm:$0xff]  ;;  %v340_v14 = vld [vmem:[#allocation2 + $0x7a8] sm:$0xff]  ;;  %v4161_v17 = vcombine.low %v328_v4, %v332_v5 }
  0x69   :  { %v4119_v35 = vcombine.low %v287_v21, %v291_v22 }
  0x6a   :  { %3242 = vmatmul.mubr.bf16.vlgmr.msra.gmra.mrb[0].mxu0 %v4654_v25  ;;  %3406 = vmatmul.mubr.bf16.vlgmr.msra.gmra.mrb[0].mxu1 %v4654_v25 }
  0x6b   :  { %3251 = vmatpush1.bf16.msra.mxu0 %v4055_v28  ;;  %3415 = vmatpush1.bf16.msra.mxu1 %v4057_v29  ;;  %v4120_v28 = vcombine.high %v287_v21, %v291_v22  ;;  %v4122_v29 = vcombine.high %v288_v23, %v292_v24  ;;  %v344_v21 = vld [vmem:[#allocation2 + $0x7c8] sm:$0xff] }
  0x6c   :  { %3252 = vmatprep.subr.bf16.mxu0 %v4064_v30  ;;  %3416 = vmatprep.subr.bf16.mxu1 %v4066_v31  ;;  %v295_v30 = vld [vmem:[#allocation2 + $0x640] sm:$0xff]  ;;  %v348_v22 = vld [vmem:[#allocation2 + $0x7e8] sm:$0xff] }
  0x6d   :  { %3282 = vmatprep.mubr.bf16.mxu0 %v4656_v34  ;;  %3446 = vmatprep.mubr.bf16.mxu1 %v4656_v34  ;;  %v299_v31 = vld [vmem:[#allocation2 + $0x660] sm:$0xff]  ;;  %v4665_v23 = vld [vmem:[%s4756_s0 + $0x8] sm:$0xff]  ;;  %s4580_s0 = smov [#allocation7]  }
  0x6e   :  { %v4127_v42 = vcombine.low %v295_v30, %v299_v31  ;;  %s3917_s13 = sshll.u32 %s4580_s0, 4  ;;  %s3918_s13 = int_to_ptr.vmem [resolvable:$true] %s3917_s13 }
  0x6f   :  { %3253 = vmatpush1.bf16.msra.mxu0 %v4063_v63  ;;  %3417 = vmatpush1.bf16.msra.mxu1 %v4065_v37  ;;  %v4128_v63 = vcombine.high %v295_v30, %v299_v31  ;;  %v4130_v37 = vcombine.high %v296_v32, %v300_v33  ;;  %v355_v30 = vld [vmem:[#allocation2 + $0x820] sm:$0xff]  ;;  %v4669_v31 = vrot.slane %v4665_v23, %v4628_v53  ;;  %v352_v32 = vld [vmem:[#allocation2 + $0x808] sm:$0xff]  ;;  %s4547_s14 = scalar_lea.vmem %s3918_s13, 256  ;;  %p4552_p3 = scmp.lt.s32.totalorder %s3918_s13, %s3918_s13 }
  0x70   :  { %3254 = vmatprep.subr.bf16.mxu0 %v4072_v38  ;;  %3418 = vmatprep.subr.bf16.mxu1 %v4074_v39  ;;  %v303_v38 = vld [vmem:[#allocation2 + $0x680] sm:$0xff]  ;;  %v356_v33 = vld [vmem:[#allocation2 + $0x828] sm:$0xff]  ;;  %p4548_p2 = scmp.ne.s32.totalorder %s3918_s13, %s4547_s14  ;;  %p4553_p4 = scmp.lt.s32.totalorder %s4547_s14, %s4547_s14 }
  0x71   :  { %v307_v39 = vld [vmem:[#allocation2 + $0x6a0] sm:$0xff] }
  0x72   :  { %v4135_v51 = vcombine.low %v303_v38, %v307_v39  ;;  %p4554_p5 = por %p4553_p4, %p4552_p3 }
  0x73   :  { %3255 = vmatpush1.bf16.msra.mxu0 %v4071_v45  ;;  %3419 = vmatpush1.bf16.msra.mxu1 %v4073_v46  ;;  %v4136_v45 = vcombine.high %v303_v38, %v307_v39  ;;  %v4138_v46 = vcombine.high %v304_v40, %v308_v41  ;;  %v359_v38 = vld [vmem:[#allocation2 + $0x840] sm:$0xff]  ;;  %v77_v40 = vcombine.high %v4669_v31, %v4669_v31 }
  0x74   :  { %3256 = vmatprep.subr.bf16.mxu0 %v4080_v47  ;;  %3420 = vmatprep.subr.bf16.mxu1 %v4082_v48  ;;  %v311_v47 = vld [vmem:[#allocation2 + $0x6c0] sm:$0xff]  ;;  %v4675_v41 = vpack.c.bf16 %v4648_v16, %v4648_v16  ;;  %p4555_p6 = pnand %p4554_p5, %p4548_p2 }
  0x75   :  { %v315_v48 = vld [vmem:[#allocation2 + $0x6e0] sm:$0xff] }
  0x76   :  { %v4143_v61 = vcombine.low %v311_v47, %v315_v48  ;;  %v363_v39 = vld [vmem:[#allocation2 + $0x860] sm:$0xff] }
  0x77   :  { %3257 = vmatpush1.bf16.msra.mxu0 %v4079_v54  ;;  %3421 = vmatpush1.bf16.msra.mxu1 %v4081_v55  ;;  %v4144_v54 = vcombine.high %v311_v47, %v315_v48  ;;  %v4146_v55 = vcombine.high %v312_v49, %v316_v50  ;;  %v4192_v47 = vcombine.high %v359_v38, %v363_v39  ;;  %v367_v49 = vld [vmem:[#allocation2 + $0x880] sm:$0xff] }
  0x78   :  { %3258 = vmatprep.subr.bf16.mxu0 %v4088_v56  ;;  %3422 = vmatprep.subr.bf16.mxu1 %v4090_v57  ;;  %v319_v56 = vld [vmem:[#allocation2 + $0x700] sm:$0xff]  ;;  %v4191_v16 = vcombine.low %v359_v38, %v363_v39 }
  0x79   :  { %v323_v57 = vld [vmem:[#allocation2 + $0x720] sm:$0xff] }
  0x7a   :  { %v4151_v6 = vcombine.low %v319_v56, %v323_v57  ;;  %v371_v50 = vld [vmem:[#allocation2 + $0x8a0] sm:$0xff] }
  0x7b   :  { %3259 = vmatpush1.bf16.msra.mxu0 %v4087_v0  ;;  %3423 = vmatpush1.bf16.msra.mxu1 %v4089_v1  ;;  %v4152_v0 = vcombine.high %v319_v56, %v323_v57  ;;  %v4154_v1 = vcombine.high %v320_v58, %v324_v60  ;;  %v4200_v56 = vcombine.high %v367_v49, %v371_v50  ;;  %v375_v58 = vld [vmem:[#allocation2 + $0x8c0] sm:$0xff] }
  0x7c   :  { %3260 = vmatprep.subr.bf16.mxu0 %v4096_v2  ;;  %3424 = vmatprep.subr.bf16.mxu1 %v4098_v3  ;;  %v327_v2 = vld [vmem:[#allocation2 + $0x740] sm:$0xff] }
  0x7d   :  { %v331_v3 = vld [vmem:[#allocation2 + $0x760] sm:$0xff] }
  0x7e   :  { %v4159_v15 = vcombine.low %v327_v2, %v331_v3  ;;  %v379_v60 = vld [vmem:[#allocation2 + $0x8e0] sm:$0xff] }
  0x7f   :  { %3261 = vmatpush1.bf16.msra.mxu0 %v4095_v8  ;;  %3425 = vmatpush1.bf16.msra.mxu1 %v4097_v10  ;;  %v4160_v8 = vcombine.high %v327_v2, %v331_v3  ;;  %v4162_v10 = vcombine.high %v328_v4, %v332_v5  ;;  %v4208_v2 = vcombine.high %v375_v58, %v379_v60  ;;  %v383_v4 = vld [vmem:[#allocation2 + $0x900] sm:$0xff] }
  0x80   :  { %3262 = vmatprep.subr.bf16.mxu0 %v4104_v11  ;;  %3426 = vmatprep.subr.bf16.mxu1 %v4106_v12  ;;  %v335_v11 = vld [vmem:[#allocation2 + $0x780] sm:$0xff] }
  0x81   :  { %v339_v12 = vld [vmem:[#allocation2 + $0x7a0] sm:$0xff] }
  0x82   :  { %v4167_v24 = vcombine.low %v335_v11, %v339_v12  ;;  %v387_v5 = vld [vmem:[#allocation2 + $0x920] sm:$0xff] }
  0x83   :  { %3263 = vmatpush1.bf16.msra.mxu0 %v4103_v18  ;;  %3427 = vmatpush1.bf16.msra.mxu1 %v4105_v19  ;;  %v4168_v18 = vcombine.high %v335_v11, %v339_v12  ;;  %v4170_v19 = vcombine.high %v336_v13, %v340_v14  ;;  %v4216_v11 = vcombine.high %v383_v4, %v387_v5 }
  0x84   :  { %3264 = vmatprep.subr.bf16.mxu0 %v4112_v59  ;;  %3428 = vmatprep.subr.bf16.mxu1 %v4114_v20  ;;  %v343_v59 = vld [vmem:[#allocation2 + $0x7c0] sm:$0xff] }
  0x85   :  { %v347_v20 = vld [vmem:[#allocation2 + $0x7e0] sm:$0xff] }
  0x87   :  { %3265 = vmatpush1.bf16.msra.mxu0 %v4111_v26  ;;  %3429 = vmatpush1.bf16.msra.mxu1 %v4113_v27  ;;  %v4169_v26 = vcombine.low %v336_v13, %v340_v14  ;;  %v4176_v27 = vcombine.high %v343_v59, %v347_v20  ;;  %v391_v13 = vld [vmem:[#allocation2 + $0x940] sm:$0xff] }
  0x88   :  { %3266 = vmatprep.subr.bf16.mxu0 %v4120_v28  ;;  %3430 = vmatprep.subr.bf16.mxu1 %v4122_v29  ;;  %v4178_v28 = vcombine.high %v344_v21, %v348_v22  ;;  %v351_v29 = vld [vmem:[#allocation2 + $0x800] sm:$0xff] }
  0x89   :  { %v395_v14 = vld [vmem:[#allocation2 + $0x960] sm:$0xff] }
  0x8b   :  { %3267 = vmatpush1.bf16.msra.mxu0 %v4119_v35  ;;  %3431 = vmatpush1.bf16.msra.mxu1 %v4121_v36  ;;  %v4175_v35 = vcombine.low %v343_v59, %v347_v20  ;;  %v4177_v36 = vcombine.low %v344_v21, %v348_v22  ;;  %v4224_v59 = vcombine.high %v391_v13, %v395_v14  ;;  %v399_v21 = vld [vmem:[#allocation2 + $0x980] sm:$0xff] }
  0x8c   :  { %3268 = vmatprep.subr.bf16.mxu0 %v4128_v63  ;;  %3432 = vmatprep.subr.bf16.mxu1 %v4130_v37  ;;  %v4184_v63 = vcombine.high %v351_v29, %v355_v30  ;;  %v4186_v37 = vcombine.high %v352_v32, %v356_v33  ;;  %v403_v22 = vld [vmem:[#allocation2 + $0x9a0] sm:$0xff] }
  0x8f   :  { %3269 = vmatpush1.bf16.msra.mxu0 %v4127_v42  ;;  %3433 = vmatpush1.bf16.msra.mxu1 %v4129_v43  ;;  %v360_v42 = vld [vmem:[#allocation2 + $0x848] sm:$0xff] }
  0x90   :  { %3270 = vmatprep.subr.bf16.mxu0 %v4136_v45  ;;  %3434 = vmatprep.subr.bf16.mxu1 %v4138_v46  ;;  %v364_v43 = vld [vmem:[#allocation2 + $0x868] sm:$0xff]  ;;  %v4183_v45 = vcombine.low %v351_v29, %v355_v30  ;;  %v4185_v46 = vcombine.low %v352_v32, %v356_v33  ;;  %v4232_v29 = vcombine.high %v399_v21, %v403_v22  ;;  %v407_v32 = vld [vmem:[#allocation2 + $0x9c0] sm:$0xff] }
  0x91   :  { %v4194_v48 = vcombine.high %v360_v42, %v364_v43  ;;  %v411_v33 = vld [vmem:[#allocation2 + $0x9e0] sm:$0xff] }
  0x92   :  { %v4240_v38 = vcombine.high %v407_v32, %v411_v33 }
  0x93   :  { %3271 = vmatpush1.bf16.msra.mxu0 %v4135_v51  ;;  %3435 = vmatpush1.bf16.msra.mxu1 %v4137_v52  ;;  %v4677_v51 = vpack.c.bf16 %v77_v40, %v77_v40  ;;  %v368_v52 = vld [vmem:[#allocation2 + $0x888] sm:$0xff]  ;;  %v415_v40 = vld [vmem:[#allocation2 + $0xa00] sm:$0xff] }
  0x94   :  { %3272 = vmatprep.subr.bf16.mxu0 %v4144_v54  ;;  %3436 = vmatprep.subr.bf16.mxu1 %v4146_v55  ;;  %v372_v54 = vld [vmem:[#allocation2 + $0x8a8] sm:$0xff]  ;;  %v4193_v55 = vcombine.low %v360_v42, %v364_v43  ;;  %v419_v42 = vld [vmem:[#allocation2 + $0xa20] sm:$0xff] }
  0x95   :  { %v4202_v57 = vcombine.high %v368_v52, %v372_v54  ;;  %v416_v43 = vld [vmem:[#allocation2 + $0xa08] sm:$0xff] }
  0x97   :  { %3273 = vmatpush1.bf16.msra.mxu0 %v4143_v61  ;;  %3437 = vmatpush1.bf16.msra.mxu1 %v4145_v62  ;;  %v376_v61 = vld [vmem:[#allocation2 + $0x8c8] sm:$0xff] }
  0x98   :  { %3274 = vmatprep.subr.bf16.mxu0 %v4152_v0  ;;  %3438 = vmatprep.subr.bf16.mxu1 %v4154_v1  ;;  %v380_v62 = vld [vmem:[#allocation2 + $0x8e8] sm:$0xff]  ;;  %v4199_v0 = vcombine.low %v367_v49, %v371_v50  ;;  %v4201_v1 = vcombine.low %v368_v52, %v372_v54  ;;  %v423_v50 = vld [vmem:[#allocation2 + $0xa40] sm:$0xff] }
  0x99   :  { %v4210_v3 = vcombine.high %v376_v61, %v380_v62  ;;  %v427_v52 = vld [vmem:[#allocation2 + $0xa60] sm:$0xff]  ;;  %v424_v54 = vld [vmem:[#allocation2 + $0xa48] sm:$0xff] }
  0x9b   :  { %3275 = vmatpush1.bf16.msra.mxu0 %v4151_v6  ;;  %3439 = vmatpush1.bf16.msra.mxu1 %v4153_v7  ;;  %v384_v6 = vld [vmem:[#allocation2 + $0x908] sm:$0xff] }
  0x9c   :  { %3276 = vmatprep.subr.bf16.mxu0 %v4160_v8  ;;  %3440 = vmatprep.subr.bf16.mxu1 %v4162_v10  ;;  %v388_v7 = vld [vmem:[#allocation2 + $0x928] sm:$0xff]  ;;  %v4207_v8 = vcombine.low %v375_v58, %v379_v60  ;;  %v4209_v10 = vcombine.low %v376_v61, %v380_v62  ;;  %v431_v60 = vld [vmem:[#allocation2 + $0xa80] sm:$0xff] }
  0x9d   :  { %v4218_v12 = vcombine.high %v384_v6, %v388_v7  ;;  %v435_v61 = vld [vmem:[#allocation2 + $0xaa0] sm:$0xff]  ;;  %v432_v62 = vld [vmem:[#allocation2 + $0xa88] sm:$0xff] }
  0x9f   :  { %3277 = vmatpush1.bf16.msra.mxu0 %v4159_v15  ;;  %3441 = vmatpush1.bf16.msra.mxu1 %v4161_v17  ;;  %v392_v15 = vld [vmem:[#allocation2 + $0x948] sm:$0xff] }
  0xa0   :  { %3278 = vmatprep.subr.bf16.mxu0 %v4168_v18  ;;  %3442 = vmatprep.subr.bf16.mxu1 %v4170_v19  ;;  %v396_v17 = vld [vmem:[#allocation2 + $0x968] sm:$0xff]  ;;  %v4215_v18 = vcombine.low %v383_v4, %v387_v5  ;;  %v4217_v19 = vcombine.low %v384_v6, %v388_v7  ;;  %v439_v5 = vld [vmem:[#allocation2 + $0xac0] sm:$0xff] }
  0xa1   :  { %v4226_v20 = vcombine.high %v392_v15, %v396_v17  ;;  %v443_v6 = vld [vmem:[#allocation2 + $0xae0] sm:$0xff]  ;;  %v440_v7 = vld [vmem:[#allocation2 + $0xac8] sm:$0xff] }
  0xa3   :  { %3279 = vmatpush1.bf16.msra.mxu0 %v4167_v24  ;;  %3443 = vmatpush1.bf16.msra.mxu1 %v4169_v26  ;;  %v400_v24 = vld [vmem:[#allocation2 + $0x988] sm:$0xff] }
  0xa4   :  { %3280 = vmatprep.subr.bf16.mxu0 %v4176_v27  ;;  %3444 = vmatprep.subr.bf16.mxu1 %v4178_v28  ;;  %v404_v26 = vld [vmem:[#allocation2 + $0x9a8] sm:$0xff]  ;;  %v4223_v27 = vcombine.low %v391_v13, %v395_v14  ;;  %v4225_v28 = vcombine.low %v392_v15, %v396_v17  ;;  %v447_v14 = vld [vmem:[#allocation2 + $0xb00] sm:$0xff] }
  0xa5   :  { %v4234_v30 = vcombine.high %v400_v24, %v404_v26  ;;  %v451_v15 = vld [vmem:[#allocation2 + $0xb20] sm:$0xff]  ;;  %v448_v17 = vld [vmem:[#allocation2 + $0xb08] sm:$0xff] }
  0xa7   :  { %3281 = vmatpush1.bf16.msra.mxu0 %v4175_v35  ;;  %3445 = vmatpush1.bf16.msra.mxu1 %v4177_v36  ;;  %v408_v35 = vld [vmem:[#allocation2 + $0x9c8] sm:$0xff] }
  0xa8   :  { %3291 = vmatprep.subr.bf16.mxu0 %v4184_v63  ;;  %3455 = vmatprep.subr.bf16.mxu1 %v4186_v37  ;;  %v412_v36 = vld [vmem:[#allocation2 + $0x9e8] sm:$0xff]  ;;  %v4231_v63 = vcombine.low %v399_v21, %v403_v22  ;;  %v4233_v37 = vcombine.low %v400_v24, %v404_v26  ;;  %v455_v22 = vld [vmem:[#allocation2 + $0xb40] sm:$0xff] }
  0xa9   :  { %v4242_v39 = vcombine.high %v408_v35, %v412_v36  ;;  %v459_v24 = vld [vmem:[#allocation2 + $0xb60] sm:$0xff]  ;;  %v456_v26 = vld [vmem:[#allocation2 + $0xb48] sm:$0xff] }
  0xaa   :  { %3283 = vmatmul.mubr.bf16.vlgmr.msra.gmra.mrb[0].mxu0 %v4675_v41  ;;  %3447 = vmatmul.mubr.bf16.vlgmr.msra.gmra.mrb[0].mxu1 %v4675_v41 }
  0xab   :  { %3292 = vmatpush1.bf16.msra.mxu0 %v4183_v45  ;;  %3456 = vmatpush1.bf16.msra.mxu1 %v4185_v46  ;;  %v420_v45 = vld [vmem:[#allocation2 + $0xa28] sm:$0xff]  ;;  %v4239_v46 = vcombine.low %v407_v32, %v411_v33  ;;  %v463_v33 = vld [vmem:[#allocation2 + $0xb80] sm:$0xff] }
  0xac   :  { %3293 = vmatprep.subr.bf16.mxu0 %v4192_v47  ;;  %3457 = vmatprep.subr.bf16.mxu1 %v4194_v48  ;;  %v4241_v47 = vcombine.low %v408_v35, %v412_v36  ;;  %v4248_v48 = vcombine.high %v415_v40, %v419_v42  ;;  %v4250_v49 = vcombine.high %v416_v43, %v420_v45  ;;  %v467_v35 = vld [vmem:[#allocation2 + $0xba0] sm:$0xff]  ;;  %v464_v36 = vld [vmem:[#allocation2 + $0xb88] sm:$0xff] }
  0xad   :  { %3323 = vmatprep.mubr.bf16.mxu0 %v4677_v51  ;;  %3487 = vmatprep.mubr.bf16.mxu1 %v4677_v51 }
  0xaf   :  { %3294 = vmatpush1.bf16.msra.mxu0 %v4191_v16  ;;  %3458 = vmatpush1.bf16.msra.mxu1 %v4193_v55  ;;  %v428_v16 = vld [vmem:[#allocation2 + $0xa68] sm:$0xff]  ;;  %v4247_v55 = vcombine.low %v415_v40, %v419_v42  ;;  %v471_v42 = vld [vmem:[#allocation2 + $0xbc0] sm:$0xff] }
  0xb0   :  { %3295 = vmatprep.subr.bf16.mxu0 %v4200_v56  ;;  %3459 = vmatprep.subr.bf16.mxu1 %v4202_v57  ;;  %v4249_v56 = vcombine.low %v416_v43, %v420_v45  ;;  %v4256_v57 = vcombine.high %v423_v50, %v427_v52  ;;  %v4258_v58 = vcombine.high %v424_v54, %v428_v16  ;;  %v475_v43 = vld [vmem:[#allocation2 + $0xbe0] sm:$0xff] }
  0xb1   :  { %v62_v45 = vcombine.high %v4665_v23, %v4665_v23 }
  0xb3   :  { %3296 = vmatpush1.bf16.msra.mxu0 %v4199_v0  ;;  %3460 = vmatpush1.bf16.msra.mxu1 %v4201_v1  ;;  %v436_v0 = vld [vmem:[#allocation2 + $0xaa8] sm:$0xff]  ;;  %v4255_v1 = vcombine.low %v423_v50, %v427_v52  ;;  %v4304_v50 = vcombine.high %v471_v42, %v475_v43 }
  0xb4   :  { %3297 = vmatprep.subr.bf16.mxu0 %v4208_v2  ;;  %3461 = vmatprep.subr.bf16.mxu1 %v4210_v3  ;;  %v4257_v2 = vcombine.low %v424_v54, %v428_v16  ;;  %v4264_v3 = vcombine.high %v431_v60, %v435_v61  ;;  %v4266_v4 = vcombine.high %v432_v62, %v436_v0  ;;  %v479_v54 = vld [vmem:[#allocation2 + $0xc00] sm:$0xff] }
  0xb5   :  { %v483_v16 = vld [vmem:[#allocation2 + $0xc20] sm:$0xff] }
  0xb7   :  { %3298 = vmatpush1.bf16.msra.mxu0 %v4207_v8  ;;  %3462 = vmatpush1.bf16.msra.mxu1 %v4209_v10  ;;  %v444_v8 = vld [vmem:[#allocation2 + $0xae8] sm:$0xff]  ;;  %v4263_v10 = vcombine.low %v431_v60, %v435_v61  ;;  %v4312_v60 = vcombine.high %v479_v54, %v483_v16 }
  0xb8   :  { %3299 = vmatprep.subr.bf16.mxu0 %v4216_v11  ;;  %3463 = vmatprep.subr.bf16.mxu1 %v4218_v12  ;;  %v4265_v11 = vcombine.low %v432_v62, %v436_v0  ;;  %v4272_v12 = vcombine.high %v439_v5, %v443_v6  ;;  %v4274_v13 = vcombine.high %v440_v7, %v444_v8  ;;  %v487_v62 = vld [vmem:[#allocation2 + $0xc40] sm:$0xff] }
  0xb9   :  { %v491_v0 = vld [vmem:[#allocation2 + $0xc60] sm:$0xff] }
  0xbb   :  { %3300 = vmatpush1.bf16.msra.mxu0 %v4215_v18  ;;  %3464 = vmatpush1.bf16.msra.mxu1 %v4217_v19  ;;  %v452_v18 = vld [vmem:[#allocation2 + $0xb28] sm:$0xff]  ;;  %v4271_v19 = vcombine.low %v439_v5, %v443_v6  ;;  %v4311_v5 = vcombine.low %v479_v54, %v483_v16 }
  0xbc   :  { %3301 = vmatprep.subr.bf16.mxu0 %v4224_v59  ;;  %3465 = vmatprep.subr.bf16.mxu1 %v4226_v20  ;;  %v4273_v59 = vcombine.low %v440_v7, %v444_v8  ;;  %v4280_v20 = vcombine.high %v447_v14, %v451_v15  ;;  %v4282_v21 = vcombine.high %v448_v17, %v452_v18 }
  0xbd   :  { %v4320_v7 = vcombine.high %v487_v62, %v491_v0 }
  0xbf   :  { %3302 = vmatpush1.bf16.msra.mxu0 %v4223_v27  ;;  %3466 = vmatpush1.bf16.msra.mxu1 %v4225_v28  ;;  %v460_v27 = vld [vmem:[#allocation2 + $0xb68] sm:$0xff]  ;;  %v4279_v28 = vcombine.low %v447_v14, %v451_v15 }
  0xc0   :  { %3303 = vmatprep.subr.bf16.mxu0 %v4232_v29  ;;  %3467 = vmatprep.subr.bf16.mxu1 %v4234_v30  ;;  %v4281_v29 = vcombine.low %v448_v17, %v452_v18  ;;  %v4288_v30 = vcombine.high %v455_v22, %v459_v24  ;;  %v4290_v32 = vcombine.high %v456_v26, %v460_v27  ;;  %v500_v14 = vld [vmem:[#allocation2 + $0xca8] sm:$0xff] }
  0xc3   :  { %3304 = vmatpush1.bf16.msra.mxu0 %v4231_v63  ;;  %3468 = vmatpush1.bf16.msra.mxu1 %v4233_v37  ;;  %v468_v63 = vld [vmem:[#allocation2 + $0xba8] sm:$0xff]  ;;  %v4287_v37 = vcombine.low %v455_v22, %v459_v24 }
  0xc4   :  { %3305 = vmatprep.subr.bf16.mxu0 %v4240_v38  ;;  %3469 = vmatprep.subr.bf16.mxu1 %v4242_v39  ;;  %v4289_v38 = vcombine.low %v456_v26, %v460_v27  ;;  %v4296_v39 = vcombine.high %v463_v33, %v467_v35  ;;  %v4298_v40 = vcombine.high %v464_v36, %v468_v63 }
  0xc7   :  { %3306 = vmatpush1.bf16.msra.mxu0 %v4239_v46  ;;  %3470 = vmatpush1.bf16.msra.mxu1 %v4241_v47  ;;  %v472_v46 = vld [vmem:[#allocation2 + $0xbc8] sm:$0xff] }
  0xc8   :  { %3307 = vmatprep.subr.bf16.mxu0 %v4248_v48  ;;  %3471 = vmatprep.subr.bf16.mxu1 %v4250_v49  ;;  %v476_v47 = vld [vmem:[#allocation2 + $0xbe8] sm:$0xff]  ;;  %v4295_v48 = vcombine.low %v463_v33, %v467_v35  ;;  %v4297_v49 = vcombine.low %v464_v36, %v468_v63 }
  0xc9   :  { %v4306_v52 = vcombine.high %v472_v46, %v476_v47  ;;  %v4305_v23 = vcombine.low %v472_v46, %v476_v47  ;;  %v527_v47 = vld [vmem:[#allocation2 + $0xd80] sm:$0xff] }
  0xcb   :  { %3308 = vmatpush1.bf16.msra.mxu0 %v4247_v55  ;;  %3472 = vmatpush1.bf16.msra.mxu1 %v4249_v56  ;;  %v4686_v55 = vrot.slane %v62_v45, %v4628_v53  ;;  %v480_v56 = vld [vmem:[#allocation2 + $0xc08] sm:$0xff] }
  0xcc   :  { %3309 = vmatprep.subr.bf16.mxu0 %v4256_v57  ;;  %3473 = vmatprep.subr.bf16.mxu1 %v4258_v58  ;;  %v484_v57 = vld [vmem:[#allocation2 + $0xc28] sm:$0xff]  ;;  %v4303_v58 = vcombine.low %v471_v42, %v475_v43 }
  0xcd   :  { %v4314_v61 = vcombine.high %v480_v56, %v484_v57  ;;  %v4313_v6 = vcombine.low %v480_v56, %v484_v57  ;;  %v535_v57 = vld [vmem:[#allocation2 + $0xdc0] sm:$0xff] }
  0xcf   :  { %3310 = vmatpush1.bf16.msra.mxu0 %v4255_v1  ;;  %3474 = vmatpush1.bf16.msra.mxu1 %v4257_v2  ;;  %v78_v1 = vcombine.high %v4686_v55, %v4686_v55  ;;  %v4692_v2 = vpack.c.bf16 %v4669_v31, %v4669_v31  ;;  %v4319_v31 = vcombine.low %v487_v62, %v491_v0 }
  0xd0   :  { %3311 = vmatprep.subr.bf16.mxu0 %v4264_v3  ;;  %3475 = vmatprep.subr.bf16.mxu1 %v4266_v4  ;;  %v488_v3 = vld [vmem:[#allocation2 + $0xc48] sm:$0xff] }
  0xd1   :  { %v492_v4 = vld [vmem:[#allocation2 + $0xc68] sm:$0xff] }
  0xd2   :  { %v4322_v8 = vcombine.high %v488_v3, %v492_v4  ;;  %v4321_v15 = vcombine.low %v488_v3, %v492_v4  ;;  %v543_v3 = vld [vmem:[#allocation2 + $0xe00] sm:$0xff] }
  0xd3   :  { %3312 = vmatpush1.bf16.msra.mxu0 %v4263_v10  ;;  %3476 = vmatpush1.bf16.msra.mxu1 %v4265_v11  ;;  %v495_v10 = vld [vmem:[#allocation2 + $0xc80] sm:$0xff] }
  0xd4   :  { %3313 = vmatprep.subr.bf16.mxu0 %v4272_v12  ;;  %3477 = vmatprep.subr.bf16.mxu1 %v4274_v13  ;;  %v499_v11 = vld [vmem:[#allocation2 + $0xca0] sm:$0xff]  ;;  %v4694_v12 = vpack.c.bf16 %v78_v1, %v78_v1  ;;  %v496_v13 = vld [vmem:[#allocation2 + $0xc88] sm:$0xff] }
  0xd5   :  { %v4328_v17 = vcombine.high %v495_v10, %v499_v11  ;;  %v4330_v18 = vcombine.high %v496_v13, %v500_v14  ;;  %v4327_v22 = vcombine.low %v495_v10, %v499_v11  ;;  %v4329_v24 = vcombine.low %v496_v13, %v500_v14  ;;  %v547_v4 = vld [vmem:[#allocation2 + $0xe20] sm:$0xff] }
  0xd6   :  { %v4376_v10 = vcombine.high %v543_v3, %v547_v4  ;;  %v551_v13 = vld [vmem:[#allocation2 + $0xe40] sm:$0xff] }
  0xd7   :  { %3314 = vmatpush1.bf16.msra.mxu0 %v4271_v19  ;;  %3478 = vmatpush1.bf16.msra.mxu1 %v4273_v59  ;;  %v503_v19 = vld [vmem:[#allocation2 + $0xcc0] sm:$0xff] }
  0xd8   :  { %3315 = vmatprep.subr.bf16.mxu0 %v4280_v20  ;;  %3479 = vmatprep.subr.bf16.mxu1 %v4282_v21  ;;  %v507_v59 = vld [vmem:[#allocation2 + $0xce0] sm:$0xff]  ;;  %v504_v20 = vld [vmem:[#allocation2 + $0xcc8] sm:$0xff] }
  0xd9   :  { %v508_v21 = vld [vmem:[#allocation2 + $0xce8] sm:$0xff]  ;;  %v4336_v26 = vcombine.high %v503_v19, %v507_v59  ;;  %v4335_v33 = vcombine.low %v503_v19, %v507_v59  ;;  %v555_v14 = vld [vmem:[#allocation2 + $0xe60] sm:$0xff] }
  0xda   :  { %v4338_v27 = vcombine.high %v504_v20, %v508_v21  ;;  %v4337_v35 = vcombine.low %v504_v20, %v508_v21  ;;  %v4384_v19 = vcombine.high %v551_v13, %v555_v14  ;;  %v559_v20 = vld [vmem:[#allocation2 + $0xe80] sm:$0xff] }
  0xdb   :  { %3316 = vmatpush1.bf16.msra.mxu0 %v4279_v28  ;;  %3480 = vmatpush1.bf16.msra.mxu1 %v4281_v29  ;;  %v511_v28 = vld [vmem:[#allocation2 + $0xd00] sm:$0xff] }
  0xdc   :  { %3317 = vmatprep.subr.bf16.mxu0 %v4288_v30  ;;  %3481 = vmatprep.subr.bf16.mxu1 %v4290_v32  ;;  %v515_v29 = vld [vmem:[#allocation2 + $0xd20] sm:$0xff]  ;;  %v512_v30 = vld [vmem:[#allocation2 + $0xd08] sm:$0xff] }
  0xdd   :  { %v516_v32 = vld [vmem:[#allocation2 + $0xd28] sm:$0xff]  ;;  %v4344_v36 = vcombine.high %v511_v28, %v515_v29  ;;  %v4343_v42 = vcombine.low %v511_v28, %v515_v29  ;;  %v563_v21 = vld [vmem:[#allocation2 + $0xea0] sm:$0xff] }
  0xde   :  { %v4346_v63 = vcombine.high %v512_v30, %v516_v32  ;;  %v4345_v43 = vcombine.low %v512_v30, %v516_v32  ;;  %v4392_v28 = vcombine.high %v559_v20, %v563_v21  ;;  %v567_v30 = vld [vmem:[#allocation2 + $0xec0] sm:$0xff] }
  0xdf   :  { %3318 = vmatpush1.bf16.msra.mxu0 %v4287_v37  ;;  %3482 = vmatpush1.bf16.msra.mxu1 %v4289_v38  ;;  %v519_v37 = vld [vmem:[#allocation2 + $0xd40] sm:$0xff] }
  0xe0   :  { %3319 = vmatprep.subr.bf16.mxu0 %v4296_v39  ;;  %3483 = vmatprep.subr.bf16.mxu1 %v4298_v40  ;;  %v523_v38 = vld [vmem:[#allocation2 + $0xd60] sm:$0xff]  ;;  %v520_v39 = vld [vmem:[#allocation2 + $0xd48] sm:$0xff] }
  0xe1   :  { %v524_v40 = vld [vmem:[#allocation2 + $0xd68] sm:$0xff]  ;;  %v4352_v45 = vcombine.high %v519_v37, %v523_v38  ;;  %v571_v32 = vld [vmem:[#allocation2 + $0xee0] sm:$0xff] }
  0xe2   :  { %v4354_v46 = vcombine.high %v520_v39, %v524_v40  ;;  %v4353_v54 = vcombine.low %v520_v39, %v524_v40  ;;  %v575_v39 = vld [vmem:[#allocation2 + $0xf00] sm:$0xff] }
  0xe3   :  { %3320 = vmatpush1.bf16.msra.mxu0 %v4295_v48  ;;  %3484 = vmatpush1.bf16.msra.mxu1 %v4297_v49  ;;  %v531_v48 = vld [vmem:[#allocation2 + $0xda0] sm:$0xff]  ;;  %v528_v49 = vld [vmem:[#allocation2 + $0xd88] sm:$0xff] }
  0xe4   :  { %3321 = vmatprep.subr.bf16.mxu0 %v4304_v50  ;;  %3485 = vmatprep.subr.bf16.mxu1 %v4306_v52  ;;  %v532_v50 = vld [vmem:[#allocation2 + $0xda8] sm:$0xff]  ;;  %v4351_v52 = vcombine.low %v519_v37, %v523_v38  ;;  %v4360_v16 = vcombine.high %v527_v47, %v531_v48  ;;  %v4400_v37 = vcombine.high %v567_v30, %v571_v32  ;;  %v579_v40 = vld [vmem:[#allocation2 + $0xf20] sm:$0xff] }
  0xe5   :  { %v4362_v56 = vcombine.high %v528_v49, %v532_v50  ;;  %v4361_v62 = vcombine.low %v528_v49, %v532_v50  ;;  %v583_v49 = vld [vmem:[#allocation2 + $0xf40] sm:$0xff] }
  0xe6   :  { %v587_v50 = vld [vmem:[#allocation2 + $0xf60] sm:$0xff] }
  0xe7   :  { %3322 = vmatpush1.bf16.msra.mxu0 %v4303_v58  ;;  %3486 = vmatpush1.bf16.msra.mxu1 %v4305_v23  ;;  %v539_v58 = vld [vmem:[#allocation2 + $0xde0] sm:$0xff]  ;;  %v536_v23 = vld [vmem:[#allocation2 + $0xdc8] sm:$0xff] }
  0xe8   :  { %3332 = vmatprep.subr.bf16.mxu0 %v4312_v60  ;;  %3496 = vmatprep.subr.bf16.mxu1 %v4314_v61  ;;  %v540_v60 = vld [vmem:[#allocation2 + $0xde8] sm:$0xff]  ;;  %v4359_v61 = vcombine.low %v527_v47, %v531_v48  ;;  %v4368_v0 = vcombine.high %v535_v57, %v539_v58  ;;  %v4408_v47 = vcombine.high %v575_v39, %v579_v40 }
  0xe9   :  { %v4370_v1 = vcombine.high %v536_v23, %v540_v60 }
  0xea   :  { %3324 = vmatmul.mubr.bf16.vlgmr.msra.gmra.mrb[0].mxu0 %v4692_v2  ;;  %3488 = vmatmul.mubr.bf16.vlgmr.msra.gmra.mrb[0].mxu1 %v4692_v2 }
  0xeb   :  { %3333 = vmatpush1.bf16.msra.mxu0 %v4311_v5  ;;  %3497 = vmatpush1.bf16.msra.mxu1 %v4313_v6  ;;  %v544_v5 = vld [vmem:[#allocation2 + $0xe08] sm:$0xff] }
  0xec   :  { %3334 = vmatprep.subr.bf16.mxu0 %v4320_v7  ;;  %3498 = vmatprep.subr.bf16.mxu1 %v4322_v8  ;;  %v548_v6 = vld [vmem:[#allocation2 + $0xe28] sm:$0xff]  ;;  %v4367_v7 = vcombine.low %v535_v57, %v539_v58  ;;  %v4369_v8 = vcombine.low %v536_v23, %v540_v60  ;;  %v4416_v57 = vcombine.high %v583_v49, %v587_v50  ;;  %v591_v23 = vld [vmem:[#allocation2 + $0xf80] sm:$0xff] }
  0xed   :  { %3364 = vmatprep.mubr.bf16.mxu0 %v4694_v12  ;;  %3528 = vmatprep.mubr.bf16.mxu1 %v4694_v12  ;;  %v4378_v11 = vcombine.high %v544_v5, %v548_v6  ;;  %v595_v60 = vld [vmem:[#allocation2 + $0xfa0] sm:$0xff] }
  0xef   :  { %3335 = vmatpush1.bf16.msra.mxu0 %v4319_v31  ;;  %3499 = vmatpush1.bf16.msra.mxu1 %v4321_v15  ;;  %v552_v31 = vld [vmem:[#allocation2 + $0xe48] sm:$0xff] }
  0xf0   :  { %3336 = vmatprep.subr.bf16.mxu0 %v4328_v17  ;;  %3500 = vmatprep.subr.bf16.mxu1 %v4330_v18  ;;  %v556_v15 = vld [vmem:[#allocation2 + $0xe68] sm:$0xff]  ;;  %v4375_v17 = vcombine.low %v543_v3, %v547_v4  ;;  %v4377_v18 = vcombine.low %v544_v5, %v548_v6  ;;  %v4424_v3 = vcombine.high %v591_v23, %v595_v60  ;;  %v599_v5 = vld [vmem:[#allocation2 + $0xfc0] sm:$0xff] }
  0xf1   :  { %v4386_v59 = vcombine.high %v552_v31, %v556_v15  ;;  %v603_v6 = vld [vmem:[#allocation2 + $0xfe0] sm:$0xff] }
  0xf3   :  { %3337 = vmatpush1.bf16.msra.mxu0 %v4327_v22  ;;  %3501 = vmatpush1.bf16.msra.mxu1 %v4329_v24  ;;  %v560_v22 = vld [vmem:[#allocation2 + $0xe88] sm:$0xff] }
  0xf4   :  { %3338 = vmatprep.subr.bf16.mxu0 %v4336_v26  ;;  %3502 = vmatprep.subr.bf16.mxu1 %v4338_v27  ;;  %v564_v24 = vld [vmem:[#allocation2 + $0xea8] sm:$0xff]  ;;  %v4383_v26 = vcombine.low %v551_v13, %v555_v14  ;;  %v4385_v27 = vcombine.low %v552_v31, %v556_v15  ;;  %v4432_v13 = vcombine.high %v599_v5, %v603_v6  ;;  %v97_v31 = vld [vmem:[#allocation2 + $0x10] sm:$0xff] }
  0xf5   :  { %v4394_v29 = vcombine.high %v560_v22, %v564_v24  ;;  %v101_v15 = vld [vmem:[#allocation2 + $0x30] sm:$0xff] }
  0xf7   :  { %3339 = vmatpush1.bf16.msra.mxu0 %v4335_v33  ;;  %3503 = vmatpush1.bf16.msra.mxu1 %v4337_v35  ;;  %v568_v33 = vld [vmem:[#allocation2 + $0xec8] sm:$0xff] }
  0xf8   :  { %3340 = vmatprep.subr.bf16.mxu0 %v4344_v36  ;;  %3504 = vmatprep.subr.bf16.mxu1 %v4346_v63  ;;  %v572_v35 = vld [vmem:[#allocation2 + $0xee8] sm:$0xff]  ;;  %v4391_v36 = vcombine.low %v559_v20, %v563_v21  ;;  %v4393_v63 = vcombine.low %v560_v22, %v564_v24  ;;  %v3932_v20 = vcombine.high %v97_v31, %v101_v15  ;;  %v105_v22 = vld [vmem:[#allocation2 + $0x50] sm:$0xff] }
  0xf9   :  { %v4402_v38 = vcombine.high %v568_v33, %v572_v35  ;;  %v109_v24 = vld [vmem:[#allocation2 + $0x70] sm:$0xff] }
  0xfb   :  { %3341 = vmatpush1.bf16.msra.mxu0 %v4343_v42  ;;  %3505 = vmatpush1.bf16.msra.mxu1 %v4345_v43  ;;  %v576_v42 = vld [vmem:[#allocation2 + $0xf08] sm:$0xff] }
  0xfc   :  { %3342 = vmatprep.subr.bf16.mxu0 %v4352_v45  ;;  %3506 = vmatprep.subr.bf16.mxu1 %v4354_v46  ;;  %v580_v43 = vld [vmem:[#allocation2 + $0xf28] sm:$0xff]  ;;  %v4399_v45 = vcombine.low %v567_v30, %v571_v32  ;;  %v4401_v46 = vcombine.low %v568_v33, %v572_v35  ;;  %v3940_v32 = vcombine.high %v105_v22, %v109_v24  ;;  %v113_v35 = vld [vmem:[#allocation2 + $0x90] sm:$0xff] }
  0xfd   :  { %v4410_v48 = vcombine.high %v576_v42, %v580_v43 }
  0xff   :  { %3343 = vmatpush1.bf16.msra.mxu0 %v4351_v52  ;;  %3507 = vmatpush1.bf16.msra.mxu1 %v4353_v54  ;;  %v584_v52 = vld [vmem:[#allocation2 + $0xf48] sm:$0xff] }
 0x100   :  { %3344 = vmatprep.subr.bf16.mxu0 %v4360_v16  ;;  %3508 = vmatprep.subr.bf16.mxu1 %v4362_v56  ;;  %v588_v54 = vld [vmem:[#allocation2 + $0xf68] sm:$0xff]  ;;  %v4407_v16 = vcombine.low %v575_v39, %v579_v40  ;;  %v4409_v56 = vcombine.low %v576_v42, %v580_v43  ;;  %v121_v42 = vld [vmem:[#allocation2 + $0xd0] sm:$0xff] }
 0x101   :  { %v4418_v58 = vcombine.high %v584_v52, %v588_v54  ;;  %v125_v43 = vld [vmem:[#allocation2 + $0xf0] sm:$0xff] }
 0x103   :  { %3345 = vmatpush1.bf16.msra.mxu0 %v4359_v61  ;;  %3509 = vmatpush1.bf16.msra.mxu1 %v4361_v62  ;;  %v592_v61 = vld [vmem:[#allocation2 + $0xf88] sm:$0xff] }
 0x104   :  { %3346 = vmatprep.subr.bf16.mxu0 %v4368_v0  ;;  %3510 = vmatprep.subr.bf16.mxu1 %v4370_v1  ;;  %v596_v62 = vld [vmem:[#allocation2 + $0xfa8] sm:$0xff]  ;;  %v4415_v0 = vcombine.low %v583_v49, %v587_v50  ;;  %v4417_v1 = vcombine.low %v584_v52, %v588_v54  ;;  %v3956_v49 = vcombine.high %v121_v42, %v125_v43  ;;  %v129_v52 = vld [vmem:[#allocation2 + $0x110] sm:$0xff] }
 0x105   :  { %v4426_v4 = vcombine.high %v592_v61, %v596_v62  ;;  %v133_v54 = vld [vmem:[#allocation2 + $0x130] sm:$0xff] }
 0x107   :  { %3347 = vmatpush1.bf16.msra.mxu0 %v4367_v7  ;;  %3511 = vmatpush1.bf16.msra.mxu1 %v4369_v8  ;;  %v600_v7 = vld [vmem:[#allocation2 + $0xfc8] sm:$0xff] }
 0x108   :  { %3348 = vmatprep.subr.bf16.mxu0 %v4376_v10  ;;  %3512 = vmatprep.subr.bf16.mxu1 %v4378_v11  ;;  %v604_v8 = vld [vmem:[#allocation2 + $0xfe8] sm:$0xff]  ;;  %v4423_v10 = vcombine.low %v591_v23, %v595_v60  ;;  %v4425_v11 = vcombine.low %v592_v61, %v596_v62  ;;  %v3964_v23 = vcombine.high %v129_v52, %v133_v54  ;;  %v137_v60 = vld [vmem:[#allocation2 + $0x150] sm:$0xff]  ;;  %v138_v62 = vld [vmem:[#allocation2 + $0x158] sm:$0xff] }
 0x109   :  { %v4434_v14 = vcombine.high %v600_v7, %v604_v8  ;;  %v141_v61 = vld [vmem:[#allocation2 + $0x170] sm:$0xff] }
 0x10b   :  { %3349 = vmatpush1.bf16.msra.mxu0 %v4375_v17  ;;  %3513 = vmatpush1.bf16.msra.mxu1 %v4377_v18  ;;  %v98_v17 = vld [vmem:[#allocation2 + $0x18] sm:$0xff] }
 0x10c   :  { %3350 = vmatprep.subr.bf16.mxu0 %v4384_v19  ;;  %3514 = vmatprep.subr.bf16.mxu1 %v4386_v59  ;;  %v102_v18 = vld [vmem:[#allocation2 + $0x38] sm:$0xff]  ;;  %v4431_v19 = vcombine.low %v599_v5, %v603_v6  ;;  %v4433_v59 = vcombine.low %v600_v7, %v604_v8  ;;  %v145_v6 = vld [vmem:[#allocation2 + $0x190] sm:$0xff] }
 0x10d   :  { %v3934_v21 = vcombine.high %v98_v17, %v102_v18  ;;  %v3933_v30 = vcombine.low %v98_v17, %v102_v18  ;;  %v149_v7 = vld [vmem:[#allocation2 + $0x1b0] sm:$0xff]  ;;  %v146_v8 = vld [vmem:[#allocation2 + $0x198] sm:$0xff] }
 0x10e   :  { %v157_v17 = vld [vmem:[#allocation2 + $0x1f0] sm:$0xff]  ;;  %v154_v18 = vld [vmem:[#allocation2 + $0x1d8] sm:$0xff] }
 0x10f   :  { %3351 = vmatpush1.bf16.msra.mxu0 %v4383_v26  ;;  %3515 = vmatpush1.bf16.msra.mxu1 %v4385_v27  ;;  %v4702_v26 = vpack.c.bf16 %v4686_v55, %v4686_v55  ;;  %v106_v27 = vld [vmem:[#allocation2 + $0x58] sm:$0xff]  ;;  %v3939_v55 = vcombine.low %v105_v22, %v109_v24  ;;  %v161_v24 = vld [vmem:[#allocation2 + $0x210] sm:$0xff] }
 0x110   :  { %3352 = vmatprep.subr.bf16.mxu0 %v4392_v28  ;;  %3516 = vmatprep.subr.bf16.mxu1 %v4394_v29  ;;  %v110_v28 = vld [vmem:[#allocation2 + $0x78] sm:$0xff]  ;;  %v3931_v29 = vcombine.low %v97_v31, %v101_v15  ;;  %v153_v15 = vld [vmem:[#allocation2 + $0x1d0] sm:$0xff] }
 0x111   :  { %v3942_v33 = vcombine.high %v106_v27, %v110_v28 }
 0x113   :  { %3353 = vmatpush1.bf16.msra.mxu0 %v4391_v36  ;;  %3517 = vmatpush1.bf16.msra.mxu1 %v4393_v63  ;;  %v117_v36 = vld [vmem:[#allocation2 + $0xb0] sm:$0xff]  ;;  %v114_v63 = vld [vmem:[#allocation2 + $0x98] sm:$0xff] }
 0x114   :  { %3354 = vmatprep.subr.bf16.mxu0 %v4400_v37  ;;  %3518 = vmatprep.subr.bf16.mxu1 %v4402_v38  ;;  %v118_v37 = vld [vmem:[#allocation2 + $0xb8] sm:$0xff]  ;;  %v3941_v38 = vcombine.low %v106_v27, %v110_v28  ;;  %v3948_v39 = vcombine.high %v113_v35, %v117_v36  ;;  %v165_v27 = vld [vmem:[#allocation2 + $0x230] sm:$0xff] }
 0x115   :  { %v3950_v40 = vcombine.high %v114_v63, %v118_v37  ;;  %v162_v28 = vld [vmem:[#allocation2 + $0x218] sm:$0xff] }
 0x117   :  { %3355 = vmatpush1.bf16.msra.mxu0 %v4399_v45  ;;  %3519 = vmatpush1.bf16.msra.mxu1 %v4401_v46  ;;  %v122_v45 = vld [vmem:[#allocation2 + $0xd8] sm:$0xff] }
 0x118   :  { %3356 = vmatprep.subr.bf16.mxu0 %v4408_v47  ;;  %3520 = vmatprep.subr.bf16.mxu1 %v4410_v48  ;;  %v126_v46 = vld [vmem:[#allocation2 + $0xf8] sm:$0xff]  ;;  %v3947_v47 = vcombine.low %v113_v35, %v117_v36  ;;  %v3949_v48 = vcombine.low %v114_v63, %v118_v37  ;;  %v169_v36 = vld [vmem:[#allocation2 + $0x250] sm:$0xff] }
 0x119   :  { %v3958_v50 = vcombine.high %v122_v45, %v126_v46  ;;  %v173_v63 = vld [vmem:[#allocation2 + $0x270] sm:$0xff]  ;;  %v170_v37 = vld [vmem:[#allocation2 + $0x258] sm:$0xff] }
 0x11b   :  { %3357 = vmatpush1.bf16.msra.mxu0 %v4407_v16  ;;  %3521 = vmatpush1.bf16.msra.mxu1 %v4409_v56  ;;  %v130_v16 = vld [vmem:[#allocation2 + $0x118] sm:$0xff] }
 0x11c   :  { %3358 = vmatprep.subr.bf16.mxu0 %v4416_v57  ;;  %3522 = vmatprep.subr.bf16.mxu1 %v4418_v58  ;;  %v134_v56 = vld [vmem:[#allocation2 + $0x138] sm:$0xff]  ;;  %v3955_v57 = vcombine.low %v121_v42, %v125_v43  ;;  %v3957_v58 = vcombine.low %v122_v45, %v126_v46  ;;  %v177_v43 = vld [vmem:[#allocation2 + $0x290] sm:$0xff] }
 0x11d   :  { %v181_v45 = vld [vmem:[#allocation2 + $0x2b0] sm:$0xff]  ;;  %v178_v46 = vld [vmem:[#allocation2 + $0x298] sm:$0xff] }
 0x11f   :  { %3359 = vmatpush1.bf16.msra.mxu0 %v4415_v0  ;;  %3523 = vmatpush1.bf16.msra.mxu1 %v4417_v1  ;;  %v142_v0 = vld [vmem:[#allocation2 + $0x178] sm:$0xff]  ;;  %v3963_v1 = vcombine.low %v129_v52, %v133_v54  ;;  %v185_v54 = vld [vmem:[#allocation2 + $0x2d0] sm:$0xff] }
 0x120   :  { %3360 = vmatprep.subr.bf16.mxu0 %v4424_v3  ;;  %3524 = vmatprep.subr.bf16.mxu1 %v4426_v4  ;;  %v3965_v3 = vcombine.low %v130_v16, %v134_v56  ;;  %v3972_v4 = vcombine.high %v137_v60, %v141_v61  ;;  %v3974_v5 = vcombine.high %v138_v62, %v142_v0 }
 0x123   :  { %3361 = vmatpush1.bf16.msra.mxu0 %v4423_v10  ;;  %3525 = vmatpush1.bf16.msra.mxu1 %v4425_v11  ;;  %v150_v10 = vld [vmem:[#allocation2 + $0x1b8] sm:$0xff]  ;;  %v3971_v11 = vcombine.low %v137_v60, %v141_v61  ;;  %v193_v61 = vld [vmem:[#allocation2 + $0x310] sm:$0xff] }
 0x124   :  { %3362 = vmatprep.subr.bf16.mxu0 %v4432_v13  ;;  %3526 = vmatprep.subr.bf16.mxu1 %v4434_v14  ;;  %v3973_v13 = vcombine.low %v138_v62, %v142_v0  ;;  %v3980_v14 = vcombine.high %v145_v6, %v149_v7  ;;  %v3982_v31 = vcombine.high %v146_v8, %v150_v10  ;;  %v197_v62 = vld [vmem:[#allocation2 + $0x330] sm:$0xff]  ;;  %v194_v0 = vld [vmem:[#allocation2 + $0x318] sm:$0xff] }
 0x127   :  { %3363 = vmatpush1.bf16.msra.mxu0 %v4431_v19  ;;  %3527 = vmatpush1.bf16.msra.mxu1 %v4433_v59  ;;  %v158_v19 = vld [vmem:[#allocation2 + $0x1f8] sm:$0xff]  ;;  %v3979_v59 = vcombine.low %v145_v6, %v149_v7  ;;  %v201_v7 = vld [vmem:[#allocation2 + $0x350] sm:$0xff] }
 0x128   :  { %3537 = vmatprep.subr.bf16.mxu0 %v3932_v20  ;;  %3701 = vmatprep.subr.bf16.mxu1 %v3934_v21  ;;  %v3981_v20 = vcombine.low %v146_v8, %v150_v10  ;;  %v3988_v21 = vcombine.high %v153_v15, %v157_v17  ;;  %v3990_v22 = vcombine.high %v154_v18, %v158_v19  ;;  %v205_v8 = vld [vmem:[#allocation2 + $0x370] sm:$0xff]  ;;  %v202_v10 = vld [vmem:[#allocation2 + $0x358] sm:$0xff] }
 0x12a   :  { %3365 = vmatmul.mubr.bf16.vlgmr.msra.gmra.mrb[0].mxu0 %v4702_v26  ;;  %3529 = vmatmul.mubr.bf16.vlgmr.msra.gmra.mrb[0].mxu1 %v4702_v26 }
 0x12b   :  { %3538 = vmatpush1.bf16.msra.mxu0 %v3931_v29  ;;  %3702 = vmatpush1.bf16.msra.mxu1 %v3933_v30  ;;  %v166_v29 = vld [vmem:[#allocation2 + $0x238] sm:$0xff]  ;;  %v3987_v30 = vcombine.low %v153_v15, %v157_v17  ;;  %v209_v17 = vld [vmem:[#allocation2 + $0x390] sm:$0xff] }
 0x12c   :  { %3539 = vmatprep.subr.bf16.mxu0 %v3940_v32  ;;  %3703 = vmatprep.subr.bf16.mxu1 %v3942_v33  ;;  %v3989_v32 = vcombine.low %v154_v18, %v158_v19  ;;  %v3996_v33 = vcombine.high %v161_v24, %v165_v27  ;;  %v3998_v35 = vcombine.high %v162_v28, %v166_v29  ;;  %v213_v18 = vld [vmem:[#allocation2 + $0x3b0] sm:$0xff]  ;;  %v210_v19 = vld [vmem:[#allocation2 + $0x398] sm:$0xff] }
 0x12d   :  { %3569 = vmatprep.mubr.bf16.mxu0 %v4641_v9  ;;  %3733 = vmatprep.mubr.bf16.mxu1 %v4641_v9  ;;  %v3966_v9 = vcombine.high %v130_v16, %v134_v56  ;;  %v189_v16 = vld [vmem:[#allocation2 + $0x2f0] sm:$0xff]  ;;  %v186_v56 = vld [vmem:[#allocation2 + $0x2d8] sm:$0xff] }
 0x12f   :  { %3540 = vmatpush1.bf16.msra.mxu0 %v3939_v55  ;;  %3704 = vmatpush1.bf16.msra.mxu1 %v3941_v38  ;;  %v174_v55 = vld [vmem:[#allocation2 + $0x278] sm:$0xff]  ;;  %v3995_v38 = vcombine.low %v161_v24, %v165_v27  ;;  %v217_v27 = vld [vmem:[#allocation2 + $0x3d0] sm:$0xff] }
 0x130   :  { %3541 = vmatprep.subr.bf16.mxu0 %v3948_v39  ;;  %3705 = vmatprep.subr.bf16.mxu1 %v3950_v40  ;;  %v3997_v39 = vcombine.low %v162_v28, %v166_v29  ;;  %v4004_v40 = vcombine.high %v169_v36, %v173_v63  ;;  %v4006_v42 = vcombine.high %v170_v37, %v174_v55  ;;  %v221_v28 = vld [vmem:[#allocation2 + $0x3f0] sm:$0xff]  ;;  %v218_v29 = vld [vmem:[#allocation2 + $0x3d8] sm:$0xff] }
 0x133   :  { %3542 = vmatpush1.bf16.msra.mxu0 %v3947_v47  ;;  %3706 = vmatpush1.bf16.msra.mxu1 %v3949_v48  ;;  %v182_v47 = vld [vmem:[#allocation2 + $0x2b8] sm:$0xff]  ;;  %v4003_v48 = vcombine.low %v169_v36, %v173_v63  ;;  %v225_v63 = vld [vmem:[#allocation2 + $0x410] sm:$0xff] }
 0x134   :  { %3543 = vmatprep.subr.bf16.mxu0 %v3956_v49  ;;  %3707 = vmatprep.subr.bf16.mxu1 %v3958_v50  ;;  %v4005_v49 = vcombine.low %v170_v37, %v174_v55  ;;  %v4012_v50 = vcombine.high %v177_v43, %v181_v45  ;;  %v4014_v52 = vcombine.high %v178_v46, %v182_v47  ;;  %v229_v37 = vld [vmem:[#allocation2 + $0x430] sm:$0xff]  ;;  %v226_v55 = vld [vmem:[#allocation2 + $0x418] sm:$0xff] }
 0x137   :  { %3544 = vmatpush1.bf16.msra.mxu0 %v3955_v57  ;;  %3708 = vmatpush1.bf16.msra.mxu1 %v3957_v58  ;;  %v190_v57 = vld [vmem:[#allocation2 + $0x2f8] sm:$0xff]  ;;  %v4011_v58 = vcombine.low %v177_v43, %v181_v45  ;;  %v233_v45 = vld [vmem:[#allocation2 + $0x450] sm:$0xff] }
 0x138   :  { %3545 = vmatprep.subr.bf16.mxu0 %v3964_v23  ;;  %3709 = vmatprep.subr.bf16.mxu1 %v3966_v9  ;;  %v4013_v23 = vcombine.low %v178_v46, %v182_v47  ;;  %v4020_v9 = vcombine.high %v185_v54, %v189_v16  ;;  %v4022_v60 = vcombine.high %v186_v56, %v190_v57  ;;  %v237_v46 = vld [vmem:[#allocation2 + $0x470] sm:$0xff]  ;;  %v234_v47 = vld [vmem:[#allocation2 + $0x458] sm:$0xff] }
 0x13b   :  { %3546 = vmatpush1.bf16.msra.mxu0 %v3963_v1  ;;  %3710 = vmatpush1.bf16.msra.mxu1 %v3965_v3  ;;  %v198_v1 = vld [vmem:[#allocation2 + $0x338] sm:$0xff]  ;;  %v4019_v3 = vcombine.low %v185_v54, %v189_v16  ;;  %v241_v16 = vld [vmem:[#allocation2 + $0x490] sm:$0xff] }
 0x13c   :  { %3547 = vmatprep.subr.bf16.mxu0 %v3972_v4  ;;  %3711 = vmatprep.subr.bf16.mxu1 %v3974_v5  ;;  %v4021_v4 = vcombine.low %v186_v56, %v190_v57  ;;  %v4028_v5 = vcombine.high %v193_v61, %v197_v62  ;;  %v4030_v6 = vcombine.high %v194_v0, %v198_v1  ;;  %v245_v56 = vld [vmem:[#allocation2 + $0x4b0] sm:$0xff]  ;;  %v242_v57 = vld [vmem:[#allocation2 + $0x498] sm:$0xff] }
 0x13f   :  { %3548 = vmatpush1.bf16.msra.mxu0 %v3971_v11  ;;  %3712 = vmatpush1.bf16.msra.mxu1 %v3973_v13  ;;  %v206_v11 = vld [vmem:[#allocation2 + $0x378] sm:$0xff]  ;;  %v4027_v13 = vcombine.low %v193_v61, %v197_v62  ;;  %v249_v62 = vld [vmem:[#allocation2 + $0x4d0] sm:$0xff] }
 0x140   :  { %3549 = vmatprep.subr.bf16.mxu0 %v3980_v14  ;;  %3713 = vmatprep.subr.bf16.mxu1 %v3982_v31  ;;  %v4029_v14 = vcombine.low %v194_v0, %v198_v1  ;;  %v4036_v31 = vcombine.high %v201_v7, %v205_v8  ;;  %v4038_v15 = vcombine.high %v202_v10, %v206_v11  ;;  %v253_v0 = vld [vmem:[#allocation2 + $0x4f0] sm:$0xff]  ;;  %v250_v1 = vld [vmem:[#allocation2 + $0x4d8] sm:$0xff] }
 0x143   :  { %3550 = vmatpush1.bf16.msra.mxu0 %v3979_v59  ;;  %3714 = vmatpush1.bf16.msra.mxu1 %v3981_v20  ;;  %v214_v59 = vld [vmem:[#allocation2 + $0x3b8] sm:$0xff]  ;;  %v4035_v20 = vcombine.low %v201_v7, %v205_v8  ;;  %v257_v7 = vld [vmem:[#allocation2 + $0x510] sm:$0xff] }
 0x144   :  { %3551 = vmatprep.subr.bf16.mxu0 %v3988_v21  ;;  %3715 = vmatprep.subr.bf16.mxu1 %v3990_v22  ;;  %v4037_v21 = vcombine.low %v202_v10, %v206_v11  ;;  %v4044_v22 = vcombine.high %v209_v17, %v213_v18  ;;  %v4046_v24 = vcombine.high %v210_v19, %v214_v59  ;;  %v261_v8 = vld [vmem:[#allocation2 + $0x530] sm:$0xff]  ;;  %v258_v10 = vld [vmem:[#allocation2 + $0x518] sm:$0xff] }
 0x145   :  { %v262_v11 = vld [vmem:[#allocation2 + $0x538] sm:$0xff] }
 0x147   :  { %3552 = vmatpush1.bf16.msra.mxu0 %v3987_v30  ;;  %3716 = vmatpush1.bf16.msra.mxu1 %v3989_v32  ;;  %v222_v30 = vld [vmem:[#allocation2 + $0x3f8] sm:$0xff]  ;;  %v4043_v32 = vcombine.low %v209_v17, %v213_v18  ;;  %v269_v17 = vld [vmem:[#allocation2 + $0x570] sm:$0xff] }
 0x148   :  { %3553 = vmatprep.subr.bf16.mxu0 %v3996_v33  ;;  %3717 = vmatprep.subr.bf16.mxu1 %v3998_v35  ;;  %v4045_v33 = vcombine.low %v210_v19, %v214_v59  ;;  %v4052_v35 = vcombine.high %v217_v27, %v221_v28  ;;  %v4054_v36 = vcombine.high %v218_v29, %v222_v30  ;;  %v266_v18 = vld [vmem:[#allocation2 + $0x558] sm:$0xff] }
 0x149   :  { %v270_v19 = vld [vmem:[#allocation2 + $0x578] sm:$0xff]  ;;  %v4091_v59 = vcombine.low %v257_v7, %v261_v8 }
 0x14b   :  { %3554 = vmatpush1.bf16.msra.mxu0 %v3995_v38  ;;  %3718 = vmatpush1.bf16.msra.mxu1 %v3997_v39  ;;  %v230_v38 = vld [vmem:[#allocation2 + $0x438] sm:$0xff]  ;;  %v4051_v39 = vcombine.low %v217_v27, %v221_v28  ;;  %v277_v27 = vld [vmem:[#allocation2 + $0x5b0] sm:$0xff] }
 0x14c   :  { %3555 = vmatprep.subr.bf16.mxu0 %v4004_v40  ;;  %3719 = vmatprep.subr.bf16.mxu1 %v4006_v42  ;;  %v4053_v40 = vcombine.low %v218_v29, %v222_v30  ;;  %v4060_v42 = vcombine.high %v225_v63, %v229_v37  ;;  %v4062_v43 = vcombine.high %v226_v55, %v230_v38  ;;  %v274_v28 = vld [vmem:[#allocation2 + $0x598] sm:$0xff] }
 0x14d   :  { %v278_v29 = vld [vmem:[#allocation2 + $0x5b8] sm:$0xff] }
 0x14f   :  { %3556 = vmatpush1.bf16.msra.mxu0 %v4003_v48  ;;  %3720 = vmatpush1.bf16.msra.mxu1 %v4005_v49  ;;  %v238_v48 = vld [vmem:[#allocation2 + $0x478] sm:$0xff]  ;;  %v4059_v49 = vcombine.low %v225_v63, %v229_v37  ;;  %v285_v63 = vld [vmem:[#allocation2 + $0x5f0] sm:$0xff] }
 0x150   :  { %3557 = vmatprep.subr.bf16.mxu0 %v4012_v50  ;;  %3721 = vmatprep.subr.bf16.mxu1 %v4014_v52  ;;  %v4061_v50 = vcombine.low %v226_v55, %v230_v38  ;;  %v4068_v52 = vcombine.high %v233_v45, %v237_v46  ;;  %v4070_v54 = vcombine.high %v234_v47, %v238_v48  ;;  %v282_v37 = vld [vmem:[#allocation2 + $0x5d8] sm:$0xff] }
 0x151   :  { %v286_v55 = vld [vmem:[#allocation2 + $0x5f8] sm:$0xff] }
 0x153   :  { %3558 = vmatpush1.bf16.msra.mxu0 %v4011_v58  ;;  %3722 = vmatpush1.bf16.msra.mxu1 %v4013_v23  ;;  %v246_v58 = vld [vmem:[#allocation2 + $0x4b8] sm:$0xff]  ;;  %v4067_v23 = vcombine.low %v233_v45, %v237_v46  ;;  %v293_v45 = vld [vmem:[#allocation2 + $0x630] sm:$0xff] }
 0x154   :  { %3559 = vmatprep.subr.bf16.mxu0 %v4020_v9  ;;  %3723 = vmatprep.subr.bf16.mxu1 %v4022_v60  ;;  %v4069_v9 = vcombine.low %v234_v47, %v238_v48  ;;  %v4076_v60 = vcombine.high %v241_v16, %v245_v56  ;;  %v4078_v61 = vcombine.high %v242_v57, %v246_v58  ;;  %v290_v46 = vld [vmem:[#allocation2 + $0x618] sm:$0xff] }
 0x155   :  { %v294_v47 = vld [vmem:[#allocation2 + $0x638] sm:$0xff] }
 0x157   :  { %3560 = vmatpush1.bf16.msra.mxu0 %v4019_v3  ;;  %3724 = vmatpush1.bf16.msra.mxu1 %v4021_v4  ;;  %v254_v3 = vld [vmem:[#allocation2 + $0x4f8] sm:$0xff]  ;;  %v4075_v4 = vcombine.low %v241_v16, %v245_v56  ;;  %v301_v16 = vld [vmem:[#allocation2 + $0x670] sm:$0xff] }
 0x158   :  { %3561 = vmatprep.subr.bf16.mxu0 %v4028_v5  ;;  %3725 = vmatprep.subr.bf16.mxu1 %v4030_v6  ;;  %v4084_v5 = vcombine.high %v249_v62, %v253_v0  ;;  %v4086_v6 = vcombine.high %v250_v1, %v254_v3  ;;  %v298_v56 = vld [vmem:[#allocation2 + $0x658] sm:$0xff] }
 0x15b   :  { %3562 = vmatpush1.bf16.msra.mxu0 %v4027_v13  ;;  %3726 = vmatpush1.bf16.msra.mxu1 %v4029_v14  ;;  %v4083_v13 = vcombine.low %v249_v62, %v253_v0  ;;  %v4085_v14 = vcombine.low %v250_v1, %v254_v3  ;;  %v309_v62 = vld [vmem:[#allocation2 + $0x6b0] sm:$0xff]  ;;  %v306_v0 = vld [vmem:[#allocation2 + $0x698] sm:$0xff] }
 0x15c   :  { %3563 = vmatprep.subr.bf16.mxu0 %v4036_v31  ;;  %3727 = vmatprep.subr.bf16.mxu1 %v4038_v15  ;;  %v4092_v31 = vcombine.high %v257_v7, %v261_v8  ;;  %v265_v15 = vld [vmem:[#allocation2 + $0x550] sm:$0xff]  ;;  %v310_v1 = vld [vmem:[#allocation2 + $0x6b8] sm:$0xff] }
 0x15d   :  { %v4099_v30 = vcombine.low %v265_v15, %v269_v17  ;;  %v317_v7 = vld [vmem:[#allocation2 + $0x6f0] sm:$0xff]  ;;  %v314_v8 = vld [vmem:[#allocation2 + $0x6d8] sm:$0xff] }
 0x15f   :  { %3564 = vmatpush1.bf16.msra.mxu0 %v4035_v20  ;;  %3728 = vmatpush1.bf16.msra.mxu1 %v4037_v21  ;;  %v4093_v20 = vcombine.low %v258_v10, %v262_v11  ;;  %v4100_v21 = vcombine.high %v265_v15, %v269_v17  ;;  %v325_v15 = vld [vmem:[#allocation2 + $0x730] sm:$0xff]  ;;  %v322_v17 = vld [vmem:[#allocation2 + $0x718] sm:$0xff] }
 0x160   :  { %3565 = vmatprep.subr.bf16.mxu0 %v4044_v22  ;;  %3729 = vmatprep.subr.bf16.mxu1 %v4046_v24  ;;  %v4102_v22 = vcombine.high %v266_v18, %v270_v19  ;;  %v273_v24 = vld [vmem:[#allocation2 + $0x590] sm:$0xff] }
 0x161   :  { %v4107_v38 = vcombine.low %v273_v24, %v277_v27 }
 0x163   :  { %3566 = vmatpush1.bf16.msra.mxu0 %v4043_v32  ;;  %3730 = vmatpush1.bf16.msra.mxu1 %v4045_v33  ;;  %v4101_v32 = vcombine.low %v266_v18, %v270_v19  ;;  %v4108_v33 = vcombine.high %v273_v24, %v277_v27  ;;  %v326_v18 = vld [vmem:[#allocation2 + $0x738] sm:$0xff]  ;;  %v333_v24 = vld [vmem:[#allocation2 + $0x770] sm:$0xff] }
 0x164   :  { %3567 = vmatprep.subr.bf16.mxu0 %v4052_v35  ;;  %3731 = vmatprep.subr.bf16.mxu1 %v4054_v36  ;;  %v4110_v35 = vcombine.high %v274_v28, %v278_v29  ;;  %v281_v36 = vld [vmem:[#allocation2 + $0x5d0] sm:$0xff]  ;;  %v330_v27 = vld [vmem:[#allocation2 + $0x758] sm:$0xff] }
 0x165   :  { %v4115_v48 = vcombine.low %v281_v36, %v285_v63 }
 0x167   :  { %3568 = vmatpush1.bf16.msra.mxu0 %v4051_v39  ;;  %3732 = vmatpush1.bf16.msra.mxu1 %v4053_v40  ;;  %v4109_v39 = vcombine.low %v274_v28, %v278_v29  ;;  %v4116_v40 = vcombine.high %v281_v36, %v285_v63  ;;  %v334_v28 = vld [vmem:[#allocation2 + $0x778] sm:$0xff]  ;;  %v341_v36 = vld [vmem:[#allocation2 + $0x7b0] sm:$0xff] }
 0x168   :  { %3578 = vmatprep.subr.bf16.mxu0 %v4060_v42  ;;  %3742 = vmatprep.subr.bf16.mxu1 %v4062_v43  ;;  %v4118_v42 = vcombine.high %v282_v37, %v286_v55  ;;  %v289_v43 = vld [vmem:[#allocation2 + $0x610] sm:$0xff]  ;;  %v338_v63 = vld [vmem:[#allocation2 + $0x798] sm:$0xff] }
 0x16a   :  { %3570 = vmatmul.mubr.bf16.vlgmr.msra.gmra.mrb[4].mxu0 %v4654_v25  ;;  %3734 = vmatmul.mubr.bf16.vlgmr.msra.gmra.mrb[4].mxu1 %v4654_v25  ;;  %v4077_v25 = vcombine.low %v242_v57, %v246_v58  ;;  %v302_v57 = vld [vmem:[#allocation2 + $0x678] sm:$0xff]  ;;  %v4123_v58 = vcombine.low %v289_v43, %v293_v45 }
 0x16b   :  { %3579 = vmatpush1.bf16.msra.mxu0 %v4059_v49  ;;  %3743 = vmatpush1.bf16.msra.mxu1 %v4061_v50  ;;  %v4117_v49 = vcombine.low %v282_v37, %v286_v55  ;;  %v4124_v50 = vcombine.high %v289_v43, %v293_v45  ;;  %v342_v37 = vld [vmem:[#allocation2 + $0x7b8] sm:$0xff]  ;;  %v349_v43 = vld [vmem:[#allocation2 + $0x7f0] sm:$0xff] }
 0x16c   :  { %3580 = vmatprep.subr.bf16.mxu0 %v4068_v52  ;;  %3744 = vmatprep.subr.bf16.mxu1 %v4070_v54  ;;  %v4126_v52 = vcombine.high %v290_v46, %v294_v47  ;;  %v297_v54 = vld [vmem:[#allocation2 + $0x650] sm:$0xff]  ;;  %v346_v45 = vld [vmem:[#allocation2 + $0x7d8] sm:$0xff] }
 0x16d   :  { %3610 = vmatprep.mubr.bf16.mxu0 %v4656_v34  ;;  %3774 = vmatprep.mubr.bf16.mxu1 %v4656_v34  ;;  %v4094_v34 = vcombine.high %v258_v10, %v262_v11  ;;  %v4131_v3 = vcombine.low %v297_v54, %v301_v16  ;;  %v318_v10 = vld [vmem:[#allocation2 + $0x6f8] sm:$0xff] }
 0x16f   :  { %3581 = vmatpush1.bf16.msra.mxu0 %v4067_v23  ;;  %3745 = vmatpush1.bf16.msra.mxu1 %v4069_v9  ;;  %v4125_v23 = vcombine.low %v290_v46, %v294_v47  ;;  %v4132_v9 = vcombine.high %v297_v54, %v301_v16  ;;  %v350_v46 = vld [vmem:[#allocation2 + $0x7f8] sm:$0xff]  ;;  %v357_v54 = vld [vmem:[#allocation2 + $0x830] sm:$0xff] }
 0x170   :  { %3582 = vmatprep.subr.bf16.mxu0 %v4076_v60  ;;  %3746 = vmatprep.subr.bf16.mxu1 %v4078_v61  ;;  %v4134_v60 = vcombine.high %v298_v56, %v302_v57  ;;  %v305_v61 = vld [vmem:[#allocation2 + $0x690] sm:$0xff]  ;;  %v354_v16 = vld [vmem:[#allocation2 + $0x818] sm:$0xff] }
 0x171   :  { %v4139_v11 = vcombine.low %v305_v61, %v309_v62 }
 0x173   :  { %3583 = vmatpush1.bf16.msra.mxu0 %v4075_v4  ;;  %3747 = vmatpush1.bf16.msra.mxu1 %v4077_v25  ;;  %v4133_v4 = vcombine.low %v298_v56, %v302_v57  ;;  %v4140_v25 = vcombine.high %v305_v61, %v309_v62  ;;  %v358_v56 = vld [vmem:[#allocation2 + $0x838] sm:$0xff]  ;;  %v365_v61 = vld [vmem:[#allocation2 + $0x870] sm:$0xff] }
 0x174   :  { %3584 = vmatprep.subr.bf16.mxu0 %v4084_v5  ;;  %3748 = vmatprep.subr.bf16.mxu1 %v4086_v6  ;;  %v4142_v5 = vcombine.high %v306_v0, %v310_v1  ;;  %v313_v6 = vld [vmem:[#allocation2 + $0x6d0] sm:$0xff]  ;;  %v362_v62 = vld [vmem:[#allocation2 + $0x858] sm:$0xff] }
 0x175   :  { %v4147_v19 = vcombine.low %v313_v6, %v317_v7 }
 0x177   :  { %3585 = vmatpush1.bf16.msra.mxu0 %v4083_v13  ;;  %3749 = vmatpush1.bf16.msra.mxu1 %v4085_v14  ;;  %v4141_v13 = vcombine.low %v306_v0, %v310_v1  ;;  %v4148_v14 = vcombine.high %v313_v6, %v317_v7  ;;  %v366_v0 = vld [vmem:[#allocation2 + $0x878] sm:$0xff]  ;;  %v373_v6 = vld [vmem:[#allocation2 + $0x8b0] sm:$0xff] }
 0x178   :  { %3586 = vmatprep.subr.bf16.mxu0 %v4092_v31  ;;  %3750 = vmatprep.subr.bf16.mxu1 %v4094_v34  ;;  %v4150_v31 = vcombine.high %v314_v8, %v318_v10  ;;  %v321_v34 = vld [vmem:[#allocation2 + $0x710] sm:$0xff]  ;;  %v370_v7 = vld [vmem:[#allocation2 + $0x898] sm:$0xff] }
 0x179   :  { %v4155_v29 = vcombine.low %v321_v34, %v325_v15 }
 0x17b   :  { %3587 = vmatpush1.bf16.msra.mxu0 %v4091_v59  ;;  %3751 = vmatpush1.bf16.msra.mxu1 %v4093_v20  ;;  %v4149_v59 = vcombine.low %v314_v8, %v318_v10  ;;  %v4156_v20 = vcombine.high %v321_v34, %v325_v15  ;;  %v374_v8 = vld [vmem:[#allocation2 + $0x8b8] sm:$0xff]  ;;  %v381_v34 = vld [vmem:[#allocation2 + $0x8f0] sm:$0xff] }
 0x17c   :  { %3588 = vmatprep.subr.bf16.mxu0 %v4100_v21  ;;  %3752 = vmatprep.subr.bf16.mxu1 %v4102_v22  ;;  %v4158_v21 = vcombine.high %v322_v17, %v326_v18  ;;  %v329_v22 = vld [vmem:[#allocation2 + $0x750] sm:$0xff]  ;;  %v378_v15 = vld [vmem:[#allocation2 + $0x8d8] sm:$0xff] }
 0x17d   :  { %v4163_v55 = vcombine.low %v329_v22, %v333_v24 }
 0x17f   :  { %3589 = vmatpush1.bf16.msra.mxu0 %v4099_v30  ;;  %3753 = vmatpush1.bf16.msra.mxu1 %v4101_v32  ;;  %v4157_v30 = vcombine.low %v322_v17, %v326_v18  ;;  %v4164_v32 = vcombine.high %v329_v22, %v333_v24  ;;  %v382_v17 = vld [vmem:[#allocation2 + $0x8f8] sm:$0xff] }
 0x180   :  { %3590 = vmatprep.subr.bf16.mxu0 %v4108_v33  ;;  %3754 = vmatprep.subr.bf16.mxu1 %v4110_v35  ;;  %v4166_v33 = vcombine.high %v330_v27, %v334_v28  ;;  %v337_v35 = vld [vmem:[#allocation2 + $0x790] sm:$0xff]  ;;  %v386_v22 = vld [vmem:[#allocation2 + $0x918] sm:$0xff] }
 0x181   :  { %v4171_v47 = vcombine.low %v337_v35, %v341_v36  ;;  %v390_v24 = vld [vmem:[#allocation2 + $0x938] sm:$0xff] }
 0x183   :  { %3591 = vmatpush1.bf16.msra.mxu0 %v4107_v38  ;;  %3755 = vmatpush1.bf16.msra.mxu1 %v4109_v39  ;;  %v4165_v38 = vcombine.low %v330_v27, %v334_v28  ;;  %v4172_v39 = vcombine.high %v337_v35, %v341_v36  ;;  %v4213_v28 = vcombine.low %v378_v15, %v382_v17  ;;  %v398_v35 = vld [vmem:[#allocation2 + $0x978] sm:$0xff] }
 0x184   :  { %3592 = vmatprep.subr.bf16.mxu0 %v4116_v40  ;;  %3756 = vmatprep.subr.bf16.mxu1 %v4118_v42  ;;  %v4174_v40 = vcombine.high %v338_v63, %v342_v37  ;;  %v345_v42 = vld [vmem:[#allocation2 + $0x7d0] sm:$0xff] }
 0x185   :  { %v4179_v57 = vcombine.low %v345_v42, %v349_v43 }
 0x187   :  { %3593 = vmatpush1.bf16.msra.mxu0 %v4115_v48  ;;  %3757 = vmatpush1.bf16.msra.mxu1 %v4117_v49  ;;  %v4173_v48 = vcombine.low %v338_v63, %v342_v37  ;;  %v4180_v49 = vcombine.high %v345_v42, %v349_v43  ;;  %v4221_v63 = vcombine.low %v386_v22, %v390_v24  ;;  %v406_v42 = vld [vmem:[#allocation2 + $0x9b8] sm:$0xff] }
 0x188   :  { %3594 = vmatprep.subr.bf16.mxu0 %v4124_v50  ;;  %3758 = vmatprep.subr.bf16.mxu1 %v4126_v52  ;;  %v4182_v50 = vcombine.high %v346_v45, %v350_v46  ;;  %v353_v52 = vld [vmem:[#allocation2 + $0x810] sm:$0xff] }
 0x189   :  { %v4187_v1 = vcombine.low %v353_v52, %v357_v54 }
 0x18b   :  { %3595 = vmatpush1.bf16.msra.mxu0 %v4123_v58  ;;  %3759 = vmatpush1.bf16.msra.mxu1 %v4125_v23  ;;  %v4181_v58 = vcombine.low %v346_v45, %v350_v46  ;;  %v4188_v23 = vcombine.high %v353_v52, %v357_v54  ;;  %v414_v52 = vld [vmem:[#allocation2 + $0x9f8] sm:$0xff] }
 0x18c   :  { %3596 = vmatprep.subr.bf16.mxu0 %v4132_v9  ;;  %3760 = vmatprep.subr.bf16.mxu1 %v4134_v60  ;;  %v4190_v9 = vcombine.high %v354_v16, %v358_v56  ;;  %v361_v60 = vld [vmem:[#allocation2 + $0x850] sm:$0xff] }
 0x18d   :  { %v4195_v10 = vcombine.low %v361_v60, %v365_v61 }
 0x18f   :  { %3597 = vmatpush1.bf16.msra.mxu0 %v4131_v3  ;;  %3761 = vmatpush1.bf16.msra.mxu1 %v4133_v4  ;;  %v4189_v3 = vcombine.low %v354_v16, %v358_v56  ;;  %v4196_v4 = vcombine.high %v361_v60, %v365_v61  ;;  %v422_v60 = vld [vmem:[#allocation2 + $0xa38] sm:$0xff] }
 0x190   :  { %3598 = vmatprep.subr.bf16.mxu0 %v4140_v25  ;;  %3762 = vmatprep.subr.bf16.mxu1 %v4142_v5  ;;  %v4198_v25 = vcombine.high %v362_v62, %v366_v0  ;;  %v369_v5 = vld [vmem:[#allocation2 + $0x890] sm:$0xff] }
 0x191   :  { %v4203_v18 = vcombine.low %v369_v5, %v373_v6 }
 0x193   :  { %3599 = vmatpush1.bf16.msra.mxu0 %v4139_v11  ;;  %3763 = vmatpush1.bf16.msra.mxu1 %v4141_v13  ;;  %v4197_v11 = vcombine.low %v362_v62, %v366_v0  ;;  %v4204_v13 = vcombine.high %v369_v5, %v373_v6  ;;  %v430_v5 = vld [vmem:[#allocation2 + $0xa78] sm:$0xff] }
 0x194   :  { %3600 = vmatprep.subr.bf16.mxu0 %v4148_v14  ;;  %3764 = vmatprep.subr.bf16.mxu1 %v4150_v31  ;;  %v4206_v14 = vcombine.high %v370_v7, %v374_v8  ;;  %v377_v31 = vld [vmem:[#allocation2 + $0x8d0] sm:$0xff] }
 0x195   :  { %v4211_v27 = vcombine.low %v377_v31, %v381_v34 }
 0x197   :  { %3601 = vmatpush1.bf16.msra.mxu0 %v4147_v19  ;;  %3765 = vmatpush1.bf16.msra.mxu1 %v4149_v59  ;;  %v4212_v19 = vcombine.high %v377_v31, %v381_v34  ;;  %v4214_v59 = vcombine.high %v378_v15, %v382_v17  ;;  %v438_v31 = vld [vmem:[#allocation2 + $0xab8] sm:$0xff] }
 0x198   :  { %3602 = vmatprep.subr.bf16.mxu0 %v4156_v20  ;;  %3766 = vmatprep.subr.bf16.mxu1 %v4158_v21  ;;  %v385_v20 = vld [vmem:[#allocation2 + $0x910] sm:$0xff] }
 0x199   :  { %v389_v21 = vld [vmem:[#allocation2 + $0x930] sm:$0xff] }
 0x19a   :  { %v4219_v36 = vcombine.low %v385_v20, %v389_v21 }
 0x19b   :  { %3603 = vmatpush1.bf16.msra.mxu0 %v4155_v29  ;;  %3767 = vmatpush1.bf16.msra.mxu1 %v4157_v30  ;;  %v4220_v29 = vcombine.high %v385_v20, %v389_v21  ;;  %v393_v30 = vld [vmem:[#allocation2 + $0x950] sm:$0xff]  ;;  %v446_v20 = vld [vmem:[#allocation2 + $0xaf8] sm:$0xff] }
 0x19c   :  { %3604 = vmatprep.subr.bf16.mxu0 %v4164_v32  ;;  %3768 = vmatprep.subr.bf16.mxu1 %v4166_v33  ;;  %v397_v32 = vld [vmem:[#allocation2 + $0x970] sm:$0xff]  ;;  %v394_v33 = vld [vmem:[#allocation2 + $0x958] sm:$0xff] }
 0x19d   :  { %v4228_v37 = vcombine.high %v393_v30, %v397_v32  ;;  %v4227_v43 = vcombine.low %v393_v30, %v397_v32  ;;  %v4229_v45 = vcombine.low %v394_v33, %v398_v35  ;;  %v454_v30 = vld [vmem:[#allocation2 + $0xb38] sm:$0xff] }
 0x19f   :  { %3605 = vmatpush1.bf16.msra.mxu0 %v4163_v55  ;;  %3769 = vmatpush1.bf16.msra.mxu1 %v4165_v38  ;;  %v4230_v55 = vcombine.high %v394_v33, %v398_v35  ;;  %v401_v38 = vld [vmem:[#allocation2 + $0x990] sm:$0xff] }
 0x1a0   :  { %3606 = vmatprep.subr.bf16.mxu0 %v4172_v39  ;;  %3770 = vmatprep.subr.bf16.mxu1 %v4174_v40  ;;  %v405_v39 = vld [vmem:[#allocation2 + $0x9b0] sm:$0xff]  ;;  %v402_v40 = vld [vmem:[#allocation2 + $0x998] sm:$0xff] }
 0x1a1   :  { %v4236_v46 = vcombine.high %v401_v38, %v405_v39  ;;  %v4235_v54 = vcombine.low %v401_v38, %v405_v39  ;;  %v4237_v16 = vcombine.low %v402_v40, %v406_v42  ;;  %v462_v38 = vld [vmem:[#allocation2 + $0xb78] sm:$0xff] }
 0x1a3   :  { %3607 = vmatpush1.bf16.msra.mxu0 %v4171_v47  ;;  %3771 = vmatpush1.bf16.msra.mxu1 %v4173_v48  ;;  %v4238_v47 = vcombine.high %v402_v40, %v406_v42  ;;  %v409_v48 = vld [vmem:[#allocation2 + $0x9d0] sm:$0xff] }
 0x1a4   :  { %3608 = vmatprep.subr.bf16.mxu0 %v4180_v49  ;;  %3772 = vmatprep.subr.bf16.mxu1 %v4182_v50  ;;  %v413_v49 = vld [vmem:[#allocation2 + $0x9f0] sm:$0xff]  ;;  %v410_v50 = vld [vmem:[#allocation2 + $0x9d8] sm:$0xff] }
 0x1a5   :  { %v4244_v56 = vcombine.high %v409_v48, %v413_v49  ;;  %v4243_v61 = vcombine.low %v409_v48, %v413_v49  ;;  %v4245_v62 = vcombine.low %v410_v50, %v414_v52  ;;  %v470_v48 = vld [vmem:[#allocation2 + $0xbb8] sm:$0xff] }
 0x1a7   :  { %3609 = vmatpush1.bf16.msra.mxu0 %v4179_v57  ;;  %3773 = vmatpush1.bf16.msra.mxu1 %v4181_v58  ;;  %v4246_v57 = vcombine.high %v410_v50, %v414_v52  ;;  %v417_v58 = vld [vmem:[#allocation2 + $0xa10] sm:$0xff] }
 0x1a8   :  { %3619 = vmatprep.subr.bf16.mxu0 %v4188_v23  ;;  %3783 = vmatprep.subr.bf16.mxu1 %v4190_v9  ;;  %v421_v23 = vld [vmem:[#allocation2 + $0xa30] sm:$0xff]  ;;  %v418_v9 = vld [vmem:[#allocation2 + $0xa18] sm:$0xff] }
 0x1a9   :  { %v4252_v0 = vcombine.high %v417_v58, %v421_v23  ;;  %v4251_v6 = vcombine.low %v417_v58, %v421_v23  ;;  %v478_v58 = vld [vmem:[#allocation2 + $0xbf8] sm:$0xff] }
 0x1aa   :  { %3611 = vmatmul.mubr.bf16.vlgmr.msra.gmra.mrb[4].mxu0 %v4675_v41  ;;  %3775 = vmatmul.mubr.bf16.vlgmr.msra.gmra.mrb[4].mxu1 %v4675_v41  ;;  %v4205_v41 = vcombine.low %v370_v7, %v374_v8  ;;  %v4253_v7 = vcombine.low %v418_v9, %v422_v60 }
 0x1ab   :  { %3620 = vmatpush1.bf16.msra.mxu0 %v4187_v1  ;;  %3784 = vmatpush1.bf16.msra.mxu1 %v4189_v3  ;;  %v4254_v1 = vcombine.high %v418_v9, %v422_v60  ;;  %v425_v3 = vld [vmem:[#allocation2 + $0xa50] sm:$0xff] }
 0x1ac   :  { %3621 = vmatprep.subr.bf16.mxu0 %v4196_v4  ;;  %3785 = vmatprep.subr.bf16.mxu1 %v4198_v25  ;;  %v429_v4 = vld [vmem:[#allocation2 + $0xa70] sm:$0xff]  ;;  %v426_v25 = vld [vmem:[#allocation2 + $0xa58] sm:$0xff] }
 0x1ad   :  { %3651 = vmatprep.mubr.bf16.mxu0 %v4677_v51  ;;  %3815 = vmatprep.mubr.bf16.mxu1 %v4677_v51  ;;  %v4222_v51 = vcombine.high %v386_v22, %v390_v24  ;;  %v4260_v8 = vcombine.high %v425_v3, %v429_v4  ;;  %v4259_v34 = vcombine.low %v425_v3, %v429_v4  ;;  %v486_v3 = vld [vmem:[#allocation2 + $0xc38] sm:$0xff] }
 0x1ae   :  { %v4261_v15 = vcombine.low %v426_v25, %v430_v5 }
 0x1af   :  { %3622 = vmatpush1.bf16.msra.mxu0 %v4195_v10  ;;  %3786 = vmatpush1.bf16.msra.mxu1 %v4197_v11  ;;  %v4262_v10 = vcombine.high %v426_v25, %v430_v5  ;;  %v433_v11 = vld [vmem:[#allocation2 + $0xa90] sm:$0xff] }
 0x1b0   :  { %3623 = vmatprep.subr.bf16.mxu0 %v4204_v13  ;;  %3787 = vmatprep.subr.bf16.mxu1 %v4206_v14  ;;  %v437_v13 = vld [vmem:[#allocation2 + $0xab0] sm:$0xff]  ;;  %v434_v14 = vld [vmem:[#allocation2 + $0xa98] sm:$0xff] }
 0x1b1   :  { %v4268_v17 = vcombine.high %v433_v11, %v437_v13  ;;  %v4267_v21 = vcombine.low %v433_v11, %v437_v13  ;;  %v4269_v22 = vcombine.low %v434_v14, %v438_v31  ;;  %v494_v11 = vld [vmem:[#allocation2 + $0xc78] sm:$0xff] }
 0x1b3   :  { %3624 = vmatpush1.bf16.msra.mxu0 %v4203_v18  ;;  %3788 = vmatpush1.bf16.msra.mxu1 %v4205_v41  ;;  %v4270_v18 = vcombine.high %v434_v14, %v438_v31  ;;  %v441_v41 = vld [vmem:[#allocation2 + $0xad0] sm:$0xff] }
 0x1b4   :  { %3625 = vmatprep.subr.bf16.mxu0 %v4212_v19  ;;  %3789 = vmatprep.subr.bf16.mxu1 %v4214_v59  ;;  %v445_v19 = vld [vmem:[#allocation2 + $0xaf0] sm:$0xff]  ;;  %v442_v59 = vld [vmem:[#allocation2 + $0xad8] sm:$0xff] }
 0x1b5   :  { %v4276_v24 = vcombine.high %v441_v41, %v445_v19  ;;  %v4275_v32 = vcombine.low %v441_v41, %v445_v19  ;;  %v4277_v33 = vcombine.low %v442_v59, %v446_v20  ;;  %v502_v41 = vld [vmem:[#allocation2 + $0xcb8] sm:$0xff] }
 0x1b7   :  { %3626 = vmatpush1.bf16.msra.mxu0 %v4211_v27  ;;  %3790 = vmatpush1.bf16.msra.mxu1 %v4213_v28  ;;  %v4278_v27 = vcombine.high %v442_v59, %v446_v20  ;;  %v449_v28 = vld [vmem:[#allocation2 + $0xb10] sm:$0xff] }
 0x1b8   :  { %3627 = vmatprep.subr.bf16.mxu0 %v4220_v29  ;;  %3791 = vmatprep.subr.bf16.mxu1 %v4222_v51  ;;  %v453_v29 = vld [vmem:[#allocation2 + $0xb30] sm:$0xff]  ;;  %v450_v51 = vld [vmem:[#allocation2 + $0xb18] sm:$0xff] }
 0x1b9   :  { %v4284_v35 = vcombine.high %v449_v28, %v453_v29  ;;  %v4283_v39 = vcombine.low %v449_v28, %v453_v29  ;;  %v4285_v40 = vcombine.low %v450_v51, %v454_v30  ;;  %v510_v28 = vld [vmem:[#allocation2 + $0xcf8] sm:$0xff] }
 0x1bb   :  { %3628 = vmatpush1.bf16.msra.mxu0 %v4219_v36  ;;  %3792 = vmatpush1.bf16.msra.mxu1 %v4221_v63  ;;  %v4286_v36 = vcombine.high %v450_v51, %v454_v30  ;;  %v457_v63 = vld [vmem:[#allocation2 + $0xb50] sm:$0xff] }
 0x1bc   :  { %3629 = vmatprep.subr.bf16.mxu0 %v4228_v37  ;;  %3793 = vmatprep.subr.bf16.mxu1 %v4230_v55  ;;  %v461_v37 = vld [vmem:[#allocation2 + $0xb70] sm:$0xff]  ;;  %v458_v55 = vld [vmem:[#allocation2 + $0xb58] sm:$0xff] }
 0x1bd   :  { %v4292_v42 = vcombine.high %v457_v63, %v461_v37  ;;  %v4291_v49 = vcombine.low %v457_v63, %v461_v37  ;;  %v4293_v50 = vcombine.low %v458_v55, %v462_v38 }
 0x1bf   :  { %3630 = vmatpush1.bf16.msra.mxu0 %v4227_v43  ;;  %3794 = vmatpush1.bf16.msra.mxu1 %v4229_v45  ;;  %v4294_v43 = vcombine.high %v458_v55, %v462_v38  ;;  %v465_v45 = vld [vmem:[#allocation2 + $0xb90] sm:$0xff] }
 0x1c0   :  { %3631 = vmatprep.subr.bf16.mxu0 %v4236_v46  ;;  %3795 = vmatprep.subr.bf16.mxu1 %v4238_v47  ;;  %v469_v46 = vld [vmem:[#allocation2 + $0xbb0] sm:$0xff]  ;;  %v466_v47 = vld [vmem:[#allocation2 + $0xb98] sm:$0xff] }
 0x1c1   :  { %v4300_v52 = vcombine.high %v465_v45, %v469_v46  ;;  %v4299_v23 = vcombine.low %v465_v45, %v469_v46  ;;  %v4301_v9 = vcombine.low %v466_v47, %v470_v48  ;;  %v521_v38 = vld [vmem:[#allocation2 + $0xd50] sm:$0xff]  ;;  %v4721_v46 = vld [vmem:[#allocation5] sm:$0xff] }
 0x1c3   :  { %3632 = vmatpush1.bf16.msra.mxu0 %v4235_v54  ;;  %3796 = vmatpush1.bf16.msra.mxu1 %v4237_v16  ;;  %v4302_v54 = vcombine.high %v466_v47, %v470_v48  ;;  %v473_v16 = vld [vmem:[#allocation2 + $0xbd0] sm:$0xff]  ;;  %v619_v47 = vsub.s32 2, %v4625_v44  ;;  %v615_v48 = vsub.s32 1, %v4625_v44 }
 0x1c4   :  { %3633 = vmatprep.subr.bf16.mxu0 %v4244_v56  ;;  %3797 = vmatprep.subr.bf16.mxu1 %v4246_v57  ;;  %v477_v56 = vld [vmem:[#allocation2 + $0xbf0] sm:$0xff]  ;;  %v474_v57 = vld [vmem:[#allocation2 + $0xbd8] sm:$0xff] }
 0x1c5   :  { %v4308_v60 = vcombine.high %v473_v16, %v477_v56  ;;  %v4307_v4 = vcombine.low %v473_v16, %v477_v56  ;;  %v4309_v25 = vcombine.low %v474_v57, %v478_v58  ;;  %v529_v16 = vld [vmem:[#allocation2 + $0xd90] sm:$0xff] }
 0x1c6   :  { %v533_v56 = vld [vmem:[#allocation2 + $0xdb0] sm:$0xff] }
 0x1c7   :  { %3634 = vmatpush1.bf16.msra.mxu0 %v4243_v61  ;;  %3798 = vmatpush1.bf16.msra.mxu1 %v4245_v62  ;;  %v4310_v61 = vcombine.high %v474_v57, %v478_v58  ;;  %v481_v62 = vld [vmem:[#allocation2 + $0xc10] sm:$0xff]  ;;  %v530_v58 = vld [vmem:[#allocation2 + $0xd98] sm:$0xff] }
 0x1c8   :  { %3635 = vmatprep.subr.bf16.mxu0 %v4252_v0  ;;  %3799 = vmatprep.subr.bf16.mxu1 %v4254_v1  ;;  %v485_v0 = vld [vmem:[#allocation2 + $0xc30] sm:$0xff]  ;;  %v482_v1 = vld [vmem:[#allocation2 + $0xc18] sm:$0xff] }
 0x1c9   :  { %v4316_v5 = vcombine.high %v481_v62, %v485_v0  ;;  %v4315_v13 = vcombine.low %v481_v62, %v485_v0  ;;  %v4317_v14 = vcombine.low %v482_v1, %v486_v3 }
 0x1cb   :  { %3636 = vmatpush1.bf16.msra.mxu0 %v4251_v6  ;;  %3800 = vmatpush1.bf16.msra.mxu1 %v4253_v7  ;;  %v4318_v6 = vcombine.high %v482_v1, %v486_v3  ;;  %v489_v7 = vld [vmem:[#allocation2 + $0xc50] sm:$0xff]  ;;  %v4364_v1 = vcombine.high %v529_v16, %v533_v56 }
 0x1cc   :  { %3637 = vmatprep.subr.bf16.mxu0 %v4260_v8  ;;  %3801 = vmatprep.subr.bf16.mxu1 %v4262_v10  ;;  %v493_v8 = vld [vmem:[#allocation2 + $0xc70] sm:$0xff]  ;;  %v490_v10 = vld [vmem:[#allocation2 + $0xc58] sm:$0xff] }
 0x1cd   :  { %v4324_v31 = vcombine.high %v489_v7, %v493_v8  ;;  %v4323_v19 = vcombine.low %v489_v7, %v493_v8  ;;  %v4325_v59 = vcombine.low %v490_v10, %v494_v11 }
 0x1cf   :  { %3638 = vmatpush1.bf16.msra.mxu0 %v4259_v34  ;;  %3802 = vmatpush1.bf16.msra.mxu1 %v4261_v15  ;;  %v4326_v34 = vcombine.high %v490_v10, %v494_v11  ;;  %v497_v15 = vld [vmem:[#allocation2 + $0xc90] sm:$0xff]  ;;  %v538_v10 = vld [vmem:[#allocation2 + $0xdd8] sm:$0xff] }
 0x1d0   :  { %3639 = vmatprep.subr.bf16.mxu0 %v4268_v17  ;;  %3803 = vmatprep.subr.bf16.mxu1 %v4270_v18  ;;  %v501_v17 = vld [vmem:[#allocation2 + $0xcb0] sm:$0xff]  ;;  %v498_v18 = vld [vmem:[#allocation2 + $0xc98] sm:$0xff] }
 0x1d1   :  { %v4332_v20 = vcombine.high %v497_v15, %v501_v17  ;;  %v4331_v29 = vcombine.low %v497_v15, %v501_v17  ;;  %v542_v11 = vld [vmem:[#allocation2 + $0xdf8] sm:$0xff]  ;;  %v4363_v15 = vcombine.low %v529_v16, %v533_v56  ;;  %v569_v56 = vld [vmem:[#allocation2 + $0xed0] sm:$0xff] }
 0x1d3   :  { %3640 = vmatpush1.bf16.msra.mxu0 %v4267_v21  ;;  %3804 = vmatpush1.bf16.msra.mxu1 %v4269_v22  ;;  %v4334_v21 = vcombine.high %v498_v18, %v502_v41  ;;  %v505_v22 = vld [vmem:[#allocation2 + $0xcd0] sm:$0xff] }
 0x1d4   :  { %3641 = vmatprep.subr.bf16.mxu0 %v4276_v24  ;;  %3805 = vmatprep.subr.bf16.mxu1 %v4278_v27  ;;  %v509_v24 = vld [vmem:[#allocation2 + $0xcf0] sm:$0xff]  ;;  %v506_v27 = vld [vmem:[#allocation2 + $0xcd8] sm:$0xff] }
 0x1d5   :  { %v4340_v51 = vcombine.high %v505_v22, %v509_v24  ;;  %v4342_v30 = vcombine.high %v506_v27, %v510_v28  ;;  %v4339_v63 = vcombine.low %v505_v22, %v509_v24  ;;  %v4341_v37 = vcombine.low %v506_v27, %v510_v28  ;;  %v545_v24 = vld [vmem:[#allocation2 + $0xe10] sm:$0xff] }
 0x1d6   :  { %v4374_v22 = vcombine.high %v538_v10, %v542_v11  ;;  %v549_v27 = vld [vmem:[#allocation2 + $0xe30] sm:$0xff] }
 0x1d7   :  { %3642 = vmatpush1.bf16.msra.mxu0 %v4275_v32  ;;  %3806 = vmatpush1.bf16.msra.mxu1 %v4277_v33  ;;  %v513_v32 = vld [vmem:[#allocation2 + $0xd10] sm:$0xff] }
 0x1d8   :  { %3643 = vmatprep.subr.bf16.mxu0 %v4284_v35  ;;  %3807 = vmatprep.subr.bf16.mxu1 %v4286_v36  ;;  %v517_v33 = vld [vmem:[#allocation2 + $0xd30] sm:$0xff]  ;;  %v514_v35 = vld [vmem:[#allocation2 + $0xd18] sm:$0xff] }
 0x1d9   :  { %v518_v36 = vld [vmem:[#allocation2 + $0xd38] sm:$0xff]  ;;  %v4348_v55 = vcombine.high %v513_v32, %v517_v33  ;;  %v4347_v45 = vcombine.low %v513_v32, %v517_v33  ;;  %v4373_v33 = vcombine.low %v538_v10, %v542_v11  ;;  %v589_v10 = vld [vmem:[#allocation2 + $0xf70] sm:$0xff] }
 0x1da   :  { %v586_v11 = vld [vmem:[#allocation2 + $0xf58] sm:$0xff] }
 0x1db   :  { %3644 = vmatpush1.bf16.msra.mxu0 %v4283_v39  ;;  %3808 = vmatpush1.bf16.msra.mxu1 %v4285_v40  ;;  %v525_v39 = vld [vmem:[#allocation2 + $0xd70] sm:$0xff]  ;;  %v611_v40 = vsub.s32 0, %v4625_v44 }
 0x1dc   :  { %3645 = vmatprep.subr.bf16.mxu0 %v4292_v42  ;;  %3809 = vmatprep.subr.bf16.mxu1 %v4294_v43  ;;  %v522_v42 = vld [vmem:[#allocation2 + $0xd58] sm:$0xff] }
 0x1dd   :  { %v526_v43 = vld [vmem:[#allocation2 + $0xd78] sm:$0xff]  ;;  %v612_v57 = vrot.slane %v4721_v46, %v611_v40 }
 0x1de   :  { %v4357_v0 = vcombine.low %v522_v42, %v526_v43 }
 0x1df   :  { %3646 = vmatpush1.bf16.msra.mxu0 %v4291_v49  ;;  %3810 = vmatpush1.bf16.msra.mxu1 %v4293_v50  ;;  %v4349_v49 = vcombine.low %v514_v35, %v518_v36  ;;  %v623_v50 = vsub.s32 3, %v4625_v44 }
 0x1e0   :  { %3647 = vmatprep.subr.bf16.mxu0 %v4300_v52  ;;  %3811 = vmatprep.subr.bf16.mxu1 %v4302_v54  ;;  %v4356_v52 = vcombine.high %v521_v38, %v525_v39  ;;  %v4358_v54 = vcombine.high %v522_v42, %v526_v43 }
 0x1e1   :  { %v624_v62 = vrot.slane %v4721_v46, %v623_v50 }
 0x1e3   :  { %3648 = vmatpush1.bf16.msra.mxu0 %v4299_v23  ;;  %3812 = vmatpush1.bf16.msra.mxu1 %v4301_v9  ;;  %v534_v23 = vld [vmem:[#allocation2 + $0xdb8] sm:$0xff]  ;;  %v620_v9 = vrot.slane %v4721_v46, %v619_v47  ;;  %v565_v47 = vld [vmem:[#allocation2 + $0xeb0] sm:$0xff] }
 0x1e4   :  { %3649 = vmatprep.subr.bf16.mxu0 %v4308_v60  ;;  %3813 = vmatprep.subr.bf16.mxu1 %v4310_v61  ;;  %v616_v60 = vrot.slane %v4721_v46, %v615_v48  ;;  %v4355_v61 = vcombine.low %v521_v38, %v525_v39  ;;  %v4379_v39 = vcombine.low %v545_v24, %v549_v27  ;;  %v562_v48 = vld [vmem:[#allocation2 + $0xe98] sm:$0xff] }
 0x1e7   :  { %3650 = vmatpush1.bf16.msra.mxu0 %v4307_v4  ;;  %3814 = vmatpush1.bf16.msra.mxu1 %v4309_v25  ;;  %v4366_v4 = vcombine.high %v530_v58, %v534_v23  ;;  %v537_v25 = vld [vmem:[#allocation2 + $0xdd0] sm:$0xff] }
 0x1e8   :  { %3660 = vmatprep.subr.bf16.mxu0 %v4316_v5  ;;  %3824 = vmatprep.subr.bf16.mxu1 %v4318_v6  ;;  %v541_v5 = vld [vmem:[#allocation2 + $0xdf0] sm:$0xff] }
 0x1ea   :  { %3652 = vmatmul.mubr.bf16.vlgmr.msra.gmra.mrb[4].mxu0 %v4692_v2  ;;  %3816 = vmatmul.mubr.bf16.vlgmr.msra.gmra.mrb[4].mxu1 %v4692_v2  ;;  %v4333_v2 = vcombine.low %v498_v18, %v502_v41 }
 0x1eb   :  { %3661 = vmatpush1.bf16.msra.mxu0 %v4315_v13  ;;  %3825 = vmatpush1.bf16.msra.mxu1 %v4317_v14 }
 0x1ec   :  { %3662 = vmatprep.subr.bf16.mxu0 %v4324_v31  ;;  %3826 = vmatprep.subr.bf16.mxu1 %v4326_v34 }
 0x1ed   :  { %3692 = vmatprep.mubr.bf16.mxu0 %v4694_v12  ;;  %3856 = vmatprep.mubr.bf16.mxu1 %v4694_v12  ;;  %v4350_v12 = vcombine.high %v514_v35, %v518_v36  ;;  %v4380_v35 = vcombine.high %v545_v24, %v549_v27  ;;  %v601_v24 = vld [vmem:[#allocation2 + $0xfd0] sm:$0xff] }
 0x1ee   :  { %v605_v27 = vld [vmem:[#allocation2 + $0xff0] sm:$0xff] }
 0x1ef   :  { %3663 = vmatpush1.bf16.msra.mxu0 %v4323_v19  ;;  %3827 = vmatpush1.bf16.msra.mxu1 %v4325_v59  ;;  %v4365_v19 = vcombine.low %v530_v58, %v534_v23  ;;  %v4372_v59 = vcombine.high %v537_v25, %v541_v5  ;;  %v570_v58 = vld [vmem:[#allocation2 + $0xed8] sm:$0xff] }
 0x1f0   :  { %3664 = vmatprep.subr.bf16.mxu0 %v4332_v20  ;;  %3828 = vmatprep.subr.bf16.mxu1 %v4334_v21  ;;  %v574_v23 = vld [vmem:[#allocation2 + $0xef8] sm:$0xff] }
 0x1f3   :  { %3665 = vmatpush1.bf16.msra.mxu0 %v4331_v29  ;;  %3829 = vmatpush1.bf16.msra.mxu1 %v4333_v2  ;;  %v546_v29 = vld [vmem:[#allocation2 + $0xe18] sm:$0xff] }
 0x1f4   :  { %3666 = vmatprep.subr.bf16.mxu0 %v4340_v51  ;;  %3830 = vmatprep.subr.bf16.mxu1 %v4342_v30  ;;  %v550_v2 = vld [vmem:[#allocation2 + $0xe38] sm:$0xff]  ;;  %v4371_v30 = vcombine.low %v537_v25, %v541_v5  ;;  %v4405_v5 = vcombine.low %v570_v58, %v574_v23 }
 0x1f5   :  { %v4382_v36 = vcombine.high %v546_v29, %v550_v2  ;;  %v4381_v40 = vcombine.low %v546_v29, %v550_v2  ;;  %v606_v29 = vld [vmem:[#allocation2 + $0xff8] sm:$0xff] }
 0x1f7   :  { %3667 = vmatpush1.bf16.msra.mxu0 %v4339_v63  ;;  %3831 = vmatpush1.bf16.msra.mxu1 %v4341_v37  ;;  %v553_v63 = vld [vmem:[#allocation2 + $0xe50] sm:$0xff] }
 0x1f8   :  { %3668 = vmatprep.subr.bf16.mxu0 %v4348_v55  ;;  %3832 = vmatprep.subr.bf16.mxu1 %v4350_v12  ;;  %v557_v37 = vld [vmem:[#allocation2 + $0xe70] sm:$0xff]  ;;  %v554_v55 = vld [vmem:[#allocation2 + $0xe58] sm:$0xff] }
 0x1f9   :  { %v558_v12 = vld [vmem:[#allocation2 + $0xe78] sm:$0xff]  ;;  %v4388_v42 = vcombine.high %v553_v63, %v557_v37  ;;  %v4387_v50 = vcombine.low %v553_v63, %v557_v37  ;;  %v635_v63 = vsub.s32 6, %v4625_v44  ;;  %v631_v37 = vsub.s32 5, %v4625_v44 }
 0x1fa   :  { %v4390_v43 = vcombine.high %v554_v55, %v558_v12 }
 0x1fb   :  { %3669 = vmatpush1.bf16.msra.mxu0 %v4347_v45  ;;  %3833 = vmatpush1.bf16.msra.mxu1 %v4349_v49  ;;  %v561_v45 = vld [vmem:[#allocation2 + $0xe90] sm:$0xff]  ;;  %v566_v49 = vld [vmem:[#allocation2 + $0xeb8] sm:$0xff] }
 0x1fc   :  { %3670 = vmatprep.subr.bf16.mxu0 %v4356_v52  ;;  %3834 = vmatprep.subr.bf16.mxu1 %v4358_v54  ;;  %v4389_v52 = vcombine.low %v554_v55, %v558_v12  ;;  %v4396_v54 = vcombine.high %v561_v45, %v565_v47  ;;  %v4398_v16 = vcombine.high %v562_v48, %v566_v49  ;;  %v639_v55 = vsub.s32 7, %v4625_v44 }
 0x1fd   :  { %v3366_v3 = vpop.f32.mrb[0].mxu0  ;;  %v3530_v7 = vpop.f32.mrb[0].mxu1 }
 0x1fe   :  { %v4439_v6 = vadd.f32 %v3366_v3, %v612_v57  ;;  %v3368_v8 = vpop.f32.mrb[1].mxu0  ;;  %v4441_v13 = vadd.f32 %v3530_v7, %v620_v9  ;;  %v3532_v31 = vpop.f32.mrb[1].mxu1  ;;  %v573_v57 = vld [vmem:[#allocation2 + $0xef0] sm:$0xff]  ;;  %v4395_v9 = vcombine.low %v561_v45, %v565_v47  ;;  %v578_v3 = vld [vmem:[#allocation2 + $0xf18] sm:$0xff] }
 0x1ff   :  { %v4440_v14 = vadd.f32 %v3368_v8, %v616_v60  ;;  %v3370_v34 = vpop.f32.mrb[2].mxu0  ;;  %3671 = vmatpush1.bf16.msra.mxu0 %v4355_v61  ;;  %v4442_v17 = vadd.f32 %v3532_v31, %v624_v62  ;;  %v3534_v18 = vpop.f32.mrb[2].mxu1  ;;  %3835 = vmatpush1.bf16.msra.mxu1 %v4357_v0  ;;  %v4397_v60 = vcombine.low %v562_v48, %v566_v49  ;;  %v577_v0 = vld [vmem:[#allocation2 + $0xf10] sm:$0xff] }
 0x200   :  { %v3371_v41 = vpop.f32.mrb[3].mxu0  ;;  %3672 = vmatprep.subr.bf16.mxu0 %v4364_v1  ;;  %v3535_v21 = vpop.f32.mrb[3].mxu1  ;;  %3836 = vmatprep.subr.bf16.mxu1 %v4366_v4  ;;  %v4404_v61 = vcombine.high %v569_v56, %v573_v57  ;;  %v4406_v62 = vcombine.high %v570_v58, %v574_v23  ;;  %v581_v1 = vld [vmem:[#allocation2 + $0xf30] sm:$0xff]  ;;  %v582_v4 = vld [vmem:[#allocation2 + $0xf38] sm:$0xff]  ;;  %v4403_v25 = vcombine.low %v569_v56, %v573_v57 }
 0x201   :  { %v3873_v20 = vcombine.low %v4439_v6, %v4440_v14  ;;  %v3874_v28 = vcombine.low %v4441_v13, %v4442_v17  ;;  %v4412_v6 = vcombine.high %v577_v0, %v581_v1  ;;  %v4414_v7 = vcombine.high %v578_v3, %v582_v4  ;;  %v585_v8 = vld [vmem:[#allocation2 + $0xf50] sm:$0xff]  ;;  %v590_v13 = vld [vmem:[#allocation2 + $0xf78] sm:$0xff] }
 0x202   :  { %v4411_v14 = vcombine.low %v577_v0, %v581_v1  ;;  %v4413_v31 = vcombine.low %v578_v3, %v582_v4  ;;  %v4420_v34 = vcombine.high %v585_v8, %v589_v10  ;;  %v593_v17 = vld [vmem:[#allocation2 + $0xf90] sm:$0xff]  ;;  %v594_v41 = vld [vmem:[#allocation2 + $0xf98] sm:$0xff] }
 0x203   :  { %v3881_v51 = vrot.slane %v3873_v20, %v4628_v53  ;;  %3673 = vmatpush1.bf16.msra.mxu0 %v4363_v15  ;;  %v3888_v32 = vrot.slane %v3874_v28, %v4628_v53  ;;  %3837 = vmatpush1.bf16.msra.mxu1 %v4365_v19  ;;  %v4422_v15 = vcombine.high %v586_v11, %v590_v13  ;;  %v597_v18 = vld [vmem:[#allocation2 + $0xfb0] sm:$0xff]  ;;  %v598_v19 = vld [vmem:[#allocation2 + $0xfb8] sm:$0xff] }
 0x204   :  { %3674 = vmatprep.subr.bf16.mxu0 %v4372_v59  ;;  %3838 = vmatprep.subr.bf16.mxu1 %v4374_v22  ;;  %v4419_v59 = vcombine.low %v585_v8, %v589_v10  ;;  %v4421_v20 = vcombine.low %v586_v11, %v590_v13  ;;  %v4428_v21 = vcombine.high %v593_v17, %v597_v18  ;;  %v602_v28 = vld [vmem:[#allocation2 + $0xfd8] sm:$0xff] }
 0x205   :  { %v3889_v38 = vcombine.low %v3881_v51, %v3888_v32  ;;  %v4430_v22 = vcombine.high %v594_v41, %v598_v19  ;;  %v4427_v2 = vcombine.low %v593_v17, %v597_v18  ;;  %v4429_v51 = vcombine.low %v594_v41, %v598_v19 }
 0x206   :  { %v4438_v32 = vcombine.high %v602_v28, %v606_v29 }
 0x207   :  { %3675 = vmatpush1.bf16.msra.mxu0 %v4371_v30  ;;  %3839 = vmatpush1.bf16.msra.mxu1 %v4373_v33  ;;  %3909 = vst [vmem:[#allocation7] sm:$0xff] %v3889_v38  ;;  %v4436_v30 = vcombine.high %v601_v24, %v605_v27  ;;  %v4435_v33 = vcombine.low %v601_v24, %v605_v27 }
 0x208   :  { %3676 = vmatprep.subr.bf16.mxu0 %v4380_v35  ;;  %3840 = vmatprep.subr.bf16.mxu1 %v4382_v36  ;;  %v4437_v35 = vcombine.low %v602_v28, %v606_v29  ;;  %v627_v36 = vsub.s32 4, %v4625_v44  ;;  %v636_v38 = vrot.slane %v4721_v46, %v635_v63 }
 0x20a   :  { %v628_v12 = vrot.slane %v4721_v46, %v627_v36 }
 0x20b   :  { %3677 = vmatpush1.bf16.msra.mxu0 %v4379_v39  ;;  %3841 = vmatpush1.bf16.msra.mxu1 %v4381_v40  ;;  %v632_v39 = vrot.slane %v4721_v46, %v631_v37  ;;  %v640_v40 = vrot.slane %v4721_v46, %v639_v55 }
 0x20c   :  { %3678 = vmatprep.subr.bf16.mxu0 %v4388_v42  ;;  %3842 = vmatprep.subr.bf16.mxu1 %v4390_v43 }
 0x20f   :  { %3679 = vmatpush1.bf16.msra.mxu0 %v4387_v50  ;;  %3843 = vmatpush1.bf16.msra.mxu1 %v4389_v52 }
 0x210   :  { %3680 = vmatprep.subr.bf16.mxu0 %v4396_v54  ;;  %3844 = vmatprep.subr.bf16.mxu1 %v4398_v16 }
 0x213   :  { %3681 = vmatpush1.bf16.msra.mxu0 %v4395_v9  ;;  %3845 = vmatpush1.bf16.msra.mxu1 %v4397_v60 }
 0x214   :  { %3682 = vmatprep.subr.bf16.mxu0 %v4404_v61  ;;  %3846 = vmatprep.subr.bf16.mxu1 %v4406_v62 }
 0x217   :  { %3683 = vmatpush1.bf16.msra.mxu0 %v4403_v25  ;;  %3847 = vmatpush1.bf16.msra.mxu1 %v4405_v5 }
 0x218   :  { %3684 = vmatprep.subr.bf16.mxu0 %v4412_v6  ;;  %3848 = vmatprep.subr.bf16.mxu1 %v4414_v7 }
 0x21b   :  { %3685 = vmatpush1.bf16.msra.mxu0 %v4411_v14  ;;  %3849 = vmatpush1.bf16.msra.mxu1 %v4413_v31 }
 0x21c   :  { %3686 = vmatprep.subr.bf16.mxu0 %v4420_v34  ;;  %3850 = vmatprep.subr.bf16.mxu1 %v4422_v15 }
 0x21f   :  { %3687 = vmatpush1.bf16.msra.mxu0 %v4419_v59  ;;  %3851 = vmatpush1.bf16.msra.mxu1 %v4421_v20 }
 0x220   :  { %3688 = vmatprep.subr.bf16.mxu0 %v4428_v21  ;;  %3852 = vmatprep.subr.bf16.mxu1 %v4430_v22 }
 0x223   :  { %3689 = vmatpush1.bf16.msra.mxu0 %v4427_v2  ;;  %3853 = vmatpush1.bf16.msra.mxu1 %v4429_v51 }
 0x224   :  { %3690 = vmatprep.subr.bf16.mxu0 %v4436_v30  ;;  %3854 = vmatprep.subr.bf16.mxu1 %v4438_v32 }
 0x227   :  { %3691 = vmatpush1.bf16.msra.mxu0 %v4435_v33  ;;  %3855 = vmatpush1.bf16.msra.mxu1 %v4437_v35 }
 0x22a   :  { %3693 = vmatmul.mubr.bf16.vlgmr.msra.gmra.mrb[4].mxu0 %v4702_v26  ;;  %3857 = vmatmul.mubr.bf16.vlgmr.msra.gmra.mrb[4].mxu1 %v4702_v26 }
 0x2fd   :  { %v3694_v42 = vpop.f32.mrb[4].mxu0  ;;  %v3858_v45 = vpop.f32.mrb[4].mxu1 }
 0x2fe   :  { %v4443_v43 = vadd.f32 %v3694_v42, %v628_v12  ;;  %v3696_v26 = vpop.f32.mrb[5].mxu0  ;;  %v4445_v47 = vadd.f32 %v3858_v45, %v636_v38  ;;  %v3860_v49 = vpop.f32.mrb[5].mxu1 }
 0x2ff   :  { %v4444_v48 = vadd.f32 %v3696_v26, %v632_v39  ;;  %v3698_v50 = vpop.f32.mrb[6].mxu0  ;;  %v4446_v52 = vadd.f32 %v3860_v49, %v640_v40  ;;  %v3862_v54 = vpop.f32.mrb[6].mxu1 }
 0x300   :  { %v3699_v16 = vpop.f32.mrb[7].mxu0  ;;  %v3863_v56 = vpop.f32.mrb[7].mxu1 }
 0x301   :  { %v3890_v44 = vcombine.low %v4443_v43, %v4444_v48  ;;  %v3891_v57 = vcombine.low %v4445_v47, %v4446_v52 }
 0x303   :  { %v3898_v58 = vrot.slane %v3890_v44, %v4628_v53  ;;  %v3905_v46 = vrot.slane %v3891_v57, %v4628_v53 }
 0x305   :  { %v3906_v23 = vcombine.low %v3898_v58, %v3905_v46 }
 0x307   :  { %3910 = vst [vmem:[#allocation7 + $0x8] sm:$0xff] %v3906_v23 }
 0x308   :  { %4558 = shalt.err (!%p4555_p6)
}
 0x309   :  { %s4559_s17 = scalar_lea.hbm %s4759_s3, 256 }
 0x30a   :  { %p4560_p7 = scmp.ne.s32.totalorder %s4759_s3, %s4559_s17  ;;  %p4563_p8 = scmp.lt.u32.totalorder %s4559_s17, %s4759_s3 }
 0x30c   :  { %p4565_p9 = pnand %p4563_p8, %p4560_p7 }
 0x30e   :  { %4568 = shalt.err (!%p4565_p9)
}
 0x30f   :  { %3920 = dma.vmem_to_hbm [thread:$0]  %s3918_s13, 256, %s4759_s3, [#allocation4]  }
 0x310   :  { %4573 = dma.done.wait [#allocation4], 256  }
 0x311   :  { %4574 = vsyncadd [#allocation4], 4294967040 }
 0x312   :  { %3924 = vsyncpa [#allocation3], 1 }
 0x313   :  { %3925 = vsyncpa [#allocation6], 1 }
 0x314   :  { %3926 = vsyncpa [#allocation4], 1 }

</bundles_post_ra>
